<compile_context>
chip_gen: v6e
topology: v6e:2x2x1
jax: 0.10.0
libtpu: 0.0.40
codegen_flags: <defaults>
</compile_context>

<pallas_src>
import jax
import jax.numpy as jnp
from jax.experimental import pallas as pl
from jax.experimental.pallas import tpu as pltpu

N_CELLS = 108
TIME_STEPS = 3
INPUT_SIZE = TIME_STEPS * N_CELLS   # 324
OUTPUT_SIZE = 2
PADDED_OUTPUT = 128                 # lane-dense final layer; sliced back to 2 outside
LAYER_SIZES = [INPUT_SIZE, 200, 400, 1800, 400, 200, OUTPUT_SIZE]


def _mlp_kernel(x_ref,
                w1_ref, b1_ref,
                w2_ref, b2_ref,
                w2b_ref, b2b_ref,
                w2c_ref, b2c_ref,
                w2d_ref, b2d_ref,
                w3_ref, b3_ref,
                o_ref):
    """One batch tile of the fused MLP: 5x (Linear + ReLU) + final Linear."""

    def linear_f32(h_bf16, w_ref, b_ref):
        # bf16 x bf16 operands, f32 accumulation on the MXU; bias add in f32.
        return jnp.dot(h_bf16, w_ref[...],
                       preferred_element_type=jnp.float32) + b_ref[...]

    h = x_ref[...].astype(jnp.bfloat16)
    for w_ref, b_ref in ((w1_ref, b1_ref), (w2_ref, b2_ref),
                         (w2b_ref, b2b_ref), (w2c_ref, b2c_ref),
                         (w2d_ref, b2d_ref)):
        y = linear_f32(h, w_ref, b_ref)                 # f32
        h = jnp.maximum(y, 0.0).astype(jnp.bfloat16)    # ReLU in f32, cast for next dot
    out = linear_f32(h, w3_ref, b3_ref)                 # final layer, no activation
    o_ref[...] = out.astype(o_ref.dtype)


def init_params(key):
    """Deterministic init mimicking nn.Linear's U(-1/sqrt(fan_in), 1/sqrt(fan_in)).

    Weights stored as (in_features, out_features); biases as (1, out_features).
    Kept in f32 here; the wrapper casts weights to bf16 for the kernel.
    """
    params = []
    for fan_in, fan_out in zip(LAYER_SIZES[:-1], LAYER_SIZES[1:]):
        key, kw, kb = jax.random.split(key, 3)
        bound = 1.0 / jnp.sqrt(jnp.float32(fan_in))
        w = jax.random.uniform(kw, (fan_in, fan_out), jnp.float32, -bound, bound)
        b = jax.random.uniform(kb, (1, fan_out), jnp.float32, -bound, bound)
        params.append((w, b))
    return params


def _round_up(n, m):
    return ((n + m - 1) // m) * m


def ann_mlp_forward(x, params):
    """Run the fused Pallas MLP kernel. x: (batch, 324) f32 -> (batch, 2) f32."""
    batch = x.shape[0]

    # --- batch tiling: tile of up to 256 rows, padded to a multiple of 8 ---
    tb = 256 if batch >= 256 else _round_up(batch, 8)
    padded_batch = _round_up(batch, tb)
    if padded_batch != batch:
        x = jnp.pad(x, ((0, padded_batch - batch), (0, 0)))
    n_tiles = padded_batch // tb

    flat_args = [x]
    in_specs = [pl.BlockSpec((tb, INPUT_SIZE), lambda i: (i, 0))]

    n_layers = len(params)
    for li, (w, b) in enumerate(params):
        if li == n_layers - 1:
            # Pad final layer to 128 lanes (zero columns) for lane-dense stores.
            w = jnp.pad(w, ((0, 0), (0, PADDED_OUTPUT - w.shape[1])))
            b = jnp.pad(b, ((0, 0), (0, PADDED_OUTPUT - b.shape[1])))
        w = w.astype(jnp.bfloat16)       # halve weight HBM bytes, native MXU rate
        b = b.astype(jnp.float32)        # bias added on the f32 accumulator
        flat_args += [w, b]
        in_specs += [
            pl.BlockSpec(w.shape, lambda i: (0, 0)),   # resident across the grid
            pl.BlockSpec(b.shape, lambda i: (0, 0)),
        ]

    out_shape = jax.ShapeDtypeStruct((padded_batch, PADDED_OUTPUT), jnp.float32)
    out_spec = pl.BlockSpec((tb, PADDED_OUTPUT), lambda i: (i, 0))

    out = pl.pallas_call(
        _mlp_kernel,
        out_shape=out_shape,
        grid=(n_tiles,),
        in_specs=in_specs,
        out_specs=out_spec,
        compiler_params=pltpu.CompilerParams(
            dimension_semantics=("parallel",),   # shard batch tiles across TCs (v7x)
            vmem_limit_bytes=32 << 20,           # plenty for ~3.6 MB bf16 weights + tiles
        ),
    )(*flat_args)

    return out[:batch, :OUTPUT_SIZE]


def _reference_forward_f32(x, params):
    """Plain-JAX f32 reference matching the PyTorch forward semantics."""
    h = x
    for i, (w, b) in enumerate(params):
        h = h @ w + b
        if i < len(params) - 1:
            h = jnp.maximum(h, 0.0)
    return h


def _reference_forward_bf16(x, params):
    """Reference mirroring the kernel's precision (bf16 operands, f32 accum)."""
    h = x.astype(jnp.bfloat16)
    for i, (w, b) in enumerate(params):
        y = jnp.dot(h, w.astype(jnp.bfloat16),
                    preferred_element_type=jnp.float32) + b
        if i < len(params) - 1:
            h = jnp.maximum(y, 0.0).astype(jnp.bfloat16)
        else:
            h = y
    return h


if __name__ == "__main__":
    key = jax.random.PRNGKey(0)
    key, kx = jax.random.split(key)

    batch = 8
    x = jax.random.normal(kx, (batch, INPUT_SIZE), jnp.float32)
    params = init_params(key)

    out = jax.block_until_ready(ann_mlp_forward(x, params))
    assert out.shape == (batch, OUTPUT_SIZE), out.shape

    ref_bf16 = _reference_forward_bf16(x, params)
    ref_f32 = _reference_forward_f32(x, params)
    assert jnp.allclose(out, ref_bf16, atol=5e-3, rtol=5e-3), \
        "mismatch vs bf16-precision reference"
    assert jnp.allclose(out, ref_f32, atol=1e-1, rtol=1e-1), \
        "mismatch vs f32 reference"

    print("KERNEL_OK")
</pallas_src>

<mosaic_0001>
module attributes {stable_mosaic.version = 11 : i64} {
  func.func @_mlp_kernel(%arg0: i32, %arg1: memref<8x324xf32, #tpu.memory_space<vmem>>, %arg2: memref<324x200xbf16, #tpu.memory_space<vmem>>, %arg3: memref<1x200xf32, #tpu.memory_space<vmem>>, %arg4: memref<200x400xbf16, #tpu.memory_space<vmem>>, %arg5: memref<1x400xf32, #tpu.memory_space<vmem>>, %arg6: memref<400x1800xbf16, #tpu.memory_space<vmem>>, %arg7: memref<1x1800xf32, #tpu.memory_space<vmem>>, %arg8: memref<1800x400xbf16, #tpu.memory_space<vmem>>, %arg9: memref<1x400xf32, #tpu.memory_space<vmem>>, %arg10: memref<400x200xbf16, #tpu.memory_space<vmem>>, %arg11: memref<1x200xf32, #tpu.memory_space<vmem>>, %arg12: memref<200x128xbf16, #tpu.memory_space<vmem>>, %arg13: memref<1x128xf32, #tpu.memory_space<vmem>>, %arg14: memref<8x128xf32, #tpu.memory_space<vmem>>) attributes {dimension_semantics = [#tpu.dimension_semantics<parallel>], iteration_bounds = array<i64: 1>, scalar_prefetch = 0 : i64, scratch_operands = 0 : i64, tpu.core_type = #tpu.core_type<tc>, window_params = [{transform_indices = @transform_0, window_bounds = array<i64: 8, 324>}, {pipeline_mode = #tpu.pipeline_mode<synchronous>, transform_indices = @transform_1, window_bounds = array<i64: 324, 200>}, {pipeline_mode = #tpu.pipeline_mode<synchronous>, transform_indices = @transform_2, window_bounds = array<i64: 1, 200>}, {pipeline_mode = #tpu.pipeline_mode<synchronous>, transform_indices = @transform_3, window_bounds = array<i64: 200, 400>}, {pipeline_mode = #tpu.pipeline_mode<synchronous>, transform_indices = @transform_4, window_bounds = array<i64: 1, 400>}, {pipeline_mode = #tpu.pipeline_mode<synchronous>, transform_indices = @transform_5, window_bounds = array<i64: 400, 1800>}, {pipeline_mode = #tpu.pipeline_mode<synchronous>, transform_indices = @transform_6, window_bounds = array<i64: 1, 1800>}, {pipeline_mode = #tpu.pipeline_mode<synchronous>, transform_indices = @transform_7, window_bounds = array<i64: 1800, 400>}, {pipeline_mode = #tpu.pipeline_mode<synchronous>, transform_indices = @transform_8, window_bounds = array<i64: 1, 400>}, {pipeline_mode = #tpu.pipeline_mode<synchronous>, transform_indices = @transform_9, window_bounds = array<i64: 400, 200>}, {pipeline_mode = #tpu.pipeline_mode<synchronous>, transform_indices = @transform_10, window_bounds = array<i64: 1, 200>}, {pipeline_mode = #tpu.pipeline_mode<synchronous>, transform_indices = @transform_11, window_bounds = array<i64: 200, 128>}, {pipeline_mode = #tpu.pipeline_mode<synchronous>, transform_indices = @transform_12, window_bounds = array<i64: 1, 128>}, {transform_indices = @transform_13, window_bounds = array<i64: 8, 128>}]} {
    %c0 = arith.constant 0 : index
    %c0_0 = arith.constant 0 : index
    %0 = vector.load %arg1[%c0, %c0_0] : memref<8x324xf32, #tpu.memory_space<vmem>>, vector<8x324xf32>
    %1 = arith.truncf %0 : vector<8x324xf32> to vector<8x324xbf16>
    %c0_1 = arith.constant 0 : index
    %c0_2 = arith.constant 0 : index
    %2 = vector.load %arg2[%c0_1, %c0_2] : memref<324x200xbf16, #tpu.memory_space<vmem>>, vector<324x200xbf16>
    %cst = arith.constant dense<0.000000e+00> : vector<8x200xf32>
    %3 = tpu.matmul %1, %2, %cst {dimension_numbers = #tpu.dot_dimension_numbers<[1], [0], [0], [1], [0, 0, 1, 1], [], []>} : vector<8x324xbf16>, vector<324x200xbf16>, vector<8x200xf32> -> vector<8x200xf32>
    %c0_3 = arith.constant 0 : index
    %c0_4 = arith.constant 0 : index
    %4 = vector.load %arg3[%c0_3, %c0_4] : memref<1x200xf32, #tpu.memory_space<vmem>>, vector<1x200xf32>
    %5 = vector.broadcast %4 : vector<1x200xf32> to vector<8x200xf32>
    %6 = arith.addf %3, %5 : vector<8x200xf32>
    %cst_5 = arith.constant 0.000000e+00 : f32
    %7 = vector.broadcast %cst_5 : f32 to vector<8x200xf32>
    %8 = arith.maximumf %6, %7 : vector<8x200xf32>
    %9 = arith.truncf %8 : vector<8x200xf32> to vector<8x200xbf16>
    %c0_6 = arith.constant 0 : index
    %c0_7 = arith.constant 0 : index
    %10 = vector.load %arg4[%c0_6, %c0_7] : memref<200x400xbf16, #tpu.memory_space<vmem>>, vector<200x400xbf16>
    %cst_8 = arith.constant dense<0.000000e+00> : vector<8x400xf32>
    %11 = tpu.matmul %9, %10, %cst_8 {dimension_numbers = #tpu.dot_dimension_numbers<[1], [0], [0], [1], [0, 0, 1, 1], [], []>} : vector<8x200xbf16>, vector<200x400xbf16>, vector<8x400xf32> -> vector<8x400xf32>
    %c0_9 = arith.constant 0 : index
    %c0_10 = arith.constant 0 : index
    %12 = vector.load %arg5[%c0_9, %c0_10] : memref<1x400xf32, #tpu.memory_space<vmem>>, vector<1x400xf32>
    %13 = vector.broadcast %12 : vector<1x400xf32> to vector<8x400xf32>
    %14 = arith.addf %11, %13 : vector<8x400xf32>
    %cst_11 = arith.constant 0.000000e+00 : f32
    %15 = vector.broadcast %cst_11 : f32 to vector<8x400xf32>
    %16 = arith.maximumf %14, %15 : vector<8x400xf32>
    %17 = arith.truncf %16 : vector<8x400xf32> to vector<8x400xbf16>
    %c0_12 = arith.constant 0 : index
    %c0_13 = arith.constant 0 : index
    %18 = vector.load %arg6[%c0_12, %c0_13] : memref<400x1800xbf16, #tpu.memory_space<vmem>>, vector<400x1800xbf16>
    %cst_14 = arith.constant dense<0.000000e+00> : vector<8x1800xf32>
    %19 = tpu.matmul %17, %18, %cst_14 {dimension_numbers = #tpu.dot_dimension_numbers<[1], [0], [0], [1], [0, 0, 1, 1], [], []>} : vector<8x400xbf16>, vector<400x1800xbf16>, vector<8x1800xf32> -> vector<8x1800xf32>
    %c0_15 = arith.constant 0 : index
    %c0_16 = arith.constant 0 : index
    %20 = vector.load %arg7[%c0_15, %c0_16] : memref<1x1800xf32, #tpu.memory_space<vmem>>, vector<1x1800xf32>
    %21 = vector.broadcast %20 : vector<1x1800xf32> to vector<8x1800xf32>
    %22 = arith.addf %19, %21 : vector<8x1800xf32>
    %cst_17 = arith.constant 0.000000e+00 : f32
    %23 = vector.broadcast %cst_17 : f32 to vector<8x1800xf32>
    %24 = arith.maximumf %22, %23 : vector<8x1800xf32>
    %25 = arith.truncf %24 : vector<8x1800xf32> to vector<8x1800xbf16>
    %c0_18 = arith.constant 0 : index
    %c0_19 = arith.constant 0 : index
    %26 = vector.load %arg8[%c0_18, %c0_19] : memref<1800x400xbf16, #tpu.memory_space<vmem>>, vector<1800x400xbf16>
    %cst_20 = arith.constant dense<0.000000e+00> : vector<8x400xf32>
    %27 = tpu.matmul %25, %26, %cst_20 {dimension_numbers = #tpu.dot_dimension_numbers<[1], [0], [0], [1], [0, 0, 1, 1], [], []>} : vector<8x1800xbf16>, vector<1800x400xbf16>, vector<8x400xf32> -> vector<8x400xf32>
    %c0_21 = arith.constant 0 : index
    %c0_22 = arith.constant 0 : index
    %28 = vector.load %arg9[%c0_21, %c0_22] : memref<1x400xf32, #tpu.memory_space<vmem>>, vector<1x400xf32>
    %29 = vector.broadcast %28 : vector<1x400xf32> to vector<8x400xf32>
    %30 = arith.addf %27, %29 : vector<8x400xf32>
    %cst_23 = arith.constant 0.000000e+00 : f32
    %31 = vector.broadcast %cst_23 : f32 to vector<8x400xf32>
    %32 = arith.maximumf %30, %31 : vector<8x400xf32>
    %33 = arith.truncf %32 : vector<8x400xf32> to vector<8x400xbf16>
    %c0_24 = arith.constant 0 : index
    %c0_25 = arith.constant 0 : index
    %34 = vector.load %arg10[%c0_24, %c0_25] : memref<400x200xbf16, #tpu.memory_space<vmem>>, vector<400x200xbf16>
    %cst_26 = arith.constant dense<0.000000e+00> : vector<8x200xf32>
    %35 = tpu.matmul %33, %34, %cst_26 {dimension_numbers = #tpu.dot_dimension_numbers<[1], [0], [0], [1], [0, 0, 1, 1], [], []>} : vector<8x400xbf16>, vector<400x200xbf16>, vector<8x200xf32> -> vector<8x200xf32>
    %c0_27 = arith.constant 0 : index
    %c0_28 = arith.constant 0 : index
    %36 = vector.load %arg11[%c0_27, %c0_28] : memref<1x200xf32, #tpu.memory_space<vmem>>, vector<1x200xf32>
    %37 = vector.broadcast %36 : vector<1x200xf32> to vector<8x200xf32>
    %38 = arith.addf %35, %37 : vector<8x200xf32>
    %cst_29 = arith.constant 0.000000e+00 : f32
    %39 = vector.broadcast %cst_29 : f32 to vector<8x200xf32>
    %40 = arith.maximumf %38, %39 : vector<8x200xf32>
    %41 = arith.truncf %40 : vector<8x200xf32> to vector<8x200xbf16>
    %c0_30 = arith.constant 0 : index
    %c0_31 = arith.constant 0 : index
    %42 = vector.load %arg12[%c0_30, %c0_31] : memref<200x128xbf16, #tpu.memory_space<vmem>>, vector<200x128xbf16>
    %cst_32 = arith.constant dense<0.000000e+00> : vector<8x128xf32>
    %43 = tpu.matmul %41, %42, %cst_32 {dimension_numbers = #tpu.dot_dimension_numbers<[1], [0], [0], [1], [0, 0, 1, 1], [], []>} : vector<8x200xbf16>, vector<200x128xbf16>, vector<8x128xf32> -> vector<8x128xf32>
    %c0_33 = arith.constant 0 : index
    %c0_34 = arith.constant 0 : index
    %44 = vector.load %arg13[%c0_33, %c0_34] : memref<1x128xf32, #tpu.memory_space<vmem>>, vector<1x128xf32>
    %45 = vector.broadcast %44 : vector<1x128xf32> to vector<8x128xf32>
    %46 = arith.addf %43, %45 : vector<8x128xf32>
    %c0_35 = arith.constant 0 : index
    %c0_36 = arith.constant 0 : index
    %47 = vector.load %arg14[%c0_35, %c0_36] : memref<8x128xf32, #tpu.memory_space<vmem>>, vector<8x128xf32>
    tpu.vector_store %arg14[%c0_35, %c0_36], %46 {strides = array<i32>} : memref<8x128xf32, #tpu.memory_space<vmem>>, vector<8x128xf32>,
    return
  }
  func.func @transform_0(%arg0: i32) -> (i32, i32) {
    %c0_i32 = arith.constant 0 : i32
    %c0_i32_0 = arith.constant 0 : i32
    return %arg0, %c0_i32 : i32, i32
  }
  func.func @transform_1(%arg0: i32) -> (i32, i32) {
    %c0_i32 = arith.constant 0 : i32
    %c0_i32_0 = arith.constant 0 : i32
    %c0_i32_1 = arith.constant 0 : i32
    return %c0_i32, %c0_i32_0 : i32, i32
  }
  func.func @transform_2(%arg0: i32) -> (i32, i32) {
    %c0_i32 = arith.constant 0 : i32
    %c0_i32_0 = arith.constant 0 : i32
    %c0_i32_1 = arith.constant 0 : i32
    return %c0_i32, %c0_i32_0 : i32, i32
  }
  func.func @transform_3(%arg0: i32) -> (i32, i32) {
    %c0_i32 = arith.constant 0 : i32
    %c0_i32_0 = arith.constant 0 : i32
    %c0_i32_1 = arith.constant 0 : i32
    return %c0_i32, %c0_i32_0 : i32, i32
  }
  func.func @transform_4(%arg0: i32) -> (i32, i32) {
    %c0_i32 = arith.constant 0 : i32
    %c0_i32_0 = arith.constant 0 : i32
    %c0_i32_1 = arith.constant 0 : i32
    return %c0_i32, %c0_i32_0 : i32, i32
  }
  func.func @transform_5(%arg0: i32) -> (i32, i32) {
    %c0_i32 = arith.constant 0 : i32
    %c0_i32_0 = arith.constant 0 : i32
    %c0_i32_1 = arith.constant 0 : i32
    return %c0_i32, %c0_i32_0 : i32, i32
  }
  func.func @transform_6(%arg0: i32) -> (i32, i32) {
    %c0_i32 = arith.constant 0 : i32
    %c0_i32_0 = arith.constant 0 : i32
    %c0_i32_1 = arith.constant 0 : i32
    return %c0_i32, %c0_i32_0 : i32, i32
  }
  func.func @transform_7(%arg0: i32) -> (i32, i32) {
    %c0_i32 = arith.constant 0 : i32
    %c0_i32_0 = arith.constant 0 : i32
    %c0_i32_1 = arith.constant 0 : i32
    return %c0_i32, %c0_i32_0 : i32, i32
  }
  func.func @transform_8(%arg0: i32) -> (i32, i32) {
    %c0_i32 = arith.constant 0 : i32
    %c0_i32_0 = arith.constant 0 : i32
    %c0_i32_1 = arith.constant 0 : i32
    return %c0_i32, %c0_i32_0 : i32, i32
  }
  func.func @transform_9(%arg0: i32) -> (i32, i32) {
    %c0_i32 = arith.constant 0 : i32
    %c0_i32_0 = arith.constant 0 : i32
    %c0_i32_1 = arith.constant 0 : i32
    return %c0_i32, %c0_i32_0 : i32, i32
  }
  func.func @transform_10(%arg0: i32) -> (i32, i32) {
    %c0_i32 = arith.constant 0 : i32
    %c0_i32_0 = arith.constant 0 : i32
    %c0_i32_1 = arith.constant 0 : i32
    return %c0_i32, %c0_i32_0 : i32, i32
  }
  func.func @transform_11(%arg0: i32) -> (i32, i32) {
    %c0_i32 = arith.constant 0 : i32
    %c0_i32_0 = arith.constant 0 : i32
    %c0_i32_1 = arith.constant 0 : i32
    return %c0_i32, %c0_i32_0 : i32, i32
  }
  func.func @transform_12(%arg0: i32) -> (i32, i32) {
    %c0_i32 = arith.constant 0 : i32
    %c0_i32_0 = arith.constant 0 : i32
    %c0_i32_1 = arith.constant 0 : i32
    return %c0_i32, %c0_i32_0 : i32, i32
  }
  func.func @transform_13(%arg0: i32) -> (i32, i32) {
    %c0_i32 = arith.constant 0 : i32
    %c0_i32_0 = arith.constant 0 : i32
    return %arg0, %c0_i32 : i32, i32
  }
}

</mosaic_0001>

<bundles_post_ra>
// kernel: tpu_custom_call.1
= control target key start
LH: loop header
LB: loop body
LE: loop exit
PB: predicated region body
PF: predicated region fallthrough
CT: control target
= control target key end

     0   :  { %vm314_vm0 = vcmask 1041408   ;;  %v10377_v55 = vmov 0   ;;  %vm310_vm1 = vcmask 556032   ;;  %vm733_vm2 = vcmask 1043456   ;;  %s13768_s0 = inlined_call_operand.vmem [shape: f32[8,324], index: 0, kind: input, shape index: {}]   ;;  %s13769_s1 = inlined_call_operand.vmem [shape: bf16[324,200], index: 1, kind: input, shape index: {}]   ;;  %s13770_s2 = inlined_call_operand.vmem [shape: f32[1,200], index: 2, kind: input, shape index: {}]   ;;  %s13771_s3 = inlined_call_operand.vmem [shape: bf16[200,400], index: 3, kind: input, shape index: {}]   ;;  %s13772_s4 = inlined_call_operand.vmem [shape: f32[1,400], index: 4, kind: input, shape index: {}]   ;;  %s13773_s5 = inlined_call_operand.vmem [shape: bf16[400,1800], index: 5, kind: input, shape index: {}]   ;;  %s13774_s6 = inlined_call_operand.vmem [shape: f32[1,1800], index: 6, kind: input, shape index: {}]   ;;  %s13775_s7 = inlined_call_operand.vmem [shape: bf16[1800,400], index: 7, kind: input, shape index: {}]   ;;  %s13776_s8 = inlined_call_operand.vmem [shape: f32[1,400], index: 8, kind: input, shape index: {}]   ;;  %s13777_s9 = inlined_call_operand.vmem [shape: bf16[400,200], index: 9, kind: input, shape index: {}]   ;;  %s13778_s10 = inlined_call_operand.vmem [shape: f32[1,200], index: 10, kind: input, shape index: {}]   ;;  %s13779_s11 = inlined_call_operand.vmem [shape: bf16[200,128], index: 11, kind: input, shape index: {}]   ;;  %s13780_s12 = inlined_call_operand.vmem [shape: f32[1,128], index: 12, kind: input, shape index: {}]   ;;  %s13781_s13 = inlined_call_operand.hbm [shape: f32[8,128], index: 13, kind: output, shape index: {}]  }
   0x1   :  { %v8903_v0 = vld [vmem:[%s13769_s1 + $0x74] ss:$8 sps:$4 sm:$0xff]   ;;  %v8905_v1 = vld [vmem:[%s13769_s1 + $0x70] ss:$8 sps:$4 sm:$0xff]   ;;  %v8906_v2 = vld [vmem:[%s13769_s1 + $0x64] ss:$8 sps:$4 sm:$0xff]  }
   0x2   :  { %321 = vmatprep.subr.bf16.mxu0 %v8903_v0  ;;  %v8908_v3 = vld [vmem:[%s13769_s1 + $0x60] ss:$8 sps:$4 sm:$0xff]   ;;  %v8909_v4 = vld [vmem:[%s13769_s1 + $0x54] ss:$8 sps:$4 sm:$0xff]   ;;  %v8911_v5 = vld [vmem:[%s13769_s1 + $0x50] ss:$8 sps:$4 sm:$0xff]  }
   0x3   :  { %322 = vmatpush1.bf16.msra.mxu0 %v8905_v1  ;;  %v8912_v6 = vld [vmem:[%s13769_s1 + $0x44] ss:$8 sps:$4 sm:$0xff]   ;;  %v8914_v7 = vld [vmem:[%s13769_s1 + $0x40] ss:$8 sps:$4 sm:$0xff]   ;;  %v8915_v8 = vld [vmem:[%s13769_s1 + $0x34] ss:$8 sps:$4 sm:$0xff]  }
   0x4   :  { %323 = vmatprep.subr.bf16.mxu0 %v8906_v2  ;;  %v8917_v9 = vld [vmem:[%s13769_s1 + $0x30] ss:$8 sps:$4 sm:$0xff]   ;;  %v8918_v10 = vld [vmem:[%s13769_s1 + $0x24] ss:$8 sps:$4 sm:$0xff]   ;;  %v8920_v11 = vld [vmem:[%s13769_s1 + $0x20] ss:$8 sps:$4 sm:$0xff]  }
   0x5   :  { %v8921_v12 = vld [vmem:[%s13769_s1 + $0x14] ss:$8 sps:$4 sm:$0xff]   ;;  %v47_v13 = vld [vmem:[%s13768_s0 + $0x8] sm:$0xff]  ;;  %v8923_v15 = vld [vmem:[%s13769_s1 + $0x10] ss:$8 sps:$4 sm:$0xff]   ;;  %vm729_vm3 = vcmask 588800  }
   0x6   :  { %v50_v14 = vpack.c.bf16 %v47_v13, %v47_v13  ;;  %v8924_v16 = vld [vmem:[%s13769_s1 + $0x4] ss:$8 sps:$4 sm:$0xff]   ;;  %v8926_v17 = vld [vmem:[%s13769_s1] ss:$8 sps:$4 sm:$0xff]   ;;  %v8927_v18 = vld [vmem:[%s13769_s1 + $0xf4] ss:$8 sps:$4 sm:$0xff]  }
   0x7   :  { %324 = vmatpush1.bf16.msra.mxu0 %v8908_v3  ;;  %v8965_v19 = vld [vmem:[%s13771_s3 + $0xe4] ss:$16 sps:$4 sm:$0xff]   ;;  %v8929_v20 = vld [vmem:[%s13769_s1 + $0xf0] ss:$8 sps:$4 sm:$0xff]   ;;  %v8932_v26 = vld [vmem:[%s13769_s1 + $0xe0] ss:$8 sps:$4 sm:$0xff]  }
   0x8   :  { %325 = vmatprep.subr.bf16.mxu0 %v8909_v4  ;;  %353 = vmatprep.mubr.bf16.mxu0 %v50_v14  ;;  %v8970_v21 = vld [vmem:[%s13771_s3 + $0xe0] ss:$16 sps:$4 sm:$0xff]   ;;  %v8971_v22 = vld [vmem:[%s13771_s3 + $0xc4] ss:$16 sps:$4 sm:$0xff]   ;;  %v8969_v62 = vld [vmem:[%s13771_s3 + $0xec] ss:$16 sps:$4 sm:$0xff]  }
   0x9   :  { %746 = vmatprep.subr.bf16.mxu1 %v8965_v19  ;;  %v8930_v23 = vld [vmem:[%s13769_s1 + $0xe4] ss:$8 sps:$4 sm:$0xff]   ;;  %v8976_v24 = vld [vmem:[%s13771_s3 + $0xc0] ss:$16 sps:$4 sm:$0xff]   ;;  %v8933_v27 = vld [vmem:[%s13769_s1 + $0xd4] ss:$8 sps:$4 sm:$0xff]  }
   0xa   :  { %747 = vmatpush1.bf16.msra.mxu1 %v8970_v21  ;;  %v8977_v25 = vld [vmem:[%s13771_s3 + $0xa4] ss:$16 sps:$4 sm:$0xff]   ;;  %v8982_v28 = vld [vmem:[%s13771_s3 + $0xa0] ss:$16 sps:$4 sm:$0xff]   ;;  %v8967_v63 = vld [vmem:[%s13771_s3 + $0xe8] ss:$16 sps:$4 sm:$0xff]  }
   0xb   :  { %326 = vmatpush1.bf16.msra.mxu0 %v8911_v5  ;;  %748 = vmatprep.subr.bf16.mxu1 %v8971_v22  ;;  %v8983_v29 = vld [vmem:[%s13771_s3 + $0x84] ss:$16 sps:$4 sm:$0xff]   ;;  %v8935_v30 = vld [vmem:[%s13769_s1 + $0xd0] ss:$8 sps:$4 sm:$0xff]   ;;  %v8938_v34 = vld [vmem:[%s13769_s1 + $0xc0] ss:$8 sps:$4 sm:$0xff]  }
   0xc   :  { %327 = vmatprep.subr.bf16.mxu0 %v8912_v6  ;;  %v8936_v31 = vld [vmem:[%s13769_s1 + $0xc4] ss:$8 sps:$4 sm:$0xff]   ;;  %v8988_v32 = vld [vmem:[%s13771_s3 + $0x80] ss:$16 sps:$4 sm:$0xff]   ;;  %v8939_v35 = vld [vmem:[%s13769_s1 + $0xb4] ss:$8 sps:$4 sm:$0xff]  }
   0xd   :  { %v8989_v33 = vld [vmem:[%s13771_s3 + $0x64] ss:$16 sps:$4 sm:$0xff]   ;;  %v8994_v36 = vld [vmem:[%s13771_s3 + $0x60] ss:$16 sps:$4 sm:$0xff]   ;;  %v8975_v1 = vld [vmem:[%s13771_s3 + $0xcc] ss:$16 sps:$4 sm:$0xff]  }
   0xe   :  { %749 = vmatpush1.bf16.msra.mxu1 %v8976_v24  ;;  %v8995_v37 = vld [vmem:[%s13771_s3 + $0x44] ss:$16 sps:$4 sm:$0xff]   ;;  %v8941_v38 = vld [vmem:[%s13769_s1 + $0xb0] ss:$8 sps:$4 sm:$0xff]   ;;  %v8944_v41 = vld [vmem:[%s13769_s1 + $0xa0] ss:$8 sps:$4 sm:$0xff]  }
   0xf   :  { %328 = vmatpush1.bf16.msra.mxu0 %v8914_v7  ;;  %750 = vmatprep.subr.bf16.mxu1 %v8977_v25  ;;  %v8942_v39 = vld [vmem:[%s13769_s1 + $0xa4] ss:$8 sps:$4 sm:$0xff]   ;;  %v9000_v40 = vld [vmem:[%s13771_s3 + $0x40] ss:$16 sps:$4 sm:$0xff]   ;;  %v8945_v42 = vld [vmem:[%s13769_s1 + $0x94] ss:$8 sps:$4 sm:$0xff]  }
  0x10   :  { %329 = vmatprep.subr.bf16.mxu0 %v8915_v8  ;;  %v8947_v43 = vld [vmem:[%s13769_s1 + $0x90] ss:$8 sps:$4 sm:$0xff]   ;;  %v8948_v44 = vld [vmem:[%s13769_s1 + $0x84] ss:$8 sps:$4 sm:$0xff]   ;;  %v8950_v46 = vld [vmem:[%s13769_s1 + $0x80] ss:$8 sps:$4 sm:$0xff]  }
  0x11   :  { %v92_v45 = vld [vmem:[%s13769_s1 + $0x140] sm:$0x33]  ;;  %v8955_v51 = vld [vmem:[%s13769_s1 + $0x134] ss:$8 sps:$4 sm:$0xff]   ;;  %v8953_v53 = vld [vmem:[%s13769_s1 + $0x130] ss:$8 sps:$4 sm:$0xff]  }
  0x12   :  { %751 = vmatpush1.bf16.msra.mxu1 %v8982_v28  ;;  %v46_v47 = vld [vmem:[%s13768_s0] sm:$0xff]  ;;  %v7915_v48 = vcombine.high %v92_v45, %v92_v45  ;;  %v7914_v49 = vcombine.low %v92_v45, %v92_v45  ;;  %v8961_v57 = vld [vmem:[%s13769_s1 + $0x114] ss:$8 sps:$4 sm:$0xff]   ;;  %v8959_v58 = vld [vmem:[%s13769_s1 + $0x110] ss:$8 sps:$4 sm:$0xff]  }
  0x13   :  { %330 = vmatpush1.bf16.msra.mxu0 %v8917_v9  ;;  %752 = vmatprep.subr.bf16.mxu1 %v8983_v29  ;;  %v49_v50 = vpack.c.bf16 %v46_v47, %v46_v47  ;;  %v8958_v54 = vld [vmem:[%s13769_s1 + $0x124] ss:$8 sps:$4 sm:$0xff]   ;;  %v8956_v56 = vld [vmem:[%s13769_s1 + $0x120] ss:$8 sps:$4 sm:$0xff]   ;;  %v48_v61 = vld [vmem:[%s13768_s0 + $0x10] sm:$0xff]  ;;  %v95_v47 = vlaneseq }
  0x14   :  { %331 = vmatprep.subr.bf16.mxu0 %v8918_v10  ;;  %v316_v52 = vsel %vm314_vm0, %v7914_v49, 0  ;;  %v8964_v59 = vld [vmem:[%s13769_s1 + $0x104] ss:$8 sps:$4 sm:$0xff]   ;;  %v8962_v60 = vld [vmem:[%s13769_s1 + $0x100] ss:$8 sps:$4 sm:$0xff]   ;;  %v51_v0 = vpack.c.bf16 %v48_v61, %v48_v61 }
  0x15   :  { %v8973_v2 = vld [vmem:[%s13771_s3 + $0xc8] ss:$16 sps:$4 sm:$0xff]   ;;  %v8981_v3 = vld [vmem:[%s13771_s3 + $0xac] ss:$16 sps:$4 sm:$0xff]   ;;  %v9006_v14 = vld [vmem:[%s13771_s3 + $0x20] ss:$16 sps:$4 sm:$0xff]  }
  0x16   :  { %753 = vmatpush1.bf16.msra.mxu1 %v8988_v32  ;;  %v8979_v4 = vld [vmem:[%s13771_s3 + $0xa8] ss:$16 sps:$4 sm:$0xff]   ;;  %v8987_v5 = vld [vmem:[%s13771_s3 + $0x8c] ss:$16 sps:$4 sm:$0xff]   ;;  %v455_v19 = vld [vmem:[%s13771_s3 + $0x180] sm:$0xff] }
  0x17   :  { %332 = vmatpush1.bf16.msra.mxu0 %v8920_v11  ;;  %754 = vmatprep.subr.bf16.mxu1 %v8989_v33  ;;  %v8985_v6 = vld [vmem:[%s13771_s3 + $0x88] ss:$16 sps:$4 sm:$0xff]   ;;  %v8993_v7 = vld [vmem:[%s13771_s3 + $0x6c] ss:$16 sps:$4 sm:$0xff]   ;;  %v9001_v11 = vld [vmem:[%s13771_s3 + $0x24] ss:$16 sps:$4 sm:$0xff]   ;;  %v7967_v21 = vcombine.high %v455_v19, %v455_v19 }
  0x18   :  { %333 = vmatprep.subr.bf16.mxu0 %v8921_v12  ;;  %v8991_v8 = vld [vmem:[%s13771_s3 + $0x68] ss:$16 sps:$4 sm:$0xff]   ;;  %v8999_v9 = vld [vmem:[%s13771_s3 + $0x4c] ss:$16 sps:$4 sm:$0xff]   ;;  %v9017_v25 = vld [vmem:[%s13771_s3 + $0x164] ss:$16 sps:$4 sm:$0xff]  }
  0x19   :  { %v8997_v10 = vld [vmem:[%s13771_s3 + $0x48] ss:$16 sps:$4 sm:$0xff]   ;;  %v9005_v12 = vld [vmem:[%s13771_s3 + $0x2c] ss:$16 sps:$4 sm:$0xff]   ;;  %v9022_v29 = vld [vmem:[%s13771_s3 + $0x160] ss:$16 sps:$4 sm:$0xff]  }
  0x1a   :  { %755 = vmatpush1.bf16.msra.mxu1 %v8994_v36  ;;  %v9003_v13 = vld [vmem:[%s13771_s3 + $0x28] ss:$16 sps:$4 sm:$0xff]   ;;  %v9027_v32 = vld [vmem:[%s13771_s3 + $0x14c] ss:$16 sps:$4 sm:$0xff]  }
  0x1b   :  { %334 = vmatpush1.bf16.msra.mxu0 %v8923_v15  ;;  %756 = vmatprep.subr.bf16.mxu1 %v8995_v37  ;;  %v9007_v15 = vld [vmem:[%s13771_s3 + $0x4] ss:$16 sps:$4 sm:$0xff]   ;;  %v9019_v28 = vld [vmem:[%s13771_s3 + $0x168] ss:$16 sps:$4 sm:$0xff]   ;;  %v9033_v36 = vld [vmem:[%s13771_s3 + $0x12c] ss:$16 sps:$4 sm:$0xff]  }
  0x1c   :  { %335 = vmatprep.subr.bf16.mxu0 %v8924_v16  ;;  %v9011_v16 = vld [vmem:[%s13771_s3 + $0xc] ss:$16 sps:$4 sm:$0xff]   ;;  %v9025_v33 = vld [vmem:[%s13771_s3 + $0x148] ss:$16 sps:$4 sm:$0xff]  }
  0x1d   :  { %v9031_v37 = vld [vmem:[%s13771_s3 + $0x128] ss:$16 sps:$4 sm:$0xff]  }
  0x1e   :  { %757 = vmatpush1.bf16.msra.mxu1 %v9000_v40  ;;  %v9039_v40 = vld [vmem:[%s13771_s3 + $0x10c] ss:$16 sps:$4 sm:$0xff]  }
  0x1f   :  { %336 = vmatpush1.bf16.msra.mxu0 %v8926_v17  ;;  %758 = vmatprep.subr.bf16.mxu1 %v9001_v11  ;;  %v9009_v17 = vld [vmem:[%s13771_s3 + $0x8] ss:$16 sps:$4 sm:$0xff]  }
  0x20   :  { %337 = vmatprep.subr.bf16.mxu0 %v8927_v18  ;;  %v9012_v18 = vld [vmem:[%s13771_s3] ss:$16 sps:$4 sm:$0xff]   ;;  %v9049_v11 = vld [vmem:[%s13773_s5 + $0x25c] ss:$60 sps:$4 sm:$0xff]  }
  0x22   :  { %759 = vmatpush1.bf16.msra.mxu1 %v9006_v14  ;;  %v9077_v14 = vld [vmem:[%s13773_s5 + $0x9e0] ss:$60 sps:$4 sm:$0xff]  }
  0x23   :  { %338 = vmatpush2.bf16.msra.mxu0 %v8929_v20  ;;  %760 = vmatprep.subr.bf16.mxu1 %v9007_v15  ;;  %v456_v20 = vld [vmem:[%s13771_s3 + $0x188] sm:$0xff]  ;;  %v9052_v15 = vld [vmem:[%s13773_s5 + $0x1e4] ss:$60 sps:$4 sm:$0xff]  }
  0x24   :  { %339 = vmatprep.subr.bf16.mxu0 %v8930_v23  ;;  %v7969_v22 = vcombine.high %v456_v20, %v456_v20  ;;  %v7966_v23 = vcombine.low %v455_v19, %v455_v19  ;;  %v7968_v24 = vcombine.low %v456_v20, %v456_v20  ;;  %v9055_v19 = vld [vmem:[%s13773_s5 + $0x16c] ss:$60 sps:$4 sm:$0xff]   ;;  %v9091_v20 = vld [vmem:[%s13773_s5 + $0x8f4] ss:$60 sps:$4 sm:$0xff]  }
  0x26   :  { %761 = vmatpush1.bf16.msra.mxu1 %v9012_v18  ;;  %v9083_v18 = vld [vmem:[%s13773_s5 + $0x968] ss:$60 sps:$4 sm:$0xff]  }
  0x27   :  { %340 = vmatpush2.bf16.msra.mxu0 %v8932_v26  ;;  %v9021_v26 = vld [vmem:[%s13771_s3 + $0x16c] ss:$16 sps:$4 sm:$0xff]   ;;  %7970 = vmatprep.subr.msk.bf16.mxu1 %vm733_vm2, %v7967_v21  ;;  %v9053_v21 = vld [vmem:[%s13773_s5 + $0x168] ss:$60 sps:$4 sm:$0xff]  }
  0x28   :  { %341 = vmatprep.subr.bf16.mxu0 %v8933_v27  ;;  %v735_v27 = vsel %vm733_vm2, %v7966_v23, 0  ;;  %v9058_v23 = vld [vmem:[%s13773_s5 + $0xf4] ss:$60 sps:$4 sm:$0xff]  }
  0x2a   :  { %769 = vmatpush2.bf16.msra.mxu1 %v735_v27  ;;  %v9061_v27 = vld [vmem:[%s13773_s5 + $0x7c] ss:$60 sps:$4 sm:$0xff]  }
  0x2b   :  { %342 = vmatpush2.bf16.msra.mxu0 %v8935_v30  ;;  %v741_v30 = vsel %vm733_vm2, %v7968_v24, 0  ;;  %770 = vmatprep.subr.bf16.mxu1 %v9017_v25  ;;  %v9097_v24 = vld [vmem:[%s13773_s5 + $0x87c] ss:$60 sps:$4 sm:$0xff]   ;;  %v9056_v25 = vld [vmem:[%s13773_s5 + $0xf0] ss:$60 sps:$4 sm:$0xff]  }
  0x2c   :  { %343 = vmatprep.subr.bf16.mxu0 %v8936_v31  ;;  %v9023_v31 = vld [vmem:[%s13771_s3 + $0x144] ss:$16 sps:$4 sm:$0xff]  }
  0x2e   :  { %771 = vmatpush2.bf16.msra.mxu1 %v9022_v29  ;;  %v9059_v29 = vld [vmem:[%s13773_s5 + $0x78] ss:$60 sps:$4 sm:$0xff]  }
  0x2f   :  { %344 = vmatpush2.bf16.msra.mxu0 %v8938_v34  ;;  %v9028_v34 = vld [vmem:[%s13771_s3 + $0x140] ss:$16 sps:$4 sm:$0xff]   ;;  %772 = vmatprep.subr.bf16.mxu1 %v9023_v31 }
  0x30   :  { %345 = vmatprep.subr.bf16.mxu0 %v8939_v35  ;;  %v9029_v35 = vld [vmem:[%s13771_s3 + $0x124] ss:$16 sps:$4 sm:$0xff]  }
  0x31   :  { %v9064_v31 = vld [vmem:[%s13773_s5 + $0x4] ss:$60 sps:$4 sm:$0xff]  }
  0x32   :  { %773 = vmatpush2.bf16.msra.mxu1 %v9028_v34  ;;  %v9068_v34 = vld [vmem:[%s13773_s5 + $0x708] ss:$60 sps:$4 sm:$0xff]  }
  0x33   :  { %346 = vmatpush2.bf16.msra.mxu0 %v8941_v38  ;;  %v9034_v38 = vld [vmem:[%s13771_s3 + $0x120] ss:$16 sps:$4 sm:$0xff]   ;;  %774 = vmatprep.subr.bf16.mxu1 %v9029_v35 }
  0x34   :  { %347 = vmatprep.subr.bf16.mxu0 %v8942_v39  ;;  %v9035_v39 = vld [vmem:[%s13771_s3 + $0x104] ss:$16 sps:$4 sm:$0xff]  }
  0x35   :  { %v9076_v35 = vld [vmem:[%s13773_s5 + $0x694] ss:$60 sps:$4 sm:$0xff]  }
  0x36   :  { %775 = vmatpush2.bf16.msra.mxu1 %v9034_v38  ;;  %v9080_v38 = vld [vmem:[%s13773_s5 + $0x618] ss:$60 sps:$4 sm:$0xff]  }
  0x37   :  { %348 = vmatpush2.bf16.msra.mxu0 %v8944_v41  ;;  %v9037_v41 = vld [vmem:[%s13771_s3 + $0x108] ss:$16 sps:$4 sm:$0xff]   ;;  %776 = vmatprep.subr.bf16.mxu1 %v9035_v39  ;;  %v9088_v39 = vld [vmem:[%s13773_s5 + $0x5a4] ss:$60 sps:$4 sm:$0xff]  }
  0x38   :  { %349 = vmatprep.subr.bf16.mxu0 %v8945_v42  ;;  %v9040_v42 = vld [vmem:[%s13771_s3 + $0x100] ss:$16 sps:$4 sm:$0xff]  }
  0x3a   :  { %777 = vmatpush2.bf16.msra.mxu1 %v9040_v42  ;;  %v9092_v42 = vld [vmem:[%s13773_s5 + $0x528] ss:$60 sps:$4 sm:$0xff]  }
  0x3b   :  { %350 = vmatpush2.bf16.msra.mxu0 %v8947_v43  ;;  %v9043_v43 = vld [vmem:[%s13773_s5 + $0x34c] ss:$60 sps:$4 sm:$0xff]  }
  0x3c   :  { %351 = vmatprep.subr.bf16.mxu0 %v8948_v44  ;;  %3219 = vmatprep.subr.bf16.mxu1 %v9043_v43  ;;  %v9067_v44 = vld [vmem:[%s13773_s5 + $0xad4] ss:$60 sps:$4 sm:$0xff]  }
  0x3d   :  { %v9100_v43 = vld [vmem:[%s13773_s5 + $0x4b4] ss:$60 sps:$4 sm:$0xff]  }
  0x3f   :  { %352 = vmatpush2.bf16.msra.mxu0 %v8950_v46 }
  0x40   :  { %7916 = vmatprep.subr.msk.bf16.mxu0 %vm314_vm0, %v7915_v48 }
  0x42   :  { %354 = vmatmul.mubr.bf16.vlgmr.msra.gmra.mxu0 %v49_v50  ;;  %v10742_v50 = vshrl.u32 %v95_v47, 7  ;;  %v9104_v47 = vld [vmem:[%s13773_s5 + $0x438] ss:$60 sps:$4 sm:$0xff]  }
  0x43   :  { %369 = vmatpush1.bf16.msra.mxu0 %v316_v52  ;;  %394 = vmatprep.mubr.bf16.mxu0 %v10377_v55 }
  0x44   :  { %370 = vmatprep.subr.bf16.mxu0 %v8955_v51  ;;  %v93_v51 = vld [vmem:[%s13770_s2] sm:$0x3]  ;;  %v10748_v52 = vsub.s32 0, %v10742_v50 }
  0x47   :  { %371 = vmatpush1.bf16.msra.mxu0 %v8953_v53  ;;  %v10751_v53 = vsub.s32 1, %v10742_v50 }
  0x48   :  { %372 = vmatprep.subr.bf16.mxu0 %v8958_v54  ;;  %v98_v54 = vrot.slane %v93_v51, %v10748_v52 }
  0x4b   :  { %373 = vmatpush1.bf16.msra.mxu0 %v8956_v56  ;;  %v102_v56 = vrot.slane %v93_v51, %v10751_v53  ;;  %v9115_v51 = vld [vmem:[%s13773_s5 + $0xb4c] ss:$60 sps:$4 sm:$0xff]  }
  0x4c   :  { %374 = vmatprep.subr.bf16.mxu0 %v8961_v57 }
  0x4f   :  { %375 = vmatpush1.bf16.msra.mxu0 %v8959_v58 }
  0x50   :  { %376 = vmatprep.subr.bf16.mxu0 %v8964_v59 }
  0x53   :  { %377 = vmatpush1.bf16.msra.mxu0 %v8962_v60 }
  0x54   :  { %787 = vmatprep.subr.bf16.mxu0 %v8969_v62 }
  0x56   :  { %7917 = vmatmul.mubr.msk.bf16.vlgmr.msra.gmra.mxu0 %vm310_vm1, %v51_v0 }
  0x57   :  { %788 = vmatpush1.bf16.msra.mxu0 %v8967_v63 }
  0x58   :  { %789 = vmatprep.subr.bf16.mxu0 %v8975_v1 }
  0x5b   :  { %790 = vmatpush1.bf16.msra.mxu0 %v8973_v2  ;;  %v9041_v2 = vld [vmem:[%s13773_s5 + $0x348] ss:$60 sps:$4 sm:$0xff]  }
  0x5c   :  { %791 = vmatprep.subr.bf16.mxu0 %v8981_v3  ;;  %v9065_v3 = vld [vmem:[%s13773_s5 + $0xad0] ss:$60 sps:$4 sm:$0xff]  }
  0x5f   :  { %792 = vmatpush1.bf16.msra.mxu0 %v8979_v4 }
  0x60   :  { %793 = vmatprep.subr.bf16.mxu0 %v8987_v5  ;;  %v9046_v5 = vld [vmem:[%s13773_s5 + $0x2d4] ss:$60 sps:$4 sm:$0xff]  }
  0x63   :  { %794 = vmatpush1.bf16.msra.mxu0 %v8985_v6  ;;  %v9073_v6 = vld [vmem:[%s13773_s5 + $0xa5c] ss:$60 sps:$4 sm:$0xff]  }
  0x64   :  { %795 = vmatprep.subr.bf16.mxu0 %v8993_v7 }
  0x67   :  { %796 = vmatpush1.bf16.msra.mxu0 %v8991_v8 }
  0x68   :  { %797 = vmatprep.subr.bf16.mxu0 %v8999_v9  ;;  %v9044_v9 = vld [vmem:[%s13773_s5 + $0x2d0] ss:$60 sps:$4 sm:$0xff]  }
  0x6b   :  { %798 = vmatpush1.bf16.msra.mxu0 %v8997_v10  ;;  %v9071_v10 = vld [vmem:[%s13773_s5 + $0xa58] ss:$60 sps:$4 sm:$0xff]  }
  0x6c   :  { %799 = vmatprep.subr.bf16.mxu0 %v9005_v12  ;;  %v9079_v12 = vld [vmem:[%s13773_s5 + $0x9e4] ss:$60 sps:$4 sm:$0xff]  }
  0x6f   :  { %800 = vmatpush1.bf16.msra.mxu0 %v9003_v13  ;;  %v9047_v13 = vld [vmem:[%s13773_s5 + $0x258] ss:$60 sps:$4 sm:$0xff]  }
  0x70   :  { %801 = vmatprep.subr.bf16.mxu0 %v9011_v16  ;;  %v9085_v16 = vld [vmem:[%s13773_s5 + $0x96c] ss:$60 sps:$4 sm:$0xff]  }
  0x73   :  { %802 = vmatpush1.bf16.msra.mxu0 %v9009_v17  ;;  %v9050_v17 = vld [vmem:[%s13773_s5 + $0x1e0] ss:$60 sps:$4 sm:$0xff]  }
  0x74   :  { %7972 = vmatprep.subr.msk.bf16.mxu0 %vm733_vm2, %v7969_v22  ;;  %v9089_v22 = vld [vmem:[%s13773_s5 + $0x8f0] ss:$60 sps:$4 sm:$0xff]  }
  0x77   :  { %810 = vmatpush2.bf16.msra.mxu0 %v741_v30  ;;  %v9101_v30 = vld [vmem:[%s13773_s5 + $0x800] ss:$60 sps:$4 sm:$0xff]  }
  0x78   :  { %811 = vmatprep.subr.bf16.mxu0 %v9021_v26  ;;  %v9095_v26 = vld [vmem:[%s13773_s5 + $0x878] ss:$60 sps:$4 sm:$0xff]  }
  0x7b   :  { %812 = vmatpush2.bf16.msra.mxu0 %v9019_v28  ;;  %v9103_v28 = vld [vmem:[%s13773_s5 + $0x804] ss:$60 sps:$4 sm:$0xff]  }
  0x7c   :  { %813 = vmatprep.subr.bf16.mxu0 %v9027_v32  ;;  %v9062_v32 = vld [vmem:[%s13773_s5] ss:$60 sps:$4 sm:$0xff]  }
  0x7f   :  { %814 = vmatpush2.bf16.msra.mxu0 %v9025_v33  ;;  %v9070_v33 = vld [vmem:[%s13773_s5 + $0x70c] ss:$60 sps:$4 sm:$0xff]  }
  0x80   :  { %815 = vmatprep.subr.bf16.mxu0 %v9033_v36  ;;  %v9074_v36 = vld [vmem:[%s13773_s5 + $0x690] ss:$60 sps:$4 sm:$0xff]  }
  0x83   :  { %816 = vmatpush2.bf16.msra.mxu0 %v9031_v37  ;;  %v9082_v37 = vld [vmem:[%s13773_s5 + $0x61c] ss:$60 sps:$4 sm:$0xff]  }
  0x84   :  { %817 = vmatprep.subr.bf16.mxu0 %v9039_v40  ;;  %v9086_v40 = vld [vmem:[%s13773_s5 + $0x5a0] ss:$60 sps:$4 sm:$0xff]  }
  0x87   :  { %818 = vmatpush2.bf16.msra.mxu0 %v9037_v41  ;;  %v9094_v41 = vld [vmem:[%s13773_s5 + $0x52c] ss:$60 sps:$4 sm:$0xff]  }
  0x88   :  { %3342 = vmatprep.subr.bf16.mxu0 %v9067_v44  ;;  %v9098_v44 = vld [vmem:[%s13773_s5 + $0x4b0] ss:$60 sps:$4 sm:$0xff]  }
 0x102   :  { %v355_v45 = vpop.f32.mrf.mxu0 }
 0x103   :  { %v356_v57 = vadd.f32 %v355_v45, %v98_v54  ;;  %v9106_v45 = vld [vmem:[%s13773_s5 + $0x43c] ss:$60 sps:$4 sm:$0xff]  }
 0x104   :  { %v357_v46 = vpop.f32.mrf.mxu0  ;;  %v9110_v54 = vld [vmem:[%s13773_s5 + $0x3c0] ss:$60 sps:$4 sm:$0xff]  }
 0x105   :  { %v358_v59 = vadd.f32 %v357_v46, %v102_v56  ;;  %v9109_v46 = vld [vmem:[%s13773_s5 + $0x78c] ss:$60 sps:$4 sm:$0xff]  }
 0x106   :  { %v359_v48 = vpop.f32.mrf.mxu0  ;;  %v9113_v56 = vld [vmem:[%s13773_s5 + $0xb48] ss:$60 sps:$4 sm:$0xff]  }
 0x107   :  { %v9107_v48 = vld [vmem:[%s13773_s5 + $0x788] ss:$60 sps:$4 sm:$0xff]  }
 0x108   :  { %v360_v49 = vpop.f32.mrf.mxu0 }
 0x109   :  { %v9112_v49 = vld [vmem:[%s13773_s5 + $0x3c4] ss:$60 sps:$4 sm:$0xff]  }
 0x116   :  { %v396_v58 = vpop.f32.mrf.mxu0 }
 0x117   :  { %v397_v60 = vadd.f32 %v396_v58, %v356_v57  ;;  %v9118_v57 = vld [vmem:[%s13773_s5 + $0xacc] ss:$60 sps:$4 sm:$0xff]   ;;  %v9121_v58 = vld [vmem:[%s13773_s5 + $0x35c] ss:$60 sps:$4 sm:$0xff]  }
 0x118   :  { %v398_v61 = vpop.f32.mrf.mxu0 }
 0x119   :  { %v399_v62 = vadd.f32 %v398_v61, %v358_v59  ;;  %v403_v63 = vmax.f32 %v397_v60, 0.0 }
 0x11a   :  { %v400_v0 = vpop.f32.mrf.mxu0 }
 0x11b   :  { %v404_v1 = vmax.f32 %v399_v62, 0.0  ;;  %v405_v8 = vpack.c.bf16 %v403_v63, %v403_v63 }
 0x11c   :  { %v401_v4 = vpop.f32.mrf.mxu0 }
 0x11d   :  { %v406_v7 = vpack.c.bf16 %v404_v1, %v404_v1 }
 0x11f   :  { %7971 = vmatprep.mubr.msk.bf16.mxu1 %vm729_vm3, %v406_v7  ;;  %7973 = vmatprep.mubr.msk.bf16.mxu0 %vm729_vm3, %v406_v7 }
 0x120   :  { %779 = vmatmul.mubr.bf16.vlgmr.msra.gmra.mxu1 %v405_v8  ;;  %820 = vmatmul.mubr.bf16.vlgmr.msra.gmra.mxu0 %v405_v8 }
 0x121   :  { %3220 = vmatpush1.bf16.msra.mxu1 %v9041_v2  ;;  %3343 = vmatpush1.bf16.msra.mxu0 %v9065_v3 }
 0x122   :  { %3221 = vmatprep.subr.bf16.mxu1 %v9046_v5  ;;  %3344 = vmatprep.subr.bf16.mxu0 %v9073_v6 }
 0x125   :  { %3222 = vmatpush1.bf16.msra.mxu1 %v9044_v9  ;;  %3345 = vmatpush1.bf16.msra.mxu0 %v9071_v10 }
 0x126   :  { %3223 = vmatprep.subr.bf16.mxu1 %v9049_v11  ;;  %3346 = vmatprep.subr.bf16.mxu0 %v9079_v12 }
 0x129   :  { %3224 = vmatpush1.bf16.msra.mxu1 %v9047_v13  ;;  %3347 = vmatpush1.bf16.msra.mxu0 %v9077_v14 }
 0x12a   :  { %3225 = vmatprep.subr.bf16.mxu1 %v9052_v15  ;;  %3348 = vmatprep.subr.bf16.mxu0 %v9085_v16 }
 0x12d   :  { %3226 = vmatpush1.bf16.msra.mxu1 %v9050_v17  ;;  %3349 = vmatpush1.bf16.msra.mxu0 %v9083_v18 }
 0x12e   :  { %3227 = vmatprep.subr.bf16.mxu1 %v9055_v19  ;;  %3350 = vmatprep.subr.bf16.mxu0 %v9091_v20 }
 0x131   :  { %3228 = vmatpush1.bf16.msra.mxu1 %v9053_v21  ;;  %3351 = vmatpush1.bf16.msra.mxu0 %v9089_v22 }
 0x132   :  { %3229 = vmatprep.subr.bf16.mxu1 %v9058_v23  ;;  %3352 = vmatprep.subr.bf16.mxu0 %v9097_v24 }
 0x135   :  { %3230 = vmatpush1.bf16.msra.mxu1 %v9056_v25  ;;  %3353 = vmatpush1.bf16.msra.mxu0 %v9095_v26 }
 0x136   :  { %3231 = vmatprep.subr.bf16.mxu1 %v9061_v27  ;;  %3354 = vmatprep.subr.bf16.mxu0 %v9103_v28 }
 0x139   :  { %3232 = vmatpush1.bf16.msra.mxu1 %v9059_v29  ;;  %3355 = vmatpush1.bf16.msra.mxu0 %v9101_v30 }
 0x13a   :  { %3233 = vmatprep.subr.bf16.mxu1 %v9064_v31  ;;  %3356 = vmatprep.subr.bf16.mxu0 %v9109_v46 }
 0x13d   :  { %3234 = vmatpush1.bf16.msra.mxu1 %v9062_v32  ;;  %3357 = vmatpush1.bf16.msra.mxu0 %v9107_v48 }
 0x13e   :  { %3235 = vmatprep.subr.bf16.mxu1 %v9070_v33  ;;  %3372 = vmatprep.subr.bf16.mxu0 %v9115_v51 }
 0x141   :  { %3236 = vmatpush2.bf16.msra.mxu1 %v9068_v34  ;;  %3373 = vmatpush2.bf16.msra.mxu0 %v9113_v56 }
 0x142   :  { %3237 = vmatprep.subr.bf16.mxu1 %v9076_v35  ;;  %3383 = vmatprep.subr.bf16.mxu0 %v9121_v58 }
 0x145   :  { %3238 = vmatpush2.bf16.msra.mxu1 %v9074_v36 }
 0x146   :  { %3239 = vmatprep.subr.bf16.mxu1 %v9082_v37 }
 0x149   :  { %3240 = vmatpush2.bf16.msra.mxu1 %v9080_v38 }
 0x14a   :  { %3241 = vmatprep.subr.bf16.mxu1 %v9088_v39 }
 0x14d   :  { %3242 = vmatpush2.bf16.msra.mxu1 %v9086_v40 }
 0x14e   :  { %3243 = vmatprep.subr.bf16.mxu1 %v9094_v41 }
 0x151   :  { %3244 = vmatpush2.bf16.msra.mxu1 %v9092_v42 }
 0x152   :  { %3245 = vmatprep.subr.bf16.mxu1 %v9100_v43 }
 0x155   :  { %3246 = vmatpush2.bf16.msra.mxu1 %v9098_v44 }
 0x156   :  { %3247 = vmatprep.subr.bf16.mxu1 %v9106_v45 }
 0x159   :  { %3248 = vmatpush2.bf16.msra.mxu1 %v9104_v47 }
 0x15a   :  { %3249 = vmatprep.subr.bf16.mxu1 %v9112_v49 }
 0x15d   :  { %3250 = vmatpush2.bf16.msra.mxu1 %v9110_v54 }
 0x15e   :  { %3260 = vmatprep.subr.bf16.mxu1 %v9118_v57 }
 0x15f   :  { %18 = vsyncpa [#allocation3], 0  ;;  %v10908_v59 = vsub.s32 2, %v10742_v50  ;;  %v457_v60 = vld [vmem:[%s13772_s4] sm:$0xf]  ;;  %v10914_v61 = vsub.s32 3, %v10742_v50 }
 0x160   :  { %v462_v62 = vrot.slane %v457_v60, %v10748_v52  ;;  %v466_v0 = vrot.slane %v457_v60, %v10751_v53  ;;  %vm3215_vm4 = vcmask 130048   ;;  %v9116_v20 = vld [vmem:[%s13773_s5 + $0xac8] ss:$60 sps:$4 sm:$0xff]   ;;  %v9119_v21 = vld [vmem:[%s13773_s5 + $0x358] ss:$60 sps:$4 sm:$0xff]   ;;  %vm6625_vm5 = vcmask 64512  }
 0x161   :  { %v470_v63 = vrot.slane %v457_v60, %v10908_v59  ;;  %v474_v1 = vrot.slane %v457_v60, %v10914_v61  ;;  %v9124_v24 = vld [vmem:[%s13773_s5 + $0xa54] ss:$60 sps:$4 sm:$0xff]   ;;  %v9127_v25 = vld [vmem:[%s13773_s5 + $0x2e4] ss:$60 sps:$4 sm:$0xff]   ;;  %v9130_v28 = vld [vmem:[%s13773_s5 + $0x9dc] ss:$60 sps:$4 sm:$0xff]  }
 0x162   :  { %v9122_v26 = vld [vmem:[%s13773_s5 + $0xa50] ss:$60 sps:$4 sm:$0xff]   ;;  %v9125_v27 = vld [vmem:[%s13773_s5 + $0x2e0] ss:$60 sps:$4 sm:$0xff]   ;;  %v9128_v30 = vld [vmem:[%s13773_s5 + $0x9d8] ss:$60 sps:$4 sm:$0xff]  }
 0x163   :  { %v9133_v29 = vld [vmem:[%s13773_s5 + $0x26c] ss:$60 sps:$4 sm:$0xff]   ;;  %v9136_v32 = vld [vmem:[%s13773_s5 + $0x964] ss:$60 sps:$4 sm:$0xff]   ;;  %v9139_v33 = vld [vmem:[%s13773_s5 + $0x1f4] ss:$60 sps:$4 sm:$0xff]  }
 0x164   :  { %v9131_v31 = vld [vmem:[%s13773_s5 + $0x268] ss:$60 sps:$4 sm:$0xff]   ;;  %v9134_v34 = vld [vmem:[%s13773_s5 + $0x960] ss:$60 sps:$4 sm:$0xff]   ;;  %v9137_v35 = vld [vmem:[%s13773_s5 + $0x1f0] ss:$60 sps:$4 sm:$0xff]  }
 0x165   :  { %v9142_v36 = vld [vmem:[%s13773_s5 + $0x8ec] ss:$60 sps:$4 sm:$0xff]   ;;  %v9145_v37 = vld [vmem:[%s13773_s5 + $0x17c] ss:$60 sps:$4 sm:$0xff]   ;;  %v9148_v40 = vld [vmem:[%s13773_s5 + $0x874] ss:$60 sps:$4 sm:$0xff]  }
 0x166   :  { %v9140_v38 = vld [vmem:[%s13773_s5 + $0x8e8] ss:$60 sps:$4 sm:$0xff]   ;;  %v9143_v39 = vld [vmem:[%s13773_s5 + $0x178] ss:$60 sps:$4 sm:$0xff]   ;;  %v9146_v42 = vld [vmem:[%s13773_s5 + $0x870] ss:$60 sps:$4 sm:$0xff]  }
 0x167   :  { %v9151_v41 = vld [vmem:[%s13773_s5 + $0x104] ss:$60 sps:$4 sm:$0xff]   ;;  %v9154_v44 = vld [vmem:[%s13773_s5 + $0x7fc] ss:$60 sps:$4 sm:$0xff]   ;;  %v9157_v45 = vld [vmem:[%s13773_s5 + $0x8c] ss:$60 sps:$4 sm:$0xff]  }
 0x168   :  { %v9149_v43 = vld [vmem:[%s13773_s5 + $0x100] ss:$60 sps:$4 sm:$0xff]   ;;  %v9152_v46 = vld [vmem:[%s13773_s5 + $0x7f8] ss:$60 sps:$4 sm:$0xff]   ;;  %v9155_v47 = vld [vmem:[%s13773_s5 + $0x88] ss:$60 sps:$4 sm:$0xff]  }
 0x169   :  { %v9160_v48 = vld [vmem:[%s13773_s5 + $0x784] ss:$60 sps:$4 sm:$0xff]   ;;  %v9163_v49 = vld [vmem:[%s13773_s5 + $0x14] ss:$60 sps:$4 sm:$0xff]   ;;  %v9169_v57 = vld [vmem:[%s13773_s5 + $0x71c] ss:$60 sps:$4 sm:$0xff]  }
 0x16a   :  { %v9158_v51 = vld [vmem:[%s13773_s5 + $0x780] ss:$60 sps:$4 sm:$0xff]   ;;  %v9161_v54 = vld [vmem:[%s13773_s5 + $0x10] ss:$60 sps:$4 sm:$0xff]   ;;  %v9167_v60 = vld [vmem:[%s13773_s5 + $0x718] ss:$60 sps:$4 sm:$0xff]  }
 0x16b   :  { %v9166_v56 = vld [vmem:[%s13773_s5 + $0xb44] ss:$60 sps:$4 sm:$0xff]   ;;  %s10378_s4 = smov [#allocation2]  }
 0x16c   :  { %v9164_v58 = vld [vmem:[%s13773_s5 + $0xb40] ss:$60 sps:$4 sm:$0xff]   ;;  %s7866_s21 = sshll.u32 %s10378_s4, 4  ;;  %s7867_s21 = int_to_ptr.vmem [resolvable:$true] %s7866_s21 }
 0x16d   :  { %s10355_s3 = scalar_lea.vmem %s7867_s21, 128  ;;  %p10360_p1 = scmp.lt.s32.totalorder %s7867_s21, %s7867_s21 }
 0x16e   :  { %p10356_p0 = scmp.ne.s32.totalorder %s7867_s21, %s10355_s3  ;;  %p10361_p2 = scmp.lt.s32.totalorder %s10355_s3, %s10355_s3 }
 0x170   :  { %p10362_p3 = por %p10361_p2, %p10360_p1 }
 0x172   :  { %p10363_p4 = pnand %p10362_p3, %p10356_p0 }
 0x1e0   :  { %v780_v2 = vpop.f32.mrf.mxu1  ;;  %v821_v3 = vpop.f32.mrf.mxu0 }
 0x1e1   :  { %v781_v4 = vadd.f32 %v780_v2, %v462_v62  ;;  %v822_v5 = vadd.f32 %v821_v3, %v470_v63  ;;  %v9172_v62 = vld [vmem:[%s13773_s5 + $0x354] ss:$60 sps:$4 sm:$0xff]   ;;  %v9175_v63 = vld [vmem:[%s13773_s5 + $0x6a4] ss:$60 sps:$4 sm:$0xff]   ;;  %v9178_v2 = vld [vmem:[%s13773_s5 + $0x2dc] ss:$60 sps:$4 sm:$0xff]  }
 0x1e2   :  { %v782_v6 = vpop.f32.mrf.mxu1  ;;  %v823_v7 = vpop.f32.mrf.mxu0  ;;  %v9181_v3 = vld [vmem:[%s13773_s5 + $0x62c] ss:$60 sps:$4 sm:$0xff]  }
 0x1e3   :  { %v783_v8 = vadd.f32 %v782_v6, %v466_v0  ;;  %v824_v9 = vadd.f32 %v823_v7, %v474_v1  ;;  %v828_v10 = vmax.f32 %v781_v4, 0.0  ;;  %v830_v11 = vmax.f32 %v822_v5, 0.0  ;;  %v9170_v0 = vld [vmem:[%s13773_s5 + $0x350] ss:$60 sps:$4 sm:$0xff]   ;;  %v9173_v1 = vld [vmem:[%s13773_s5 + $0x6a0] ss:$60 sps:$4 sm:$0xff]  }
 0x1e4   :  { %v784_v12 = vpop.f32.mrf.mxu1  ;;  %v825_v13 = vpop.f32.mrf.mxu0  ;;  %v9176_v4 = vld [vmem:[%s13773_s5 + $0x2d8] ss:$60 sps:$4 sm:$0xff]   ;;  %v9179_v5 = vld [vmem:[%s13773_s5 + $0x628] ss:$60 sps:$4 sm:$0xff]  }
 0x1e5   :  { %v829_v14 = vmax.f32 %v783_v8, 0.0  ;;  %v831_v15 = vmax.f32 %v824_v9, 0.0  ;;  %v10930_v22 = vpack.c.bf16 %v828_v10, %v828_v10  ;;  %v10932_v23 = vpack.c.bf16 %v830_v11, %v830_v11  ;;  %v9184_v6 = vld [vmem:[%s13773_s5 + $0x264] ss:$60 sps:$4 sm:$0xff]   ;;  %v9187_v7 = vld [vmem:[%s13773_s5 + $0x5b4] ss:$60 sps:$4 sm:$0xff]  }
 0x1e6   :  { %v785_v16 = vpop.f32.mrf.mxu1  ;;  %v826_v17 = vpop.f32.mrf.mxu0  ;;  %v9182_v8 = vld [vmem:[%s13773_s5 + $0x260] ss:$60 sps:$4 sm:$0xff]   ;;  %v9185_v9 = vld [vmem:[%s13773_s5 + $0x5b0] ss:$60 sps:$4 sm:$0xff]   ;;  %v9188_v12 = vld [vmem:[%s13773_s5 + $0x1e8] ss:$60 sps:$4 sm:$0xff]  }
 0x1e7   :  { %v10920_v18 = vpack.c.bf16 %v829_v14, %v829_v14  ;;  %v10922_v19 = vpack.c.bf16 %v831_v15, %v831_v15  ;;  %v9190_v10 = vld [vmem:[%s13773_s5 + $0x1ec] ss:$60 sps:$4 sm:$0xff]   ;;  %v9193_v11 = vld [vmem:[%s13773_s5 + $0x53c] ss:$60 sps:$4 sm:$0xff]   ;;  %v9196_v14 = vld [vmem:[%s13773_s5 + $0x174] ss:$60 sps:$4 sm:$0xff]  }
 0x1e8   :  { %v9191_v13 = vld [vmem:[%s13773_s5 + $0x538] ss:$60 sps:$4 sm:$0xff]   ;;  %v9199_v15 = vld [vmem:[%s13773_s5 + $0x4c4] ss:$60 sps:$4 sm:$0xff]   ;;  %v9194_v16 = vld [vmem:[%s13773_s5 + $0x170] ss:$60 sps:$4 sm:$0xff]  }
 0x1e9   :  { %3251 = vmatprep.mubr.bf16.mxu1 %v10920_v18  ;;  %8350 = vmatprep.mubr.msk.bf16.mxu0 %vm3215_vm4, %v10922_v19  ;;  %v9197_v17 = vld [vmem:[%s13773_s5 + $0x4c0] ss:$60 sps:$4 sm:$0xff]  }
 0x1ea   :  { %3252 = vmatmul.mubr.bf16.vlgmr.msra.gmra.mxu1 %v10930_v22  ;;  %3375 = vmatmul.mubr.bf16.vlgmr.msra.gmra.mxu0 %v10932_v23 }
 0x1eb   :  { %3261 = vmatpush1.bf16.msra.mxu1 %v9116_v20  ;;  %3384 = vmatpush1.bf16.msra.mxu0 %v9119_v21  ;;  %v9202_v20 = vld [vmem:[%s13773_s5 + $0xfc] ss:$60 sps:$4 sm:$0xff]   ;;  %v9205_v21 = vld [vmem:[%s13773_s5 + $0x44c] ss:$60 sps:$4 sm:$0xff]  }
 0x1ec   :  { %8349 = vmatprep.mubr.msk.bf16.mxu1 %vm3215_vm4, %v10922_v19  ;;  %3415 = vmatprep.mubr.bf16.mxu0 %v10920_v18 }
 0x1ed   :  { %3262 = vmatprep.subr.bf16.mxu1 %v9124_v24  ;;  %3385 = vmatprep.subr.bf16.mxu0 %v9127_v25  ;;  %v9200_v24 = vld [vmem:[%s13773_s5 + $0xf8] ss:$60 sps:$4 sm:$0xff]   ;;  %v9203_v25 = vld [vmem:[%s13773_s5 + $0x448] ss:$60 sps:$4 sm:$0xff]  }
 0x1ef   :  { %3263 = vmatpush1.bf16.msra.mxu1 %v9122_v26  ;;  %3386 = vmatpush1.bf16.msra.mxu0 %v9125_v27  ;;  %v9208_v26 = vld [vmem:[%s13773_s5 + $0x84] ss:$60 sps:$4 sm:$0xff]   ;;  %v9211_v27 = vld [vmem:[%s13773_s5 + $0x3d4] ss:$60 sps:$4 sm:$0xff]  }
 0x1f0   :  { %3264 = vmatprep.subr.bf16.mxu1 %v9130_v28  ;;  %3387 = vmatprep.subr.bf16.mxu0 %v9133_v29  ;;  %v9206_v28 = vld [vmem:[%s13773_s5 + $0x80] ss:$60 sps:$4 sm:$0xff]   ;;  %v9209_v29 = vld [vmem:[%s13773_s5 + $0x3d0] ss:$60 sps:$4 sm:$0xff]  }
 0x1f3   :  { %3265 = vmatpush1.bf16.msra.mxu1 %v9128_v30  ;;  %3388 = vmatpush1.bf16.msra.mxu0 %v9131_v31  ;;  %v9214_v30 = vld [vmem:[%s13773_s5 + $0xc] ss:$60 sps:$4 sm:$0xff]   ;;  %v9217_v31 = vld [vmem:[%s13773_s5 + $0xae4] ss:$60 sps:$4 sm:$0xff]  }
 0x1f4   :  { %3266 = vmatprep.subr.bf16.mxu1 %v9136_v32  ;;  %3389 = vmatprep.subr.bf16.mxu0 %v9139_v33  ;;  %v9212_v32 = vld [vmem:[%s13773_s5 + $0x8] ss:$60 sps:$4 sm:$0xff]   ;;  %v9215_v33 = vld [vmem:[%s13773_s5 + $0xae0] ss:$60 sps:$4 sm:$0xff]  }
 0x1f7   :  { %3267 = vmatpush1.bf16.msra.mxu1 %v9134_v34  ;;  %3390 = vmatpush1.bf16.msra.mxu0 %v9137_v35  ;;  %v9220_v34 = vld [vmem:[%s13773_s5 + $0x714] ss:$60 sps:$4 sm:$0xff]   ;;  %v9223_v35 = vld [vmem:[%s13773_s5 + $0xa6c] ss:$60 sps:$4 sm:$0xff]  }
 0x1f8   :  { %3268 = vmatprep.subr.bf16.mxu1 %v9142_v36  ;;  %3391 = vmatprep.subr.bf16.mxu0 %v9145_v37  ;;  %v9218_v36 = vld [vmem:[%s13773_s5 + $0x710] ss:$60 sps:$4 sm:$0xff]   ;;  %v9221_v37 = vld [vmem:[%s13773_s5 + $0xa68] ss:$60 sps:$4 sm:$0xff]  }
 0x1fb   :  { %3269 = vmatpush1.bf16.msra.mxu1 %v9140_v38  ;;  %3392 = vmatpush1.bf16.msra.mxu0 %v9143_v39  ;;  %v9226_v38 = vld [vmem:[%s13773_s5 + $0x69c] ss:$60 sps:$4 sm:$0xff]   ;;  %v9229_v39 = vld [vmem:[%s13773_s5 + $0x9f4] ss:$60 sps:$4 sm:$0xff]  }
 0x1fc   :  { %3270 = vmatprep.subr.bf16.mxu1 %v9148_v40  ;;  %3393 = vmatprep.subr.bf16.mxu0 %v9151_v41  ;;  %v9224_v40 = vld [vmem:[%s13773_s5 + $0x698] ss:$60 sps:$4 sm:$0xff]   ;;  %v9227_v41 = vld [vmem:[%s13773_s5 + $0x9f0] ss:$60 sps:$4 sm:$0xff]  }
 0x1ff   :  { %3271 = vmatpush1.bf16.msra.mxu1 %v9146_v42  ;;  %3394 = vmatpush1.bf16.msra.mxu0 %v9149_v43  ;;  %v9232_v42 = vld [vmem:[%s13773_s5 + $0x624] ss:$60 sps:$4 sm:$0xff]   ;;  %v9235_v43 = vld [vmem:[%s13773_s5 + $0x97c] ss:$60 sps:$4 sm:$0xff]  }
 0x200   :  { %3272 = vmatprep.subr.bf16.mxu1 %v9154_v44  ;;  %3395 = vmatprep.subr.bf16.mxu0 %v9157_v45  ;;  %v9230_v44 = vld [vmem:[%s13773_s5 + $0x620] ss:$60 sps:$4 sm:$0xff]   ;;  %v9233_v45 = vld [vmem:[%s13773_s5 + $0x978] ss:$60 sps:$4 sm:$0xff]  }
 0x203   :  { %3273 = vmatpush1.bf16.msra.mxu1 %v9152_v46  ;;  %3396 = vmatpush1.bf16.msra.mxu0 %v9155_v47  ;;  %v9238_v46 = vld [vmem:[%s13773_s5 + $0x5ac] ss:$60 sps:$4 sm:$0xff]   ;;  %v9241_v47 = vld [vmem:[%s13773_s5 + $0x904] ss:$60 sps:$4 sm:$0xff]  }
 0x204   :  { %3274 = vmatprep.subr.bf16.mxu1 %v9160_v48  ;;  %3397 = vmatprep.subr.bf16.mxu0 %v9163_v49  ;;  %v9236_v48 = vld [vmem:[%s13773_s5 + $0x5a8] ss:$60 sps:$4 sm:$0xff]   ;;  %v9239_v49 = vld [vmem:[%s13773_s5 + $0x900] ss:$60 sps:$4 sm:$0xff]  }
 0x207   :  { %3275 = vmatpush1.bf16.msra.mxu1 %v9158_v51  ;;  %3398 = vmatpush1.bf16.msra.mxu0 %v9161_v54  ;;  %v9244_v51 = vld [vmem:[%s13773_s5 + $0x534] ss:$60 sps:$4 sm:$0xff]   ;;  %v9247_v54 = vld [vmem:[%s13773_s5 + $0x88c] ss:$60 sps:$4 sm:$0xff]  }
 0x208   :  { %3290 = vmatprep.subr.bf16.mxu1 %v9166_v56  ;;  %3399 = vmatprep.subr.bf16.mxu0 %v9169_v57  ;;  %v9242_v56 = vld [vmem:[%s13773_s5 + $0x530] ss:$60 sps:$4 sm:$0xff]   ;;  %v9245_v57 = vld [vmem:[%s13773_s5 + $0x888] ss:$60 sps:$4 sm:$0xff]  }
 0x20b   :  { %3291 = vmatpush2.bf16.msra.mxu1 %v9164_v58  ;;  %3400 = vmatpush2.bf16.msra.mxu0 %v9167_v60  ;;  %v9250_v58 = vld [vmem:[%s13773_s5 + $0x4bc] ss:$60 sps:$4 sm:$0xff]   ;;  %v9253_v60 = vld [vmem:[%s13773_s5 + $0x814] ss:$60 sps:$4 sm:$0xff]  }
 0x20c   :  { %3301 = vmatprep.subr.bf16.mxu1 %v9172_v62  ;;  %3401 = vmatprep.subr.bf16.mxu0 %v9175_v63  ;;  %v9248_v62 = vld [vmem:[%s13773_s5 + $0x4b8] ss:$60 sps:$4 sm:$0xff]   ;;  %v9251_v63 = vld [vmem:[%s13773_s5 + $0x810] ss:$60 sps:$4 sm:$0xff]  }
 0x20e   :  { %3293 = vmatmul.mubr.bf16.vlgmr.msra.gmra.mxu1 %v10932_v23 }
 0x20f   :  { %3302 = vmatpush1.bf16.msra.mxu1 %v9170_v0  ;;  %3333 = vmatprep.mubr.bf16.mxu1 %v10920_v18  ;;  %v9256_v0 = vld [vmem:[%s13773_s5 + $0x444] ss:$60 sps:$4 sm:$0xff]  }
 0x210   :  { %3402 = vmatpush2.bf16.msra.mxu0 %v9173_v1  ;;  %3303 = vmatprep.subr.bf16.mxu1 %v9178_v2  ;;  %v9259_v1 = vld [vmem:[%s13773_s5 + $0x79c] ss:$60 sps:$4 sm:$0xff]  }
 0x211   :  { %3403 = vmatprep.subr.bf16.mxu0 %v9181_v3  ;;  %v9254_v2 = vld [vmem:[%s13773_s5 + $0x440] ss:$60 sps:$4 sm:$0xff]   ;;  %v9257_v3 = vld [vmem:[%s13773_s5 + $0x798] ss:$60 sps:$4 sm:$0xff]  }
 0x213   :  { %3304 = vmatpush1.bf16.msra.mxu1 %v9176_v4  ;;  %v9262_v4 = vld [vmem:[%s13773_s5 + $0x3cc] ss:$60 sps:$4 sm:$0xff]  }
 0x214   :  { %3404 = vmatpush2.bf16.msra.mxu0 %v9179_v5  ;;  %3305 = vmatprep.subr.bf16.mxu1 %v9184_v6  ;;  %v9265_v5 = vld [vmem:[%s13773_s5 + $0xb5c] ss:$60 sps:$4 sm:$0xff]   ;;  %v9260_v6 = vld [vmem:[%s13773_s5 + $0x3c8] ss:$60 sps:$4 sm:$0xff]  }
 0x215   :  { %3405 = vmatprep.subr.bf16.mxu0 %v9187_v7  ;;  %v9263_v7 = vld [vmem:[%s13773_s5 + $0xb58] ss:$60 sps:$4 sm:$0xff]  }
 0x217   :  { %3306 = vmatpush1.bf16.msra.mxu1 %v9182_v8  ;;  %v9268_v8 = vld [vmem:[%s13773_s5 + $0xadc] ss:$60 sps:$4 sm:$0xff]  }
 0x218   :  { %3406 = vmatpush2.bf16.msra.mxu0 %v9185_v9  ;;  %3307 = vmatprep.subr.bf16.mxu1 %v9190_v10  ;;  %v9271_v9 = vld [vmem:[%s13773_s5 + $0x36c] ss:$60 sps:$4 sm:$0xff]   ;;  %v9266_v10 = vld [vmem:[%s13773_s5 + $0xad8] ss:$60 sps:$4 sm:$0xff]  }
 0x219   :  { %3407 = vmatprep.subr.bf16.mxu0 %v9193_v11  ;;  %v9269_v11 = vld [vmem:[%s13773_s5 + $0x368] ss:$60 sps:$4 sm:$0xff]  }
 0x21b   :  { %3308 = vmatpush1.bf16.msra.mxu1 %v9188_v12  ;;  %v9274_v12 = vld [vmem:[%s13773_s5 + $0xa64] ss:$60 sps:$4 sm:$0xff]  }
 0x21c   :  { %3408 = vmatpush2.bf16.msra.mxu0 %v9191_v13  ;;  %3309 = vmatprep.subr.bf16.mxu1 %v9196_v14  ;;  %v9277_v13 = vld [vmem:[%s13773_s5 + $0x2f4] ss:$60 sps:$4 sm:$0xff]   ;;  %v9272_v14 = vld [vmem:[%s13773_s5 + $0xa60] ss:$60 sps:$4 sm:$0xff]  }
 0x21d   :  { %3409 = vmatprep.subr.bf16.mxu0 %v9199_v15  ;;  %v9275_v15 = vld [vmem:[%s13773_s5 + $0x2f0] ss:$60 sps:$4 sm:$0xff]  }
 0x21f   :  { %3310 = vmatpush1.bf16.msra.mxu1 %v9194_v16  ;;  %v9280_v16 = vld [vmem:[%s13773_s5 + $0x9ec] ss:$60 sps:$4 sm:$0xff]  }
 0x220   :  { %3410 = vmatpush2.bf16.msra.mxu0 %v9197_v17  ;;  %3311 = vmatprep.subr.bf16.mxu1 %v9202_v20  ;;  %v9283_v17 = vld [vmem:[%s13773_s5 + $0x27c] ss:$60 sps:$4 sm:$0xff]   ;;  %v9278_v20 = vld [vmem:[%s13773_s5 + $0x9e8] ss:$60 sps:$4 sm:$0xff]  }
 0x221   :  { %3411 = vmatprep.subr.bf16.mxu0 %v9205_v21  ;;  %v9281_v21 = vld [vmem:[%s13773_s5 + $0x278] ss:$60 sps:$4 sm:$0xff]  }
 0x223   :  { %3312 = vmatpush1.bf16.msra.mxu1 %v9200_v24  ;;  %v9286_v24 = vld [vmem:[%s13773_s5 + $0x974] ss:$60 sps:$4 sm:$0xff]  }
 0x224   :  { %3412 = vmatpush2.bf16.msra.mxu0 %v9203_v25  ;;  %3313 = vmatprep.subr.bf16.mxu1 %v9208_v26  ;;  %v9289_v25 = vld [vmem:[%s13773_s5 + $0x204] ss:$60 sps:$4 sm:$0xff]   ;;  %v9284_v26 = vld [vmem:[%s13773_s5 + $0x970] ss:$60 sps:$4 sm:$0xff]  }
 0x225   :  { %3413 = vmatprep.subr.bf16.mxu0 %v9211_v27  ;;  %v9287_v27 = vld [vmem:[%s13773_s5 + $0x200] ss:$60 sps:$4 sm:$0xff]  }
 0x227   :  { %3314 = vmatpush1.bf16.msra.mxu1 %v9206_v28  ;;  %v9292_v28 = vld [vmem:[%s13773_s5 + $0x8fc] ss:$60 sps:$4 sm:$0xff]  }
 0x228   :  { %3414 = vmatpush2.bf16.msra.mxu0 %v9209_v29  ;;  %3315 = vmatprep.subr.bf16.mxu1 %v9214_v30  ;;  %v9295_v29 = vld [vmem:[%s13773_s5 + $0x18c] ss:$60 sps:$4 sm:$0xff]   ;;  %v9290_v30 = vld [vmem:[%s13773_s5 + $0x8f8] ss:$60 sps:$4 sm:$0xff]  }
 0x229   :  { %3506 = vmatprep.subr.bf16.mxu0 %v9217_v31  ;;  %v9293_v31 = vld [vmem:[%s13773_s5 + $0x188] ss:$60 sps:$4 sm:$0xff]  }
 0x22b   :  { %3416 = vmatmul.mubr.bf16.vlgmr.msra.gmra.mxu0 %v10930_v22  ;;  %3316 = vmatpush1.bf16.msra.mxu1 %v9212_v32  ;;  %v9298_v32 = vld [vmem:[%s13773_s5 + $0x884] ss:$60 sps:$4 sm:$0xff]  }
 0x22c   :  { %3507 = vmatpush1.bf16.msra.mxu0 %v9215_v33  ;;  %8352 = vmatprep.mubr.msk.bf16.mxu0 %vm3215_vm4, %v10922_v19  ;;  %v9301_v33 = vld [vmem:[%s13773_s5 + $0x114] ss:$60 sps:$4 sm:$0xff]  }
 0x22d   :  { %3317 = vmatprep.subr.bf16.mxu1 %v9220_v34  ;;  %3508 = vmatprep.subr.bf16.mxu0 %v9223_v35  ;;  %v9296_v34 = vld [vmem:[%s13773_s5 + $0x880] ss:$60 sps:$4 sm:$0xff]   ;;  %v9299_v35 = vld [vmem:[%s13773_s5 + $0x110] ss:$60 sps:$4 sm:$0xff]  }
 0x22f   :  { %3318 = vmatpush2.bf16.msra.mxu1 %v9218_v36  ;;  %v9304_v36 = vld [vmem:[%s13773_s5 + $0x80c] ss:$60 sps:$4 sm:$0xff]  }
 0x230   :  { %3509 = vmatpush1.bf16.msra.mxu0 %v9221_v37  ;;  %3319 = vmatprep.subr.bf16.mxu1 %v9226_v38  ;;  %v9307_v37 = vld [vmem:[%s13773_s5 + $0x9c] ss:$60 sps:$4 sm:$0xff]   ;;  %v9302_v38 = vld [vmem:[%s13773_s5 + $0x808] ss:$60 sps:$4 sm:$0xff]  }
 0x231   :  { %3510 = vmatprep.subr.bf16.mxu0 %v9229_v39  ;;  %v9305_v39 = vld [vmem:[%s13773_s5 + $0x98] ss:$60 sps:$4 sm:$0xff]  }
 0x233   :  { %3320 = vmatpush2.bf16.msra.mxu1 %v9224_v40  ;;  %v9310_v40 = vld [vmem:[%s13773_s5 + $0x794] ss:$60 sps:$4 sm:$0xff]  }
 0x234   :  { %3511 = vmatpush1.bf16.msra.mxu0 %v9227_v41  ;;  %3321 = vmatprep.subr.bf16.mxu1 %v9232_v42  ;;  %v9313_v41 = vld [vmem:[%s13773_s5 + $0x24] ss:$60 sps:$4 sm:$0xff]   ;;  %v9308_v42 = vld [vmem:[%s13773_s5 + $0x790] ss:$60 sps:$4 sm:$0xff]  }
 0x235   :  { %3512 = vmatprep.subr.bf16.mxu0 %v9235_v43  ;;  %v9311_v43 = vld [vmem:[%s13773_s5 + $0x20] ss:$60 sps:$4 sm:$0xff]  }
 0x237   :  { %3322 = vmatpush2.bf16.msra.mxu1 %v9230_v44  ;;  %v9316_v44 = vld [vmem:[%s13773_s5 + $0xb54] ss:$60 sps:$4 sm:$0xff]  }
 0x238   :  { %3513 = vmatpush1.bf16.msra.mxu0 %v9233_v45  ;;  %3323 = vmatprep.subr.bf16.mxu1 %v9238_v46  ;;  %v9319_v45 = vld [vmem:[%s13773_s5 + $0x72c] ss:$60 sps:$4 sm:$0xff]  }
 0x239   :  { %3514 = vmatprep.subr.bf16.mxu0 %v9241_v47  ;;  %v9314_v46 = vld [vmem:[%s13773_s5 + $0xb50] ss:$60 sps:$4 sm:$0xff]   ;;  %v9317_v47 = vld [vmem:[%s13773_s5 + $0x728] ss:$60 sps:$4 sm:$0xff]  }
 0x23b   :  { %3324 = vmatpush2.bf16.msra.mxu1 %v9236_v48  ;;  %v9322_v48 = vld [vmem:[%s13773_s5 + $0x364] ss:$60 sps:$4 sm:$0xff]  }
 0x23c   :  { %3515 = vmatpush1.bf16.msra.mxu0 %v9239_v49  ;;  %3325 = vmatprep.subr.bf16.mxu1 %v9244_v51  ;;  %v9325_v49 = vld [vmem:[%s13773_s5 + $0x6b4] ss:$60 sps:$4 sm:$0xff]   ;;  %v9320_v51 = vld [vmem:[%s13773_s5 + $0x360] ss:$60 sps:$4 sm:$0xff]  }
 0x23d   :  { %3516 = vmatprep.subr.bf16.mxu0 %v9247_v54  ;;  %v9323_v54 = vld [vmem:[%s13773_s5 + $0x6b0] ss:$60 sps:$4 sm:$0xff]  }
 0x23f   :  { %3326 = vmatpush2.bf16.msra.mxu1 %v9242_v56  ;;  %v9328_v56 = vld [vmem:[%s13773_s5 + $0x2ec] ss:$60 sps:$4 sm:$0xff]  }
 0x240   :  { %3517 = vmatpush1.bf16.msra.mxu0 %v9245_v57  ;;  %3327 = vmatprep.subr.bf16.mxu1 %v9250_v58  ;;  %v9331_v57 = vld [vmem:[%s13773_s5 + $0x63c] ss:$60 sps:$4 sm:$0xff]   ;;  %v9326_v58 = vld [vmem:[%s13773_s5 + $0x2e8] ss:$60 sps:$4 sm:$0xff]  }
 0x241   :  { %3518 = vmatprep.subr.bf16.mxu0 %v9253_v60  ;;  %v9329_v60 = vld [vmem:[%s13773_s5 + $0x638] ss:$60 sps:$4 sm:$0xff]  }
 0x243   :  { %3328 = vmatpush2.bf16.msra.mxu1 %v9248_v62  ;;  %v9334_v62 = vld [vmem:[%s13773_s5 + $0x274] ss:$60 sps:$4 sm:$0xff]  }
 0x244   :  { %3519 = vmatpush1.bf16.msra.mxu0 %v9251_v63  ;;  %3329 = vmatprep.subr.bf16.mxu1 %v9256_v0  ;;  %v9337_v63 = vld [vmem:[%s13773_s5 + $0x5c4] ss:$60 sps:$4 sm:$0xff]   ;;  %v9332_v0 = vld [vmem:[%s13773_s5 + $0x270] ss:$60 sps:$4 sm:$0xff]  }
 0x245   :  { %3520 = vmatprep.subr.bf16.mxu0 %v9259_v1  ;;  %v9335_v1 = vld [vmem:[%s13773_s5 + $0x5c0] ss:$60 sps:$4 sm:$0xff]  }
 0x247   :  { %3330 = vmatpush2.bf16.msra.mxu1 %v9254_v2  ;;  %v9340_v2 = vld [vmem:[%s13773_s5 + $0x1fc] ss:$60 sps:$4 sm:$0xff]  }
 0x248   :  { %3521 = vmatpush1.bf16.msra.mxu0 %v9257_v3  ;;  %3331 = vmatprep.subr.bf16.mxu1 %v9262_v4  ;;  %v9343_v3 = vld [vmem:[%s13773_s5 + $0x54c] ss:$60 sps:$4 sm:$0xff]   ;;  %v9338_v4 = vld [vmem:[%s13773_s5 + $0x1f8] ss:$60 sps:$4 sm:$0xff]  }
 0x249   :  { %3536 = vmatprep.subr.bf16.mxu0 %v9265_v5  ;;  %v9341_v5 = vld [vmem:[%s13773_s5 + $0x548] ss:$60 sps:$4 sm:$0xff]  }
 0x24b   :  { %3332 = vmatpush2.bf16.msra.mxu1 %v9260_v6  ;;  %v9346_v6 = vld [vmem:[%s13773_s5 + $0x184] ss:$60 sps:$4 sm:$0xff]  }
 0x24c   :  { %3537 = vmatpush2.bf16.msra.mxu0 %v9263_v7  ;;  %3424 = vmatprep.subr.bf16.mxu1 %v9268_v8  ;;  %v9349_v7 = vld [vmem:[%s13773_s5 + $0x4d4] ss:$60 sps:$4 sm:$0xff]   ;;  %v9344_v8 = vld [vmem:[%s13773_s5 + $0x180] ss:$60 sps:$4 sm:$0xff]  }
 0x24d   :  { %3547 = vmatprep.subr.bf16.mxu0 %v9271_v9  ;;  %v9347_v9 = vld [vmem:[%s13773_s5 + $0x4d0] ss:$60 sps:$4 sm:$0xff]  }
 0x24e   :  { %3334 = vmatmul.mubr.bf16.vlgmr.msra.gmra.mxu1 %v10930_v22 }
 0x24f   :  { %3539 = vmatmul.mubr.bf16.vlgmr.msra.gmra.mxu0 %v10932_v23  ;;  %3425 = vmatpush1.bf16.msra.mxu1 %v9266_v10  ;;  %v9352_v10 = vld [vmem:[%s13773_s5 + $0x10c] ss:$60 sps:$4 sm:$0xff]  }
 0x250   :  { %8351 = vmatprep.mubr.msk.bf16.mxu1 %vm3215_vm4, %v10922_v19  ;;  %3548 = vmatpush1.bf16.msra.mxu0 %v9269_v11  ;;  %v9355_v11 = vld [vmem:[%s13773_s5 + $0x45c] ss:$60 sps:$4 sm:$0xff]  }
 0x251   :  { %3579 = vmatprep.mubr.bf16.mxu0 %v10920_v18  ;;  %3426 = vmatprep.subr.bf16.mxu1 %v9274_v12  ;;  %v9350_v12 = vld [vmem:[%s13773_s5 + $0x108] ss:$60 sps:$4 sm:$0xff]  }
 0x252   :  { %3549 = vmatprep.subr.bf16.mxu0 %v9277_v13  ;;  %v9353_v13 = vld [vmem:[%s13773_s5 + $0x458] ss:$60 sps:$4 sm:$0xff]  }
 0x253   :  { %3427 = vmatpush1.bf16.msra.mxu1 %v9272_v14  ;;  %v9358_v14 = vld [vmem:[%s13773_s5 + $0x94] ss:$60 sps:$4 sm:$0xff]  }
 0x254   :  { %3550 = vmatpush1.bf16.msra.mxu0 %v9275_v15  ;;  %3428 = vmatprep.subr.bf16.mxu1 %v9280_v16  ;;  %v9361_v15 = vld [vmem:[%s13773_s5 + $0x3e4] ss:$60 sps:$4 sm:$0xff]   ;;  %v9356_v16 = vld [vmem:[%s13773_s5 + $0x90] ss:$60 sps:$4 sm:$0xff]  }
 0x255   :  { %3551 = vmatprep.subr.bf16.mxu0 %v9283_v17  ;;  %v9359_v17 = vld [vmem:[%s13773_s5 + $0x3e0] ss:$60 sps:$4 sm:$0xff]  }
 0x257   :  { %3429 = vmatpush1.bf16.msra.mxu1 %v9278_v20  ;;  %v9364_v20 = vld [vmem:[%s13773_s5 + $0x1c] ss:$60 sps:$4 sm:$0xff]  }
 0x258   :  { %3552 = vmatpush1.bf16.msra.mxu0 %v9281_v21  ;;  %3430 = vmatprep.subr.bf16.mxu1 %v9286_v24  ;;  %v9367_v21 = vld [vmem:[%s13773_s5 + $0xaf4] ss:$60 sps:$4 sm:$0xff]  }
 0x259   :  { %3553 = vmatprep.subr.bf16.mxu0 %v9289_v25  ;;  %v9362_v24 = vld [vmem:[%s13773_s5 + $0x18] ss:$60 sps:$4 sm:$0xff]   ;;  %v9365_v25 = vld [vmem:[%s13773_s5 + $0xaf0] ss:$60 sps:$4 sm:$0xff]  }
 0x25b   :  { %3431 = vmatpush1.bf16.msra.mxu1 %v9284_v26  ;;  %v9370_v26 = vld [vmem:[%s13773_s5 + $0x724] ss:$60 sps:$4 sm:$0xff]  }
 0x25c   :  { %3554 = vmatpush1.bf16.msra.mxu0 %v9287_v27  ;;  %3432 = vmatprep.subr.bf16.mxu1 %v9292_v28  ;;  %v9373_v27 = vld [vmem:[%s13773_s5 + $0xa7c] ss:$60 sps:$4 sm:$0xff]  }
 0x25d   :  { %3555 = vmatprep.subr.bf16.mxu0 %v9295_v29  ;;  %v9368_v28 = vld [vmem:[%s13773_s5 + $0x720] ss:$60 sps:$4 sm:$0xff]   ;;  %v9371_v29 = vld [vmem:[%s13773_s5 + $0xa78] ss:$60 sps:$4 sm:$0xff]  }
 0x25f   :  { %3433 = vmatpush1.bf16.msra.mxu1 %v9290_v30  ;;  %v9376_v30 = vld [vmem:[%s13773_s5 + $0x6ac] ss:$60 sps:$4 sm:$0xff]  }
 0x260   :  { %3556 = vmatpush1.bf16.msra.mxu0 %v9293_v31  ;;  %3434 = vmatprep.subr.bf16.mxu1 %v9298_v32  ;;  %v9379_v31 = vld [vmem:[%s13773_s5 + $0xa04] ss:$60 sps:$4 sm:$0xff]  }
 0x261   :  { %3557 = vmatprep.subr.bf16.mxu0 %v9301_v33  ;;  %v9374_v32 = vld [vmem:[%s13773_s5 + $0x6a8] ss:$60 sps:$4 sm:$0xff]   ;;  %v9377_v33 = vld [vmem:[%s13773_s5 + $0xa00] ss:$60 sps:$4 sm:$0xff]  }
 0x263   :  { %3435 = vmatpush1.bf16.msra.mxu1 %v9296_v34  ;;  %v9382_v34 = vld [vmem:[%s13773_s5 + $0x634] ss:$60 sps:$4 sm:$0xff]  }
 0x264   :  { %3558 = vmatpush1.bf16.msra.mxu0 %v9299_v35  ;;  %3436 = vmatprep.subr.bf16.mxu1 %v9304_v36  ;;  %v9385_v35 = vld [vmem:[%s13773_s5 + $0x98c] ss:$60 sps:$4 sm:$0xff]  }
 0x265   :  { %3559 = vmatprep.subr.bf16.mxu0 %v9307_v37  ;;  %v9380_v36 = vld [vmem:[%s13773_s5 + $0x630] ss:$60 sps:$4 sm:$0xff]   ;;  %v9383_v37 = vld [vmem:[%s13773_s5 + $0x988] ss:$60 sps:$4 sm:$0xff]  }
 0x267   :  { %3437 = vmatpush1.bf16.msra.mxu1 %v9302_v38  ;;  %v9388_v38 = vld [vmem:[%s13773_s5 + $0x5bc] ss:$60 sps:$4 sm:$0xff]  }
 0x268   :  { %3560 = vmatpush1.bf16.msra.mxu0 %v9305_v39  ;;  %3438 = vmatprep.subr.bf16.mxu1 %v9310_v40  ;;  %v9391_v39 = vld [vmem:[%s13773_s5 + $0x914] ss:$60 sps:$4 sm:$0xff]  }
 0x269   :  { %3561 = vmatprep.subr.bf16.mxu0 %v9313_v41  ;;  %v9386_v40 = vld [vmem:[%s13773_s5 + $0x5b8] ss:$60 sps:$4 sm:$0xff]   ;;  %v9389_v41 = vld [vmem:[%s13773_s5 + $0x910] ss:$60 sps:$4 sm:$0xff]  }
 0x26b   :  { %3439 = vmatpush1.bf16.msra.mxu1 %v9308_v42  ;;  %v9394_v42 = vld [vmem:[%s13773_s5 + $0x544] ss:$60 sps:$4 sm:$0xff]  }
 0x26c   :  { %3562 = vmatpush1.bf16.msra.mxu0 %v9311_v43  ;;  %3454 = vmatprep.subr.bf16.mxu1 %v9316_v44  ;;  %v9397_v43 = vld [vmem:[%s13773_s5 + $0x89c] ss:$60 sps:$4 sm:$0xff]  }
 0x26d   :  { %3563 = vmatprep.subr.bf16.mxu0 %v9319_v45  ;;  %v9392_v44 = vld [vmem:[%s13773_s5 + $0x540] ss:$60 sps:$4 sm:$0xff]   ;;  %v9395_v45 = vld [vmem:[%s13773_s5 + $0x898] ss:$60 sps:$4 sm:$0xff]  }
 0x26f   :  { %3455 = vmatpush2.bf16.msra.mxu1 %v9314_v46  ;;  %v9400_v46 = vld [vmem:[%s13773_s5 + $0x4cc] ss:$60 sps:$4 sm:$0xff]  }
 0x270   :  { %3564 = vmatpush2.bf16.msra.mxu0 %v9317_v47  ;;  %3465 = vmatprep.subr.bf16.mxu1 %v9322_v48  ;;  %v9403_v47 = vld [vmem:[%s13773_s5 + $0x824] ss:$60 sps:$4 sm:$0xff]  }
 0x271   :  { %3565 = vmatprep.subr.bf16.mxu0 %v9325_v49  ;;  %v9398_v48 = vld [vmem:[%s13773_s5 + $0x4c8] ss:$60 sps:$4 sm:$0xff]   ;;  %v9401_v49 = vld [vmem:[%s13773_s5 + $0x820] ss:$60 sps:$4 sm:$0xff]  }
 0x272   :  { %3457 = vmatmul.mubr.bf16.vlgmr.msra.gmra.mxu1 %v10932_v23 }
 0x273   :  { %3466 = vmatpush1.bf16.msra.mxu1 %v9320_v51  ;;  %3497 = vmatprep.mubr.bf16.mxu1 %v10920_v18  ;;  %v9406_v51 = vld [vmem:[%s13773_s5 + $0x454] ss:$60 sps:$4 sm:$0xff]  }
 0x274   :  { %3566 = vmatpush2.bf16.msra.mxu0 %v9323_v54  ;;  %3467 = vmatprep.subr.bf16.mxu1 %v9328_v56  ;;  %v9409_v54 = vld [vmem:[%s13773_s5 + $0x7ac] ss:$60 sps:$4 sm:$0xff]  }
 0x275   :  { %3567 = vmatprep.subr.bf16.mxu0 %v9331_v57  ;;  %v9404_v56 = vld [vmem:[%s13773_s5 + $0x450] ss:$60 sps:$4 sm:$0xff]   ;;  %v9407_v57 = vld [vmem:[%s13773_s5 + $0x7a8] ss:$60 sps:$4 sm:$0xff]  }
 0x277   :  { %3468 = vmatpush1.bf16.msra.mxu1 %v9326_v58  ;;  %v9412_v58 = vld [vmem:[%s13773_s5 + $0x3dc] ss:$60 sps:$4 sm:$0xff]  }
 0x278   :  { %3568 = vmatpush2.bf16.msra.mxu0 %v9329_v60  ;;  %3469 = vmatprep.subr.bf16.mxu1 %v9334_v62  ;;  %v9415_v60 = vld [vmem:[%s13773_s5 + $0xb6c] ss:$60 sps:$4 sm:$0xff]  }
 0x279   :  { %3569 = vmatprep.subr.bf16.mxu0 %v9337_v63 }
 0x27b   :  { %3470 = vmatpush1.bf16.msra.mxu1 %v9332_v0  ;;  %v9410_v0 = vld [vmem:[%s13773_s5 + $0x3d8] ss:$60 sps:$4 sm:$0xff]  }
 0x27c   :  { %3570 = vmatpush2.bf16.msra.mxu0 %v9335_v1  ;;  %3471 = vmatprep.subr.bf16.mxu1 %v9340_v2 }
 0x27d   :  { %3571 = vmatprep.subr.bf16.mxu0 %v9343_v3  ;;  %v9413_v3 = vld [vmem:[%s13773_s5 + $0xb68] ss:$60 sps:$4 sm:$0xff]  }
 0x27f   :  { %3472 = vmatpush1.bf16.msra.mxu1 %v9338_v4  ;;  %v9418_v4 = vld [vmem:[%s13773_s5 + $0xaec] ss:$60 sps:$4 sm:$0xff]  }
 0x280   :  { %3572 = vmatpush2.bf16.msra.mxu0 %v9341_v5  ;;  %3473 = vmatprep.subr.bf16.mxu1 %v9346_v6  ;;  %v9421_v5 = vld [vmem:[%s13773_s5 + $0x37c] ss:$60 sps:$4 sm:$0xff]  }
 0x281   :  { %3573 = vmatprep.subr.bf16.mxu0 %v9349_v7 }
 0x283   :  { %3474 = vmatpush1.bf16.msra.mxu1 %v9344_v8  ;;  %v9416_v8 = vld [vmem:[%s13773_s5 + $0xae8] ss:$60 sps:$4 sm:$0xff]  }
 0x284   :  { %3574 = vmatpush2.bf16.msra.mxu0 %v9347_v9  ;;  %3475 = vmatprep.subr.bf16.mxu1 %v9352_v10 }
 0x285   :  { %3575 = vmatprep.subr.bf16.mxu0 %v9355_v11  ;;  %v9419_v11 = vld [vmem:[%s13773_s5 + $0x378] ss:$60 sps:$4 sm:$0xff]  }
 0x287   :  { %3476 = vmatpush1.bf16.msra.mxu1 %v9350_v12  ;;  %v9424_v12 = vld [vmem:[%s13773_s5 + $0xa74] ss:$60 sps:$4 sm:$0xff]  }
 0x288   :  { %3576 = vmatpush2.bf16.msra.mxu0 %v9353_v13  ;;  %3477 = vmatprep.subr.bf16.mxu1 %v9358_v14  ;;  %v9427_v13 = vld [vmem:[%s13773_s5 + $0x304] ss:$60 sps:$4 sm:$0xff]   ;;  %v9422_v14 = vld [vmem:[%s13773_s5 + $0xa70] ss:$60 sps:$4 sm:$0xff]  }
 0x289   :  { %3577 = vmatprep.subr.bf16.mxu0 %v9361_v15  ;;  %v9425_v15 = vld [vmem:[%s13773_s5 + $0x300] ss:$60 sps:$4 sm:$0xff]  }
 0x28b   :  { %3478 = vmatpush1.bf16.msra.mxu1 %v9356_v16  ;;  %v9430_v16 = vld [vmem:[%s13773_s5 + $0x9fc] ss:$60 sps:$4 sm:$0xff]  }
 0x28c   :  { %3578 = vmatpush2.bf16.msra.mxu0 %v9359_v17  ;;  %3479 = vmatprep.subr.bf16.mxu1 %v9364_v20  ;;  %v9433_v17 = vld [vmem:[%s13773_s5 + $0x28c] ss:$60 sps:$4 sm:$0xff]   ;;  %v9428_v20 = vld [vmem:[%s13773_s5 + $0x9f8] ss:$60 sps:$4 sm:$0xff]  }
 0x28d   :  { %3670 = vmatprep.subr.bf16.mxu0 %v9367_v21  ;;  %v9431_v21 = vld [vmem:[%s13773_s5 + $0x288] ss:$60 sps:$4 sm:$0xff]  }
 0x28f   :  { %3580 = vmatmul.mubr.bf16.vlgmr.msra.gmra.mxu0 %v10930_v22  ;;  %3480 = vmatpush1.bf16.msra.mxu1 %v9362_v24  ;;  %v9436_v24 = vld [vmem:[%s13773_s5 + $0x984] ss:$60 sps:$4 sm:$0xff]  }
 0x290   :  { %3671 = vmatpush1.bf16.msra.mxu0 %v9365_v25  ;;  %8354 = vmatprep.mubr.msk.bf16.mxu0 %vm3215_vm4, %v10922_v19  ;;  %v9439_v25 = vld [vmem:[%s13773_s5 + $0x214] ss:$60 sps:$4 sm:$0xff]  }
 0x291   :  { %3481 = vmatprep.subr.bf16.mxu1 %v9370_v26  ;;  %3672 = vmatprep.subr.bf16.mxu0 %v9373_v27  ;;  %v9434_v26 = vld [vmem:[%s13773_s5 + $0x980] ss:$60 sps:$4 sm:$0xff]   ;;  %v9437_v27 = vld [vmem:[%s13773_s5 + $0x210] ss:$60 sps:$4 sm:$0xff]  }
 0x293   :  { %3482 = vmatpush2.bf16.msra.mxu1 %v9368_v28  ;;  %v9442_v28 = vld [vmem:[%s13773_s5 + $0x90c] ss:$60 sps:$4 sm:$0xff]  }
 0x294   :  { %3673 = vmatpush1.bf16.msra.mxu0 %v9371_v29  ;;  %3483 = vmatprep.subr.bf16.mxu1 %v9376_v30  ;;  %v9445_v29 = vld [vmem:[%s13773_s5 + $0x19c] ss:$60 sps:$4 sm:$0xff]   ;;  %v9440_v30 = vld [vmem:[%s13773_s5 + $0x908] ss:$60 sps:$4 sm:$0xff]  }
 0x295   :  { %3674 = vmatprep.subr.bf16.mxu0 %v9379_v31  ;;  %v9443_v31 = vld [vmem:[%s13773_s5 + $0x198] ss:$60 sps:$4 sm:$0xff]  }
 0x297   :  { %3484 = vmatpush2.bf16.msra.mxu1 %v9374_v32  ;;  %v9448_v32 = vld [vmem:[%s13773_s5 + $0x894] ss:$60 sps:$4 sm:$0xff]  }
 0x298   :  { %3675 = vmatpush1.bf16.msra.mxu0 %v9377_v33  ;;  %3485 = vmatprep.subr.bf16.mxu1 %v9382_v34  ;;  %v9451_v33 = vld [vmem:[%s13773_s5 + $0x124] ss:$60 sps:$4 sm:$0xff]   ;;  %v9446_v34 = vld [vmem:[%s13773_s5 + $0x890] ss:$60 sps:$4 sm:$0xff]  }
 0x299   :  { %3676 = vmatprep.subr.bf16.mxu0 %v9385_v35  ;;  %v9449_v35 = vld [vmem:[%s13773_s5 + $0x120] ss:$60 sps:$4 sm:$0xff]  }
 0x29b   :  { %3486 = vmatpush2.bf16.msra.mxu1 %v9380_v36  ;;  %v9454_v36 = vld [vmem:[%s13773_s5 + $0x81c] ss:$60 sps:$4 sm:$0xff]  }
 0x29c   :  { %3677 = vmatpush1.bf16.msra.mxu0 %v9383_v37  ;;  %3487 = vmatprep.subr.bf16.mxu1 %v9388_v38  ;;  %v9457_v37 = vld [vmem:[%s13773_s5 + $0xac] ss:$60 sps:$4 sm:$0xff]   ;;  %v11639_v38 = vld [vmem:[%s13774_s6] sm:$0xff] }
 0x29d   :  { %3678 = vmatprep.subr.bf16.mxu0 %v9391_v39  ;;  %v9452_v39 = vld [vmem:[%s13773_s5 + $0x818] ss:$60 sps:$4 sm:$0xff]  }
 0x29f   :  { %3488 = vmatpush2.bf16.msra.mxu1 %v9386_v40  ;;  %v9455_v40 = vld [vmem:[%s13773_s5 + $0xa8] ss:$60 sps:$4 sm:$0xff]  }
 0x2a0   :  { %3679 = vmatpush1.bf16.msra.mxu0 %v9389_v41  ;;  %3489 = vmatprep.subr.bf16.mxu1 %v9394_v42  ;;  %v9460_v41 = vld [vmem:[%s13773_s5 + $0x7a4] ss:$60 sps:$4 sm:$0xff]   ;;  %v1243_v42 = vrot.slane %v11639_v38, %v10748_v52 }
 0x2a1   :  { %3680 = vmatprep.subr.bf16.mxu0 %v9397_v43  ;;  %v9463_v43 = vld [vmem:[%s13773_s5 + $0x34] ss:$60 sps:$4 sm:$0xff]  }
 0x2a3   :  { %3490 = vmatpush2.bf16.msra.mxu1 %v9392_v44  ;;  %v1247_v44 = vrot.slane %v11639_v38, %v10751_v53 }
 0x2a4   :  { %3681 = vmatpush1.bf16.msra.mxu0 %v9395_v45  ;;  %3491 = vmatprep.subr.bf16.mxu1 %v9400_v46  ;;  %v9458_v45 = vld [vmem:[%s13773_s5 + $0x7a0] ss:$60 sps:$4 sm:$0xff]   ;;  %v9461_v46 = vld [vmem:[%s13773_s5 + $0x30] ss:$60 sps:$4 sm:$0xff]  }
 0x2a5   :  { %3682 = vmatprep.subr.bf16.mxu0 %v9403_v47  ;;  %v9466_v47 = vld [vmem:[%s13773_s5 + $0xb64] ss:$60 sps:$4 sm:$0xff]  }
 0x2a7   :  { %3492 = vmatpush2.bf16.msra.mxu1 %v9398_v48 }
 0x2a8   :  { %3683 = vmatpush1.bf16.msra.mxu0 %v9401_v49  ;;  %3493 = vmatprep.subr.bf16.mxu1 %v9406_v51  ;;  %v9469_v49 = vld [vmem:[%s13773_s5 + $0x73c] ss:$60 sps:$4 sm:$0xff]  }
 0x2a9   :  { %3684 = vmatprep.subr.bf16.mxu0 %v9409_v54 }
 0x2aa   :  { %v11539_v62 = vpop.f32.mrf.mxu1  ;;  %v11541_v63 = vpop.f32.mrf.mxu0 }
 0x2ab   :  { %3494 = vmatpush2.bf16.msra.mxu1 %v9404_v56  ;;  %v3254_v48 = vadd.f32 %v11539_v62, %v1243_v42  ;;  %v9472_v62 = vld [vmem:[%s13773_s5 + $0x374] ss:$60 sps:$4 sm:$0xff]  }
 0x2ac   :  { %3685 = vmatpush1.bf16.msra.mxu0 %v9407_v57  ;;  %v11546_v1 = vpop.f32.mrf.mxu1  ;;  %v11548_v2 = vpop.f32.mrf.mxu0  ;;  %3495 = vmatprep.subr.bf16.mxu1 %v9412_v58  ;;  %v9464_v57 = vld [vmem:[%s13773_s5 + $0xb60] ss:$60 sps:$4 sm:$0xff]  }
 0x2ad   :  { %3700 = vmatprep.subr.bf16.mxu0 %v9415_v60  ;;  %v3256_v54 = vadd.f32 %v11546_v1, %v1247_v44  ;;  %v9467_v60 = vld [vmem:[%s13773_s5 + $0x738] ss:$60 sps:$4 sm:$0xff]   ;;  %v9475_v1 = vld [vmem:[%s13773_s5 + $0x6c4] ss:$60 sps:$4 sm:$0xff]   ;;  %v9516_v44 = vld [vmem:[%s13773_s5 + $0x730] ss:$60 sps:$4 sm:$0xff]  }
 0x2ae   :  { %v3257_v6 = vpop.f32.mrf.mxu1  ;;  %v3380_v7 = vpop.f32.mrf.mxu0 }
 0x2af   :  { %3496 = vmatpush2.bf16.msra.mxu1 %v9410_v0  ;;  %v9473_v6 = vld [vmem:[%s13773_s5 + $0x6c0] ss:$60 sps:$4 sm:$0xff]  }
 0x2b0   :  { %3701 = vmatpush2.bf16.msra.mxu0 %v9413_v3  ;;  %v3258_v9 = vpop.f32.mrf.mxu1  ;;  %v3381_v10 = vpop.f32.mrf.mxu0  ;;  %3588 = vmatprep.subr.bf16.mxu1 %v9418_v4  ;;  %v9470_v4 = vld [vmem:[%s13773_s5 + $0x370] ss:$60 sps:$4 sm:$0xff]   ;;  %v9478_v7 = vld [vmem:[%s13773_s5 + $0x2fc] ss:$60 sps:$4 sm:$0xff]  }
 0x2b1   :  { %3711 = vmatprep.subr.bf16.mxu0 %v9421_v5  ;;  %v9476_v9 = vld [vmem:[%s13773_s5 + $0x2f8] ss:$60 sps:$4 sm:$0xff]   ;;  %v9479_v10 = vld [vmem:[%s13773_s5 + $0x648] ss:$60 sps:$4 sm:$0xff]  }
 0x2b2   :  { %3498 = vmatmul.mubr.bf16.vlgmr.msra.gmra.mxu1 %v10930_v22 }
 0x2b3   :  { %3703 = vmatmul.mubr.bf16.vlgmr.msra.gmra.mxu0 %v10932_v23  ;;  %3589 = vmatpush1.bf16.msra.mxu1 %v9416_v8  ;;  %v9481_v8 = vld [vmem:[%s13773_s5 + $0x64c] ss:$60 sps:$4 sm:$0xff]  }
 0x2b4   :  { %8353 = vmatprep.mubr.msk.bf16.mxu1 %vm3215_vm4, %v10922_v19  ;;  %3712 = vmatpush1.bf16.msra.mxu0 %v9419_v11  ;;  %v9484_v11 = vld [vmem:[%s13773_s5 + $0x284] ss:$60 sps:$4 sm:$0xff]  }
 0x2b5   :  { %3743 = vmatprep.mubr.bf16.mxu0 %v10920_v18  ;;  %3590 = vmatprep.subr.bf16.mxu1 %v9424_v12  ;;  %v9487_v12 = vld [vmem:[%s13773_s5 + $0x5d4] ss:$60 sps:$4 sm:$0xff]  }
 0x2b6   :  { %3713 = vmatprep.subr.bf16.mxu0 %v9427_v13  ;;  %v9482_v13 = vld [vmem:[%s13773_s5 + $0x280] ss:$60 sps:$4 sm:$0xff]  }
 0x2b7   :  { %3591 = vmatpush1.bf16.msra.mxu1 %v9422_v14  ;;  %v9485_v14 = vld [vmem:[%s13773_s5 + $0x5d0] ss:$60 sps:$4 sm:$0xff]  }
 0x2b8   :  { %3714 = vmatpush1.bf16.msra.mxu0 %v9425_v15  ;;  %3592 = vmatprep.subr.bf16.mxu1 %v9430_v16  ;;  %v9490_v15 = vld [vmem:[%s13773_s5 + $0x20c] ss:$60 sps:$4 sm:$0xff]   ;;  %v9493_v16 = vld [vmem:[%s13773_s5 + $0x55c] ss:$60 sps:$4 sm:$0xff]  }
 0x2b9   :  { %3715 = vmatprep.subr.bf16.mxu0 %v9433_v17  ;;  %v9488_v17 = vld [vmem:[%s13773_s5 + $0x208] ss:$60 sps:$4 sm:$0xff]  }
 0x2bb   :  { %3593 = vmatpush1.bf16.msra.mxu1 %v9428_v20  ;;  %v9491_v20 = vld [vmem:[%s13773_s5 + $0x558] ss:$60 sps:$4 sm:$0xff]  }
 0x2bc   :  { %3716 = vmatpush1.bf16.msra.mxu0 %v9431_v21  ;;  %3594 = vmatprep.subr.bf16.mxu1 %v9436_v24  ;;  %v9496_v21 = vld [vmem:[%s13773_s5 + $0x194] ss:$60 sps:$4 sm:$0xff]   ;;  %v9499_v24 = vld [vmem:[%s13773_s5 + $0x4e4] ss:$60 sps:$4 sm:$0xff]  }
 0x2bd   :  { %3717 = vmatprep.subr.bf16.mxu0 %v9439_v25  ;;  %v9494_v25 = vld [vmem:[%s13773_s5 + $0x190] ss:$60 sps:$4 sm:$0xff]  }
 0x2bf   :  { %3595 = vmatpush1.bf16.msra.mxu1 %v9434_v26  ;;  %v9497_v26 = vld [vmem:[%s13773_s5 + $0x4e0] ss:$60 sps:$4 sm:$0xff]  }
 0x2c0   :  { %3718 = vmatpush1.bf16.msra.mxu0 %v9437_v27  ;;  %3596 = vmatprep.subr.bf16.mxu1 %v9442_v28  ;;  %v9502_v27 = vld [vmem:[%s13773_s5 + $0x11c] ss:$60 sps:$4 sm:$0xff]   ;;  %v9505_v28 = vld [vmem:[%s13773_s5 + $0x46c] ss:$60 sps:$4 sm:$0xff]  }
 0x2c1   :  { %3719 = vmatprep.subr.bf16.mxu0 %v9445_v29  ;;  %v9500_v29 = vld [vmem:[%s13773_s5 + $0x118] ss:$60 sps:$4 sm:$0xff]  }
 0x2c3   :  { %3597 = vmatpush1.bf16.msra.mxu1 %v9440_v30  ;;  %v9503_v30 = vld [vmem:[%s13773_s5 + $0x468] ss:$60 sps:$4 sm:$0xff]  }
 0x2c4   :  { %3720 = vmatpush1.bf16.msra.mxu0 %v9443_v31  ;;  %3598 = vmatprep.subr.bf16.mxu1 %v9448_v32  ;;  %v9508_v31 = vld [vmem:[%s13773_s5 + $0xa4] ss:$60 sps:$4 sm:$0xff]   ;;  %v9511_v32 = vld [vmem:[%s13773_s5 + $0x3f4] ss:$60 sps:$4 sm:$0xff]  }
 0x2c5   :  { %3721 = vmatprep.subr.bf16.mxu0 %v9451_v33 }
 0x2c7   :  { %3599 = vmatpush1.bf16.msra.mxu1 %v9446_v34  ;;  %v9506_v34 = vld [vmem:[%s13773_s5 + $0xa0] ss:$60 sps:$4 sm:$0xff]  }
 0x2c8   :  { %3722 = vmatpush1.bf16.msra.mxu0 %v9449_v35  ;;  %3600 = vmatprep.subr.bf16.mxu1 %v9454_v36  ;;  %v9509_v35 = vld [vmem:[%s13773_s5 + $0x3f0] ss:$60 sps:$4 sm:$0xff]  }
 0x2c9   :  { %3723 = vmatprep.subr.bf16.mxu0 %v9457_v37  ;;  %v9514_v36 = vld [vmem:[%s13773_s5 + $0x2c] ss:$60 sps:$4 sm:$0xff]  }
 0x2cb   :  { %3601 = vmatpush1.bf16.msra.mxu1 %v9452_v39 }
 0x2cc   :  { %3724 = vmatpush1.bf16.msra.mxu0 %v9455_v40  ;;  %3602 = vmatprep.subr.bf16.mxu1 %v9460_v41  ;;  %v9512_v40 = vld [vmem:[%s13773_s5 + $0x28] ss:$60 sps:$4 sm:$0xff]   ;;  %v9515_v41 = vld [vmem:[%s13773_s5 + $0xb00] ss:$60 sps:$4 sm:$0xff]  }
 0x2cd   :  { %3725 = vmatprep.subr.bf16.mxu0 %v9463_v43  ;;  %v9518_v43 = vld [vmem:[%s13773_s5 + $0x734] ss:$60 sps:$4 sm:$0xff]  }
 0x2ce   :  { %v3294_v51 = vpop.f32.mrf.mxu1 }
 0x2cf   :  { %v11671_v56 = vadd.f32 %v3294_v51, %v3254_v48  ;;  %3603 = vmatpush1.bf16.msra.mxu1 %v9458_v45  ;;  %v9519_v45 = vld [vmem:[%s13773_s5 + $0xa88] ss:$60 sps:$4 sm:$0xff]   ;;  %v9523_v48 = vld [vmem:[%s13773_s5 + $0xa10] ss:$60 sps:$4 sm:$0xff]   ;;  %v9524_v51 = vld [vmem:[%s13773_s5 + $0x640] ss:$60 sps:$4 sm:$0xff]  }
 0x2d0   :  { %3726 = vmatpush1.bf16.msra.mxu0 %v9461_v46  ;;  %v3296_v58 = vpop.f32.mrf.mxu1  ;;  %3618 = vmatprep.subr.bf16.mxu1 %v9466_v47  ;;  %v9522_v46 = vld [vmem:[%s13773_s5 + $0x6bc] ss:$60 sps:$4 sm:$0xff]  }
 0x2d1   :  { %v11682_v0 = vadd.f32 %v3296_v58, %v3256_v54  ;;  %3727 = vmatprep.subr.bf16.mxu0 %v9469_v49  ;;  %v9520_v47 = vld [vmem:[%s13773_s5 + $0x6b8] ss:$60 sps:$4 sm:$0xff]   ;;  %v9526_v49 = vld [vmem:[%s13773_s5 + $0x644] ss:$60 sps:$4 sm:$0xff]  }
 0x2d2   :  { %v3298_v3 = vpop.f32.mrf.mxu1  ;;  %v9527_v54 = vld [vmem:[%s13773_s5 + $0x998] ss:$60 sps:$4 sm:$0xff]   ;;  %v9528_v58 = vld [vmem:[%s13773_s5 + $0x5c8] ss:$60 sps:$4 sm:$0xff]  }
 0x2d3   :  { %3619 = vmatpush2.bf16.msra.mxu1 %v9464_v57  ;;  %v9530_v57 = vld [vmem:[%s13773_s5 + $0x5cc] ss:$60 sps:$4 sm:$0xff]  }
 0x2d4   :  { %3728 = vmatpush2.bf16.msra.mxu0 %v9467_v60  ;;  %v3299_v5 = vpop.f32.mrf.mxu1  ;;  %3629 = vmatprep.subr.bf16.mxu1 %v9472_v62  ;;  %v9531_v60 = vld [vmem:[%s13773_s5 + $0x920] ss:$60 sps:$4 sm:$0xff]   ;;  %v9534_v62 = vld [vmem:[%s13773_s5 + $0x554] ss:$60 sps:$4 sm:$0xff]   ;;  %v9535_v3 = vld [vmem:[%s13773_s5 + $0x8a8] ss:$60 sps:$4 sm:$0xff]  }
 0x2d5   :  { %3729 = vmatprep.subr.bf16.mxu0 %v9475_v1  ;;  %v9532_v1 = vld [vmem:[%s13773_s5 + $0x550] ss:$60 sps:$4 sm:$0xff]   ;;  %v9536_v5 = vld [vmem:[%s13773_s5 + $0x4d8] ss:$60 sps:$4 sm:$0xff]  }
 0x2d6   :  { %3621 = vmatmul.mubr.bf16.vlgmr.msra.gmra.mxu1 %v10932_v23 }
 0x2d7   :  { %3630 = vmatpush1.bf16.msra.mxu1 %v9470_v4  ;;  %3661 = vmatprep.mubr.bf16.mxu1 %v10920_v18  ;;  %v9538_v4 = vld [vmem:[%s13773_s5 + $0x4dc] ss:$60 sps:$4 sm:$0xff]  }
 0x2d8   :  { %3730 = vmatpush2.bf16.msra.mxu0 %v9473_v6  ;;  %3631 = vmatprep.subr.bf16.mxu1 %v9478_v7  ;;  %v9539_v6 = vld [vmem:[%s13773_s5 + $0x830] ss:$60 sps:$4 sm:$0xff]   ;;  %v9542_v7 = vld [vmem:[%s13773_s5 + $0x464] ss:$60 sps:$4 sm:$0xff]  }
 0x2d9   :  { %3731 = vmatprep.subr.bf16.mxu0 %v9481_v8  ;;  %v9540_v8 = vld [vmem:[%s13773_s5 + $0x460] ss:$60 sps:$4 sm:$0xff]  }
 0x2db   :  { %3632 = vmatpush1.bf16.msra.mxu1 %v9476_v9  ;;  %v9543_v9 = vld [vmem:[%s13773_s5 + $0x7b8] ss:$60 sps:$4 sm:$0xff]  }
 0x2dc   :  { %3732 = vmatpush2.bf16.msra.mxu0 %v9479_v10  ;;  %3633 = vmatprep.subr.bf16.mxu1 %v9484_v11  ;;  %v9546_v10 = vld [vmem:[%s13773_s5 + $0x3ec] ss:$60 sps:$4 sm:$0xff]   ;;  %v1255_v11 = vrot.slane %v11639_v38, %v10914_v61 }
 0x2dd   :  { %3733 = vmatprep.subr.bf16.mxu0 %v9487_v12 }
 0x2df   :  { %3634 = vmatpush1.bf16.msra.mxu1 %v9482_v13 }
 0x2e0   :  { %3734 = vmatpush2.bf16.msra.mxu0 %v9485_v14  ;;  %3635 = vmatprep.subr.bf16.mxu1 %v9490_v15  ;;  %v9544_v14 = vld [vmem:[%s13773_s5 + $0x3e8] ss:$60 sps:$4 sm:$0xff]  }
 0x2e1   :  { %3735 = vmatprep.subr.bf16.mxu0 %v9493_v16  ;;  %v9547_v16 = vld [vmem:[%s13773_s5 + $0xb78] ss:$60 sps:$4 sm:$0xff]  }
 0x2e3   :  { %3636 = vmatpush1.bf16.msra.mxu1 %v9488_v17  ;;  %v9550_v17 = vld [vmem:[%s13773_s5 + $0xafc] ss:$60 sps:$4 sm:$0xff]  }
 0x2e4   :  { %3736 = vmatpush2.bf16.msra.mxu0 %v9491_v20  ;;  %3637 = vmatprep.subr.bf16.mxu1 %v9496_v21 }
 0x2e5   :  { %3737 = vmatprep.subr.bf16.mxu0 %v9499_v24  ;;  %v9553_v24 = vld [vmem:[%s13775_s7 + $0x2e4] ss:$16 sps:$4 sm:$0xff]  }
 0x2e7   :  { %3638 = vmatpush1.bf16.msra.mxu1 %v9494_v25 }
 0x2e8   :  { %3738 = vmatpush2.bf16.msra.mxu0 %v9497_v26  ;;  %3639 = vmatprep.subr.bf16.mxu1 %v9502_v27 }
 0x2e9   :  { %3739 = vmatprep.subr.bf16.mxu0 %v9505_v28  ;;  %v9548_v28 = vld [vmem:[%s13773_s5 + $0xaf8] ss:$60 sps:$4 sm:$0xff]  }
 0x2eb   :  { %v11761_v33 = vpop.f32.mrf.mxu0  ;;  %3640 = vmatpush1.bf16.msra.mxu1 %v9500_v29 }
 0x2ec   :  { %3740 = vmatpush2.bf16.msra.mxu0 %v9503_v30  ;;  %3641 = vmatprep.subr.bf16.mxu1 %v9508_v31  ;;  %v9551_v30 = vld [vmem:[%s13775_s7 + $0x2e0] ss:$16 sps:$4 sm:$0xff]  }
 0x2ed   :  { %v11772_v37 = vpop.f32.mrf.mxu0  ;;  %3741 = vmatprep.subr.bf16.mxu0 %v9511_v32 }
 0x2ef   :  { %v3421_v39 = vpop.f32.mrf.mxu0  ;;  %3642 = vmatpush1.bf16.msra.mxu1 %v9506_v34  ;;  %v9559_v34 = vld [vmem:[%s13775_s7 + $0x2c4] ss:$16 sps:$4 sm:$0xff]  }
 0x2f0   :  { %3742 = vmatpush2.bf16.msra.mxu0 %v9509_v35  ;;  %3643 = vmatprep.subr.bf16.mxu1 %v9514_v36  ;;  %v9554_v36 = vld [vmem:[%s13773_s5 + $0xa80] ss:$60 sps:$4 sm:$0xff]  }
 0x2f1   :  { %v3422_v42 = vpop.f32.mrf.mxu0  ;;  %3833 = vmatprep.subr.bf16.mxu0 %v10377_v55  ;;  %v9557_v39 = vld [vmem:[%s13775_s7 + $0x2c0] ss:$16 sps:$4 sm:$0xff]  }
 0x2f2   :  { %v9563_v42 = vld [vmem:[%s13775_s7 + $0x2a0] ss:$16 sps:$4 sm:$0xff]  }
 0x2f3   :  { %3744 = vmatmul.mubr.bf16.vlgmr.msra.gmra.mxu0 %v10930_v22  ;;  %3644 = vmatpush1.bf16.msra.mxu1 %v9512_v40  ;;  %v9562_v40 = vld [vmem:[%s13773_s5 + $0xa0c] ss:$60 sps:$4 sm:$0xff]  }
 0x2f4   :  { %3834 = vmatpush1.bf16.msra.mxu0 %v9515_v41  ;;  %8356 = vmatprep.mubr.msk.bf16.mxu0 %vm3215_vm4, %v10922_v19  ;;  %v9565_v41 = vld [vmem:[%s13775_s7 + $0x2a4] ss:$16 sps:$4 sm:$0xff]  }
 0x2f5   :  { %3645 = vmatprep.subr.bf16.mxu1 %v9518_v43  ;;  %3835 = vmatprep.subr.bf16.mxu0 %v10377_v55  ;;  %v9568_v43 = vld [vmem:[%s13773_s5 + $0x994] ss:$60 sps:$4 sm:$0xff]  }
 0x2f7   :  { %3646 = vmatpush2.bf16.msra.mxu1 %v9516_v44  ;;  %v9571_v44 = vld [vmem:[%s13775_s7 + $0x284] ss:$16 sps:$4 sm:$0xff]  }
 0x2f8   :  { %3836 = vmatpush1.bf16.msra.mxu0 %v9519_v45  ;;  %3647 = vmatprep.subr.bf16.mxu1 %v9522_v46  ;;  %v9566_v45 = vld [vmem:[%s13773_s5 + $0x990] ss:$60 sps:$4 sm:$0xff]  }
 0x2f9   :  { %3837 = vmatprep.subr.bf16.mxu0 %v10377_v55  ;;  %v9569_v46 = vld [vmem:[%s13775_s7 + $0x280] ss:$16 sps:$4 sm:$0xff]  }
 0x2fb   :  { %3648 = vmatpush2.bf16.msra.mxu1 %v9520_v47  ;;  %v9574_v47 = vld [vmem:[%s13773_s5 + $0x91c] ss:$60 sps:$4 sm:$0xff]  }
 0x2fc   :  { %3838 = vmatpush1.bf16.msra.mxu0 %v9523_v48  ;;  %3649 = vmatprep.subr.bf16.mxu1 %v9526_v49  ;;  %v9577_v48 = vld [vmem:[%s13775_s7 + $0x264] ss:$16 sps:$4 sm:$0xff]  }
 0x2fd   :  { %3839 = vmatprep.subr.bf16.mxu0 %v10377_v55  ;;  %v9572_v49 = vld [vmem:[%s13773_s5 + $0x918] ss:$60 sps:$4 sm:$0xff]  }
 0x2ff   :  { %3650 = vmatpush2.bf16.msra.mxu1 %v9524_v51  ;;  %v9575_v51 = vld [vmem:[%s13775_s7 + $0x260] ss:$16 sps:$4 sm:$0xff]  }
 0x300   :  { %3840 = vmatpush1.bf16.msra.mxu0 %v9527_v54  ;;  %3651 = vmatprep.subr.bf16.mxu1 %v9530_v57  ;;  %v9580_v54 = vld [vmem:[%s13773_s5 + $0x8a4] ss:$60 sps:$4 sm:$0xff]  }
 0x301   :  { %3841 = vmatprep.subr.bf16.mxu0 %v10377_v55  ;;  %v9583_v57 = vld [vmem:[%s13775_s7 + $0x244] ss:$16 sps:$4 sm:$0xff]  }
 0x303   :  { %3652 = vmatpush2.bf16.msra.mxu1 %v9528_v58  ;;  %v9578_v58 = vld [vmem:[%s13773_s5 + $0x8a0] ss:$60 sps:$4 sm:$0xff]  }
 0x304   :  { %3842 = vmatpush1.bf16.msra.mxu0 %v9531_v60  ;;  %3653 = vmatprep.subr.bf16.mxu1 %v9534_v62  ;;  %v9581_v60 = vld [vmem:[%s13775_s7 + $0x240] ss:$16 sps:$4 sm:$0xff]   ;;  %v9586_v62 = vld [vmem:[%s13773_s5 + $0x82c] ss:$60 sps:$4 sm:$0xff]  }
 0x305   :  { %3843 = vmatprep.subr.bf16.mxu0 %v10377_v55 }
 0x307   :  { %3654 = vmatpush2.bf16.msra.mxu1 %v9532_v1  ;;  %v1258_v1 = vsub.s32 4, %v10742_v50 }
 0x308   :  { %3844 = vmatpush1.bf16.msra.mxu0 %v9535_v3  ;;  %3655 = vmatprep.subr.bf16.mxu1 %v9538_v4  ;;  %v9589_v3 = vld [vmem:[%s13775_s7 + $0x224] ss:$16 sps:$4 sm:$0xff]   ;;  %v1262_v4 = vsub.s32 5, %v10742_v50 }
 0x309   :  { %3845 = vmatprep.subr.bf16.mxu0 %v10377_v55 }
 0x30b   :  { %3656 = vmatpush2.bf16.msra.mxu1 %v9536_v5  ;;  %v9584_v5 = vld [vmem:[%s13773_s5 + $0x828] ss:$60 sps:$4 sm:$0xff]  }
 0x30c   :  { %3846 = vmatpush1.bf16.msra.mxu0 %v9539_v6  ;;  %3657 = vmatprep.subr.bf16.mxu1 %v9542_v7  ;;  %v9587_v6 = vld [vmem:[%s13775_s7 + $0x220] ss:$16 sps:$4 sm:$0xff]  }
 0x30d   :  { %3847 = vmatprep.subr.bf16.mxu0 %v10377_v55  ;;  %v9592_v7 = vld [vmem:[%s13773_s5 + $0x7b4] ss:$60 sps:$4 sm:$0xff]  }
 0x30e   :  { %v11859_v12 = vpop.f32.mrf.mxu1 }
 0x30f   :  { %v11861_v13 = vpop.f32.mrf.mxu0  ;;  %3658 = vmatpush2.bf16.msra.mxu1 %v9540_v8  ;;  %v1259_v8 = vrot.slane %v11639_v38, %v1258_v1 }
 0x310   :  { %3848 = vmatpush1.bf16.msra.mxu0 %v9543_v9  ;;  %v3337_v15 = vpop.f32.mrf.mxu1  ;;  %3659 = vmatprep.subr.bf16.mxu1 %v9546_v10  ;;  %v9595_v9 = vld [vmem:[%s13775_s7 + $0x204] ss:$16 sps:$4 sm:$0xff]   ;;  %v1263_v10 = vrot.slane %v11639_v38, %v1262_v4 }
 0x311   :  { %v3338_v20 = vadd.f32 %v3337_v15, %v1255_v11  ;;  %v11872_v21 = vpop.f32.mrf.mxu0  ;;  %3863 = vmatprep.subr.bf16.mxu0 %v10377_v55  ;;  %v9590_v11 = vld [vmem:[%s13773_s5 + $0x7b0] ss:$60 sps:$4 sm:$0xff]  }
 0x312   :  { %v3339_v25 = vpop.f32.mrf.mxu1  ;;  %v9598_v15 = vld [vmem:[%s13773_s5 + $0xb74] ss:$60 sps:$4 sm:$0xff]  }
 0x313   :  { %v3379_v26 = vadd.f32 %v11548_v2, %v3338_v20  ;;  %v3544_v27 = vpop.f32.mrf.mxu0  ;;  %3660 = vmatpush2.bf16.msra.mxu1 %v9544_v14  ;;  %v9556_v2 = vld [vmem:[%s13773_s5 + $0xa84] ss:$60 sps:$4 sm:$0xff]  }
 0x314   :  { %3864 = vmatpush2.bf16.msra.mxu0 %v9547_v16  ;;  %v3340_v29 = vpop.f32.mrf.mxu1  ;;  %3752 = vmatprep.subr.bf16.mxu1 %v9550_v17  ;;  %v9593_v14 = vld [vmem:[%s13775_s7 + $0x200] ss:$16 sps:$4 sm:$0xff]   ;;  %v3418_v16 = vadd.f32 %v11761_v33, %v1259_v8  ;;  %v9601_v17 = vld [vmem:[%s13775_s7 + $0x3e4] ss:$16 sps:$4 sm:$0xff]  }
 0x315   :  { %v3876_v31 = vmax.f32 %v3379_v26, 0.0  ;;  %v3545_v32 = vpop.f32.mrf.mxu0  ;;  %6682 = vmatprep.subr.bf16.mxu0 %v9553_v24  ;;  %v3420_v24 = vadd.f32 %v11772_v37, %v1263_v10  ;;  %v9596_v26 = vld [vmem:[%s13773_s5 + $0xb70] ss:$60 sps:$4 sm:$0xff]   ;;  %v9605_v37 = vld [vmem:[%s13775_s7 + $0x3c4] ss:$16 sps:$4 sm:$0xff]  }
 0x316   :  { %3662 = vmatmul.mubr.bf16.vlgmr.msra.gmra.mxu1 %v10930_v22  ;;  %v9599_v33 = vld [vmem:[%s13775_s7 + $0x3e0] ss:$16 sps:$4 sm:$0xff]  }
 0x317   :  { %v11892_v35 = vpack.c.bf16 %v3876_v31, %v3876_v31  ;;  %3866 = vmatmul.mubr.bf16.vlgmr.msra.gmra.mxu0 %v10932_v23  ;;  %3753 = vmatpush1.bf16.msra.mxu1 %v9548_v28  ;;  %v9602_v28 = vld [vmem:[%s13773_s5 + $0x740] ss:$60 sps:$4 sm:$0xff]  }
 0x318   :  { %8355 = vmatprep.mubr.msk.bf16.mxu1 %vm3215_vm4, %v10922_v19  ;;  %6683 = vmatpush1.bf16.msra.mxu0 %v9551_v30  ;;  %v9560_v19 = vld [vmem:[%s13773_s5 + $0xa08] ss:$60 sps:$4 sm:$0xff]   ;;  %v9606_v31 = vld [vmem:[%s13773_s5 + $0x380] ss:$60 sps:$4 sm:$0xff]  }
 0x319   :  { %6714 = vmatprep.mubr.bf16.mxu0 %v11892_v35  ;;  %3754 = vmatprep.subr.bf16.mxu1 %v9556_v2  ;;  %v9603_v2 = vld [vmem:[%s13775_s7 + $0x3c0] ss:$16 sps:$4 sm:$0xff]  }
 0x31a   :  { %6684 = vmatprep.subr.bf16.mxu0 %v9559_v34  ;;  %v9607_v34 = vld [vmem:[%s13773_s5 + $0x6c8] ss:$60 sps:$4 sm:$0xff]   ;;  %v9633_v8 = vld [vmem:[%s13775_s7 + $0x300] ss:$16 sps:$4 sm:$0xff]  }
 0x31b   :  { %3755 = vmatpush1.bf16.msra.mxu1 %v9554_v36  ;;  %v9610_v36 = vld [vmem:[%s13775_s7 + $0x3a4] ss:$16 sps:$4 sm:$0xff]  }
 0x31c   :  { %6685 = vmatpush1.bf16.msra.mxu0 %v9557_v39  ;;  %3756 = vmatprep.subr.bf16.mxu1 %v9562_v40  ;;  %v9611_v39 = vld [vmem:[%s13773_s5 + $0x308] ss:$60 sps:$4 sm:$0xff]   ;;  %v9608_v40 = vld [vmem:[%s13775_s7 + $0x3a0] ss:$16 sps:$4 sm:$0xff]  }
 0x31d   :  { %6686 = vmatprep.subr.bf16.mxu0 %v9565_v41  ;;  %v9612_v41 = vld [vmem:[%s13773_s5 + $0x650] ss:$60 sps:$4 sm:$0xff]  }
 0x31f   :  { %3757 = vmatpush1.bf16.msra.mxu1 %v9560_v19  ;;  %v9613_v19 = vld [vmem:[%s13775_s7 + $0x380] ss:$16 sps:$4 sm:$0xff]  }
 0x320   :  { %6687 = vmatpush1.bf16.msra.mxu0 %v9563_v42  ;;  %3758 = vmatprep.subr.bf16.mxu1 %v9568_v43  ;;  %v9617_v42 = vld [vmem:[%s13773_s5 + $0x5d8] ss:$60 sps:$4 sm:$0xff]  }
 0x321   :  { %6688 = vmatprep.subr.bf16.mxu0 %v9571_v44  ;;  %v9620_v43 = vld [vmem:[%s13775_s7 + $0x364] ss:$16 sps:$4 sm:$0xff]  }
 0x322   :  { %v9621_v44 = vld [vmem:[%s13773_s5 + $0x218] ss:$60 sps:$4 sm:$0xff]  }
 0x323   :  { %3759 = vmatpush1.bf16.msra.mxu1 %v9566_v45  ;;  %v9618_v45 = vld [vmem:[%s13775_s7 + $0x360] ss:$16 sps:$4 sm:$0xff]  }
 0x324   :  { %6689 = vmatpush1.bf16.msra.mxu0 %v9569_v46  ;;  %3760 = vmatprep.subr.bf16.mxu1 %v9574_v47  ;;  %v9622_v46 = vld [vmem:[%s13773_s5 + $0x560] ss:$60 sps:$4 sm:$0xff]   ;;  %v1251_v47 = vrot.slane %v11639_v38, %v10908_v59 }
 0x325   :  { %6690 = vmatprep.subr.bf16.mxu0 %v9577_v48  ;;  %v9625_v48 = vld [vmem:[%s13775_s7 + $0x344] ss:$16 sps:$4 sm:$0xff]  }
 0x327   :  { %3761 = vmatpush1.bf16.msra.mxu1 %v9572_v49  ;;  %v9626_v49 = vld [vmem:[%s13773_s5 + $0x1a0] ss:$60 sps:$4 sm:$0xff]  }
 0x328   :  { %6691 = vmatpush1.bf16.msra.mxu0 %v9575_v51  ;;  %3762 = vmatprep.subr.bf16.mxu1 %v9580_v54  ;;  %v9623_v51 = vld [vmem:[%s13775_s7 + $0x340] ss:$16 sps:$4 sm:$0xff]   ;;  %v9627_v54 = vld [vmem:[%s13773_s5 + $0x4e8] ss:$60 sps:$4 sm:$0xff]  }
 0x329   :  { %6692 = vmatprep.subr.bf16.mxu0 %v9583_v57  ;;  %v3336_v57 = vadd.f32 %v11859_v12, %v1251_v47  ;;  %v9632_v12 = vld [vmem:[%s13773_s5 + $0x470] ss:$60 sps:$4 sm:$0xff]  }
 0x32a   :  { %v9675_v47 = vld [vmem:[%s13775_s7 + $0x620] ss:$16 sps:$4 sm:$0xff]  }
 0x32b   :  { %3763 = vmatpush1.bf16.msra.mxu1 %v9578_v58  ;;  %v9630_v58 = vld [vmem:[%s13775_s7 + $0x324] ss:$16 sps:$4 sm:$0xff]  }
 0x32c   :  { %6693 = vmatpush1.bf16.msra.mxu0 %v9581_v60  ;;  %3764 = vmatprep.subr.bf16.mxu1 %v9586_v62  ;;  %v9631_v60 = vld [vmem:[%s13773_s5 + $0x128] ss:$60 sps:$4 sm:$0xff]   ;;  %v9628_v62 = vld [vmem:[%s13775_s7 + $0x320] ss:$16 sps:$4 sm:$0xff]  }
 0x32d   :  { %6694 = vmatprep.subr.bf16.mxu0 %v9589_v3  ;;  %v3377_v3 = vadd.f32 %v11541_v63, %v3336_v57  ;;  %v9637_v63 = vld [vmem:[%s13773_s5 + $0x3f8] ss:$60 sps:$4 sm:$0xff]   ;;  %v9681_v57 = vld [vmem:[%s13775_s7 + $0x600] ss:$16 sps:$4 sm:$0xff]  }
 0x32f   :  { %3765 = vmatpush1.bf16.msra.mxu1 %v9584_v5  ;;  %v9635_v5 = vld [vmem:[%s13775_s7 + $0x304] ss:$16 sps:$4 sm:$0xff]  }
 0x330   :  { %6695 = vmatpush1.bf16.msra.mxu0 %v9587_v6  ;;  %3766 = vmatprep.subr.bf16.mxu1 %v9592_v7  ;;  %v9636_v7 = vld [vmem:[%s13773_s5 + $0xb0] ss:$60 sps:$4 sm:$0xff]  }
 0x331   :  { %6696 = vmatprep.subr.bf16.mxu0 %v9595_v9  ;;  %v3875_v9 = vmax.f32 %v3377_v3, 0.0 }
 0x332   :  { %v3458_v20 = vpop.f32.mrf.mxu1 }
 0x333   :  { %v11992_v25 = vadd.f32 %v3458_v20, %v3418_v16  ;;  %3767 = vmatpush1.bf16.msra.mxu1 %v9590_v11  ;;  %v9640_v11 = vld [vmem:[%s13775_s7 + $0x6e4] ss:$16 sps:$4 sm:$0xff]   ;;  %v9638_v16 = vld [vmem:[%s13775_s7 + $0x6e0] ss:$16 sps:$4 sm:$0xff]   ;;  %v3874_v20 = vmax.f32 %v11682_v0, 0.0 }
 0x334   :  { %6697 = vmatpush1.bf16.msra.mxu0 %v9593_v14  ;;  %v3460_v27 = vpop.f32.mrf.mxu1  ;;  %3782 = vmatprep.subr.bf16.mxu1 %v9598_v15  ;;  %v9641_v15 = vld [vmem:[%s13773_s5 + $0x38] ss:$60 sps:$4 sm:$0xff]   ;;  %v9645_v0 = vld [vmem:[%s13775_s7 + $0x6c0] ss:$16 sps:$4 sm:$0xff]  }
 0x335   :  { %v12003_v29 = vadd.f32 %v3460_v27, %v3420_v24  ;;  %6698 = vmatprep.subr.bf16.mxu0 %v9601_v17  ;;  %v9644_v17 = vld [vmem:[%s13775_s7 + $0xe4] ss:$16 sps:$4 sm:$0xff]   ;;  %v12112_v24 = vpack.c.bf16 %v3875_v9, %v3875_v9 }
 0x336   :  { %v3462_v30 = vpop.f32.mrf.mxu1  ;;  %v9647_v27 = vld [vmem:[%s13775_s7 + $0x6c4] ss:$16 sps:$4 sm:$0xff]  }
 0x337   :  { %3783 = vmatpush2.bf16.msra.mxu1 %v9596_v26  ;;  %v9653_v30 = vld [vmem:[%s13775_s7 + $0x6a4] ss:$16 sps:$4 sm:$0xff]  }
 0x338   :  { %6699 = vmatpush2.bf16.msra.mxu0 %v9599_v33  ;;  %v3463_v32 = vpop.f32.mrf.mxu1  ;;  %8879 = vmatprep.subr.bf16.mxu1 %v9602_v28  ;;  %v9642_v33 = vld [vmem:[%s13775_s7 + $0xe0] ss:$16 sps:$4 sm:$0xff]   ;;  %v9650_v28 = vld [vmem:[%s13775_s7 + $0xc4] ss:$16 sps:$4 sm:$0xff]  }
 0x339   :  { %6700 = vmatprep.subr.bf16.mxu0 %v9605_v37  ;;  %v12127_v37 = vpack.c.bf16 %v3874_v20, %v3874_v20  ;;  %v9651_v32 = vld [vmem:[%s13775_s7 + $0x6a0] ss:$16 sps:$4 sm:$0xff]  }
 0x33a   :  { %3785 = vmatmul.mubr.bf16.vlgmr.msra.gmra.mxu1 %v10932_v23  ;;  %v9615_v23 = vld [vmem:[%s13775_s7 + $0x384] ss:$16 sps:$4 sm:$0xff]   ;;  %v9690_v20 = vld [vmem:[%s13775_s7 + $0x1e0] ss:$16 sps:$4 sm:$0xff]  }
 0x33b   :  { %8880 = vmatpush3.bf16.msra.mxu1 %v9606_v31  ;;  %3825 = vmatprep.mubr.bf16.mxu1 %v10920_v18  ;;  %v9616_v18 = vld [vmem:[%s13773_s5 + $0x290] ss:$60 sps:$4 sm:$0xff]  }
 0x33c   :  { %6701 = vmatpush2.bf16.msra.mxu0 %v9603_v2  ;;  %8881 = vmatprep.subr.bf16.mxu1 %v9607_v34  ;;  %v9648_v31 = vld [vmem:[%s13775_s7 + $0xc0] ss:$16 sps:$4 sm:$0xff]   ;;  %v9656_v2 = vld [vmem:[%s13775_s7 + $0xa4] ss:$16 sps:$4 sm:$0xff]  }
 0x33d   :  { %6702 = vmatprep.subr.bf16.mxu0 %v9610_v36  ;;  %v9654_v34 = vld [vmem:[%s13775_s7 + $0xa0] ss:$16 sps:$4 sm:$0xff]  }
 0x33e   :  { %v9657_v36 = vld [vmem:[%s13775_s7 + $0x680] ss:$16 sps:$4 sm:$0xff]  }
 0x33f   :  { %8882 = vmatpush3.bf16.msra.mxu1 %v9611_v39  ;;  %v9662_v39 = vld [vmem:[%s13775_s7 + $0x84] ss:$16 sps:$4 sm:$0xff]  }
 0x340   :  { %6703 = vmatpush2.bf16.msra.mxu0 %v9608_v40  ;;  %8883 = vmatprep.subr.bf16.mxu1 %v9612_v41  ;;  %v9665_v40 = vld [vmem:[%s13775_s7 + $0x664] ss:$16 sps:$4 sm:$0xff]   ;;  %v9660_v41 = vld [vmem:[%s13775_s7 + $0x80] ss:$16 sps:$4 sm:$0xff]  }
 0x341   :  { %6704 = vmatprep.subr.bf16.mxu0 %v9615_v23  ;;  %v9663_v23 = vld [vmem:[%s13775_s7 + $0x660] ss:$16 sps:$4 sm:$0xff]  }
 0x343   :  { %8884 = vmatpush3.bf16.msra.mxu1 %v9616_v18  ;;  %v9668_v18 = vld [vmem:[%s13775_s7 + $0x64] ss:$16 sps:$4 sm:$0xff]  }
 0x344   :  { %6705 = vmatpush2.bf16.msra.mxu0 %v9613_v19  ;;  %8885 = vmatprep.subr.bf16.mxu1 %v9617_v42  ;;  %v9671_v19 = vld [vmem:[%s13775_s7 + $0x644] ss:$16 sps:$4 sm:$0xff]   ;;  %v9666_v42 = vld [vmem:[%s13775_s7 + $0x60] ss:$16 sps:$4 sm:$0xff]  }
 0x345   :  { %6706 = vmatprep.subr.bf16.mxu0 %v9620_v43  ;;  %v9669_v43 = vld [vmem:[%s13775_s7 + $0x640] ss:$16 sps:$4 sm:$0xff]  }
 0x347   :  { %8886 = vmatpush3.bf16.msra.mxu1 %v9621_v44  ;;  %v9674_v44 = vld [vmem:[%s13775_s7 + $0x44] ss:$16 sps:$4 sm:$0xff]  }
 0x348   :  { %6707 = vmatpush2.bf16.msra.mxu0 %v9618_v45  ;;  %8887 = vmatprep.subr.bf16.mxu1 %v9622_v46  ;;  %v9677_v45 = vld [vmem:[%s13775_s7 + $0x624] ss:$16 sps:$4 sm:$0xff]   ;;  %v9672_v46 = vld [vmem:[%s13775_s7 + $0x40] ss:$16 sps:$4 sm:$0xff]  }
 0x349   :  { %6708 = vmatprep.subr.bf16.mxu0 %v9625_v48  ;;  %v9680_v48 = vld [vmem:[%s13775_s7 + $0x24] ss:$16 sps:$4 sm:$0xff]  }
 0x34b   :  { %8888 = vmatpush3.bf16.msra.mxu1 %v9626_v49  ;;  %v9683_v49 = vld [vmem:[%s13775_s7 + $0x604] ss:$16 sps:$4 sm:$0xff]  }
 0x34c   :  { %6709 = vmatpush2.bf16.msra.mxu0 %v9623_v51  ;;  %8889 = vmatprep.subr.bf16.mxu1 %v9627_v54  ;;  %v1270_v51 = vsub.s32 7, %v10742_v50  ;;  %v9678_v54 = vld [vmem:[%s13775_s7 + $0x20] ss:$16 sps:$4 sm:$0xff]  }
 0x34d   :  { %6710 = vmatprep.subr.bf16.mxu0 %v9630_v58  ;;  %v9686_v58 = vld [vmem:[%s13775_s7 + $0x4] ss:$16 sps:$4 sm:$0xff]  }
 0x34f   :  { %v12086_v6 = vpop.f32.mrf.mxu0  ;;  %8890 = vmatpush3.bf16.msra.mxu1 %v9631_v60  ;;  %v1271_v60 = vrot.slane %v11639_v38, %v1270_v51  ;;  %v9728_v51 = vld [vmem:[%s13775_s7 + $0x124] ss:$16 sps:$4 sm:$0xff]  }
 0x350   :  { %6711 = vmatpush2.bf16.msra.mxu0 %v9628_v62  ;;  %8891 = vmatprep.subr.bf16.mxu1 %v9632_v12  ;;  %v9689_v62 = vld [vmem:[%s13775_s7 + $0x7e4] ss:$16 sps:$4 sm:$0xff]  }
 0x351   :  { %v12097_v10 = vpop.f32.mrf.mxu0  ;;  %6712 = vmatprep.subr.bf16.mxu0 %v9635_v5  ;;  %v9684_v5 = vld [vmem:[%s13775_s7] ss:$16 sps:$4 sm:$0xff]  }
 0x353   :  { %v3585_v14 = vpop.f32.mrf.mxu0  ;;  %8892 = vmatpush3.bf16.msra.mxu1 %v9636_v7 }
 0x354   :  { %6713 = vmatpush2.bf16.msra.mxu0 %v9633_v8  ;;  %8893 = vmatprep.subr.bf16.mxu1 %v9637_v63  ;;  %v9687_v8 = vld [vmem:[%s13775_s7 + $0x7e0] ss:$16 sps:$4 sm:$0xff]   ;;  %v9692_v63 = vld [vmem:[%s13775_s7 + $0x1e4] ss:$16 sps:$4 sm:$0xff]  }
 0x355   :  { %v3586_v26 = vpop.f32.mrf.mxu0  ;;  %6764 = vmatprep.subr.bf16.mxu0 %v9640_v11  ;;  %v9695_v14 = vld [vmem:[%s13775_s7 + $0x7c4] ss:$16 sps:$4 sm:$0xff]  }
 0x357   :  { %6715 = vmatmul.mubr.bf16.vlgmr.msra.gmra.mxu0 %v12112_v24  ;;  %8894 = vmatpush3.bf16.msra.mxu1 %v9641_v15 }
 0x358   :  { %6765 = vmatpush1.bf16.msra.mxu0 %v9638_v16  ;;  %6641 = vmatprep.subr.bf16.mxu1 %v9644_v17 }
 0x359   :  { %6766 = vmatprep.subr.bf16.mxu0 %v9647_v27  ;;  %v9693_v27 = vld [vmem:[%s13775_s7 + $0x7c0] ss:$16 sps:$4 sm:$0xff]  }
 0x35a   :  { %3826 = vmatmul.mubr.bf16.vlgmr.msra.gmra.mxu1 %v10930_v22  ;;  %v9659_v22 = vld [vmem:[%s13775_s7 + $0x684] ss:$16 sps:$4 sm:$0xff]  }
 0x35b   :  { %6642 = vmatpush1.bf16.msra.mxu1 %v9642_v33  ;;  %6673 = vmatprep.mubr.bf16.mxu1 %v12127_v37  ;;  %v9698_v33 = vld [vmem:[%s13775_s7 + $0x1c4] ss:$16 sps:$4 sm:$0xff]  }
 0x35c   :  { %6767 = vmatpush1.bf16.msra.mxu0 %v9645_v0  ;;  %6643 = vmatprep.subr.bf16.mxu1 %v9650_v28 }
 0x35d   :  { %6768 = vmatprep.subr.bf16.mxu0 %v9653_v30 }
 0x35f   :  { %6644 = vmatpush1.bf16.msra.mxu1 %v9648_v31  ;;  %v9696_v31 = vld [vmem:[%s13775_s7 + $0x1c0] ss:$16 sps:$4 sm:$0xff]  }
 0x360   :  { %6769 = vmatpush1.bf16.msra.mxu0 %v9651_v32  ;;  %6645 = vmatprep.subr.bf16.mxu1 %v9656_v2  ;;  %v9699_v32 = vld [vmem:[%s13775_s7 + $0x7a0] ss:$16 sps:$4 sm:$0xff]   ;;  %v9704_v2 = vld [vmem:[%s13775_s7 + $0x1a4] ss:$16 sps:$4 sm:$0xff]  }
 0x361   :  { %6770 = vmatprep.subr.bf16.mxu0 %v9659_v22  ;;  %v9707_v22 = vld [vmem:[%s13775_s7 + $0x784] ss:$16 sps:$4 sm:$0xff]  }
 0x363   :  { %6646 = vmatpush1.bf16.msra.mxu1 %v9654_v34  ;;  %v9702_v34 = vld [vmem:[%s13775_s7 + $0x1a0] ss:$16 sps:$4 sm:$0xff]  }
 0x364   :  { %6771 = vmatpush1.bf16.msra.mxu0 %v9657_v36  ;;  %6647 = vmatprep.subr.bf16.mxu1 %v9662_v39  ;;  %v9705_v36 = vld [vmem:[%s13775_s7 + $0x780] ss:$16 sps:$4 sm:$0xff]   ;;  %v9710_v39 = vld [vmem:[%s13775_s7 + $0x184] ss:$16 sps:$4 sm:$0xff]  }
 0x365   :  { %6772 = vmatprep.subr.bf16.mxu0 %v9665_v40  ;;  %v1266_v40 = vsub.s32 6, %v10742_v50  ;;  %v10014_v50 = vld [vmem:[%s13775_s7 + $0xd00] ss:$16 sps:$4 sm:$0xff]  }
 0x367   :  { %6648 = vmatpush1.bf16.msra.mxu1 %v9660_v41  ;;  %v9713_v41 = vld [vmem:[%s13775_s7 + $0x764] ss:$16 sps:$4 sm:$0xff]  }
 0x368   :  { %6773 = vmatpush1.bf16.msra.mxu0 %v9663_v23  ;;  %6649 = vmatprep.subr.bf16.mxu1 %v9668_v18  ;;  %v9708_v23 = vld [vmem:[%s13775_s7 + $0x180] ss:$16 sps:$4 sm:$0xff]  }
 0x369   :  { %6774 = vmatprep.subr.bf16.mxu0 %v9671_v19  ;;  %v9711_v18 = vld [vmem:[%s13775_s7 + $0x760] ss:$16 sps:$4 sm:$0xff]   ;;  %v9716_v19 = vld [vmem:[%s13775_s7 + $0x164] ss:$16 sps:$4 sm:$0xff]  }
 0x36b   :  { %6650 = vmatpush1.bf16.msra.mxu1 %v9666_v42  ;;  %v1267_v42 = vrot.slane %v11639_v38, %v1266_v40  ;;  %v9722_v38 = vld [vmem:[%s13775_s7 + $0x144] ss:$16 sps:$4 sm:$0xff]  }
 0x36c   :  { %6775 = vmatpush1.bf16.msra.mxu0 %v9669_v43  ;;  %6651 = vmatprep.subr.bf16.mxu1 %v9674_v44  ;;  %v9719_v43 = vld [vmem:[%s13775_s7 + $0x744] ss:$16 sps:$4 sm:$0xff]   ;;  %v9714_v44 = vld [vmem:[%s13775_s7 + $0x160] ss:$16 sps:$4 sm:$0xff]  }
 0x36d   :  { %6776 = vmatprep.subr.bf16.mxu0 %v9677_v45  ;;  %v9717_v45 = vld [vmem:[%s13775_s7 + $0x740] ss:$16 sps:$4 sm:$0xff]  }
 0x36f   :  { %6652 = vmatpush1.bf16.msra.mxu1 %v9672_v46 }
 0x370   :  { %6777 = vmatpush1.bf16.msra.mxu0 %v9675_v47  ;;  %6653 = vmatprep.subr.bf16.mxu1 %v9680_v48  ;;  %v9725_v47 = vld [vmem:[%s13775_s7 + $0x724] ss:$16 sps:$4 sm:$0xff]   ;;  %v9720_v48 = vld [vmem:[%s13775_s7 + $0x140] ss:$16 sps:$4 sm:$0xff]  }
 0x371   :  { %6778 = vmatprep.subr.bf16.mxu0 %v9683_v49  ;;  %v9723_v49 = vld [vmem:[%s13775_s7 + $0x720] ss:$16 sps:$4 sm:$0xff]  }
 0x372   :  { %v3499_v12 = vpop.f32.mrf.mxu1 }
 0x373   :  { %v12208_v3 = vpop.f32.mrf.mxu0  ;;  %6654 = vmatpush1.bf16.msra.mxu1 %v9678_v54  ;;  %v3500_v46 = vadd.f32 %v3499_v12, %v1267_v42  ;;  %v9758_v42 = vld [vmem:[%s13775_s7 + $0x464] ss:$16 sps:$4 sm:$0xff]  }
 0x374   :  { %6779 = vmatpush1.bf16.msra.mxu0 %v9681_v57  ;;  %v3501_v7 = vpop.f32.mrf.mxu1  ;;  %6655 = vmatprep.subr.bf16.mxu1 %v9686_v58  ;;  %v9731_v57 = vld [vmem:[%s13775_s7 + $0x704] ss:$16 sps:$4 sm:$0xff]   ;;  %v12308_v58 = vld [vmem:[%s13774_s6 + $0x8] sm:$0x7f] }
 0x375   :  { %v3502_v9 = vadd.f32 %v3501_v7, %v1271_v60  ;;  %v12219_v11 = vpop.f32.mrf.mxu0  ;;  %6780 = vmatprep.subr.bf16.mxu0 %v9689_v62  ;;  %v3541_v54 = vadd.f32 %v11861_v13, %v3500_v46  ;;  %v9726_v60 = vld [vmem:[%s13775_s7 + $0x120] ss:$16 sps:$4 sm:$0xff]   ;;  %v9734_v62 = vld [vmem:[%s13775_s7 + $0x104] ss:$16 sps:$4 sm:$0xff]   ;;  %v1275_v12 = vrot.slane %v12308_v58, %v10748_v52 }
 0x376   :  { %v3503_v15 = vpop.f32.mrf.mxu1  ;;  %v9729_v13 = vld [vmem:[%s13775_s7 + $0x700] ss:$16 sps:$4 sm:$0xff]   ;;  %v9743_v7 = vld [vmem:[%s13775_s7 + $0xae4] ss:$16 sps:$4 sm:$0xff]  }
 0x377   :  { %v3543_v16 = vadd.f32 %v11872_v21, %v3502_v9  ;;  %v3708_v17 = vpop.f32.mrf.mxu0  ;;  %6656 = vmatpush1.bf16.msra.mxu1 %v9684_v5  ;;  %v9701_v21 = vld [vmem:[%s13775_s7 + $0x7a4] ss:$16 sps:$4 sm:$0xff]   ;;  %v3879_v5 = vmax.f32 %v3541_v54, 0.0  ;;  %v3878_v15 = vmax.f32 %v12003_v29, 0.0  ;;  %v9771_v46 = vld [vmem:[%s13775_s7 + $0xa40] ss:$16 sps:$4 sm:$0xff]  }
 0x378   :  { %6781 = vmatpush2.bf16.msra.mxu0 %v9687_v8  ;;  %v3504_v26 = vpop.f32.mrf.mxu1  ;;  %6657 = vmatprep.subr.bf16.mxu1 %v9692_v63  ;;  %v9732_v8 = vld [vmem:[%s13775_s7 + $0x100] ss:$16 sps:$4 sm:$0xff]   ;;  %v3873_v63 = vmax.f32 %v11671_v56, 0.0  ;;  %v9737_v9 = vld [vmem:[%s13775_s7 + $0x4e4] ss:$16 sps:$4 sm:$0xff]  }
 0x379   :  { %v3880_v0 = vmax.f32 %v3543_v16, 0.0  ;;  %v3709_v28 = vpop.f32.mrf.mxu0  ;;  %6782 = vmatprep.subr.bf16.mxu0 %v9695_v14  ;;  %v9741_v14 = vld [vmem:[%s13775_s7 + $0xae0] ss:$16 sps:$4 sm:$0xff]   ;;  %v3582_v16 = vadd.f32 %v12086_v6, %v1275_v12  ;;  %v12336_v17 = vpack.c.bf16 %v3879_v5, %v3879_v5  ;;  %v9749_v56 = vld [vmem:[%s13775_s7 + $0xac4] ss:$16 sps:$4 sm:$0xff]  }
 0x37a   :  { %v12347_v29 = vpack.c.bf16 %v3873_v63, %v3873_v63  ;;  %v12357_v28 = vpack.c.bf16 %v3878_v15, %v3878_v15  ;;  %v9785_v54 = vld [vmem:[%s13775_s7 + $0xa04] ss:$16 sps:$4 sm:$0xff]   ;;  %v9774_v5 = vld [vmem:[%s13775_s7 + $0x400] ss:$16 sps:$4 sm:$0xff]  }
 0x37b   :  { %v12237_v30 = vpack.c.bf16 %v3880_v0, %v3880_v0  ;;  %6658 = vmatpush2.bf16.msra.mxu1 %v9690_v20  ;;  %v9747_v0 = vld [vmem:[%s13775_s7 + $0xac0] ss:$16 sps:$4 sm:$0xff]  }
 0x37c   :  { %6783 = vmatpush2.bf16.msra.mxu0 %v9693_v27  ;;  %6659 = vmatprep.subr.bf16.mxu1 %v9698_v33  ;;  %v9735_v27 = vld [vmem:[%s13775_s7 + $0x4e0] ss:$16 sps:$4 sm:$0xff]   ;;  %v9740_v33 = vld [vmem:[%s13775_s7 + $0x4c4] ss:$16 sps:$4 sm:$0xff]  }
 0x37d   :  { %6796 = vmatprep.mubr.bf16.mxu0 %v12237_v30  ;;  %6784 = vmatprep.subr.bf16.mxu0 %v9701_v21  ;;  %v9755_v21 = vld [vmem:[%s13775_s7 + $0xaa4] ss:$16 sps:$4 sm:$0xff]   ;;  %v9780_v15 = vld [vmem:[%s13775_s7 + $0x5e0] ss:$16 sps:$4 sm:$0xff]  }
 0x37f   :  { %6660 = vmatpush2.bf16.msra.mxu1 %v9696_v31 }
 0x380   :  { %6785 = vmatpush2.bf16.msra.mxu0 %v9699_v32  ;;  %6661 = vmatprep.subr.bf16.mxu1 %v9704_v2  ;;  %v9738_v32 = vld [vmem:[%s13775_s7 + $0x4c0] ss:$16 sps:$4 sm:$0xff]  }
 0x381   :  { %6786 = vmatprep.subr.bf16.mxu0 %v9707_v22  ;;  %v9746_v22 = vld [vmem:[%s13775_s7 + $0x4a4] ss:$16 sps:$4 sm:$0xff]  }
 0x383   :  { %6662 = vmatpush2.bf16.msra.mxu1 %v9702_v34  ;;  %v9753_v34 = vld [vmem:[%s13775_s7 + $0xaa0] ss:$16 sps:$4 sm:$0xff]  }
 0x384   :  { %6787 = vmatpush2.bf16.msra.mxu0 %v9705_v36  ;;  %6663 = vmatprep.subr.bf16.mxu1 %v9710_v39  ;;  %v9761_v36 = vld [vmem:[%s13775_s7 + $0xa84] ss:$16 sps:$4 sm:$0xff]   ;;  %v9744_v39 = vld [vmem:[%s13775_s7 + $0x4a0] ss:$16 sps:$4 sm:$0xff]  }
 0x385   :  { %6788 = vmatprep.subr.bf16.mxu0 %v9713_v41  ;;  %v9752_v41 = vld [vmem:[%s13775_s7 + $0x484] ss:$16 sps:$4 sm:$0xff]  }
 0x387   :  { %6664 = vmatpush2.bf16.msra.mxu1 %v9708_v23  ;;  %v9759_v23 = vld [vmem:[%s13775_s7 + $0xa80] ss:$16 sps:$4 sm:$0xff]  }
 0x388   :  { %6789 = vmatpush2.bf16.msra.mxu0 %v9711_v18  ;;  %6665 = vmatprep.subr.bf16.mxu1 %v9716_v19  ;;  %v9767_v18 = vld [vmem:[%s13775_s7 + $0xa64] ss:$16 sps:$4 sm:$0xff]   ;;  %v9750_v19 = vld [vmem:[%s13775_s7 + $0x480] ss:$16 sps:$4 sm:$0xff]  }
 0x389   :  { %6790 = vmatprep.subr.bf16.mxu0 %v9719_v43  ;;  %v9765_v43 = vld [vmem:[%s13775_s7 + $0xa60] ss:$16 sps:$4 sm:$0xff]  }
 0x38b   :  { %6666 = vmatpush2.bf16.msra.mxu1 %v9714_v44  ;;  %v9773_v44 = vld [vmem:[%s13775_s7 + $0xa44] ss:$16 sps:$4 sm:$0xff]  }
 0x38c   :  { %6791 = vmatpush2.bf16.msra.mxu0 %v9717_v45  ;;  %6667 = vmatprep.subr.bf16.mxu1 %v9722_v38  ;;  %v9756_v45 = vld [vmem:[%s13775_s7 + $0x460] ss:$16 sps:$4 sm:$0xff]   ;;  %v9764_v38 = vld [vmem:[%s13775_s7 + $0x444] ss:$16 sps:$4 sm:$0xff]  }
 0x38d   :  { %6792 = vmatprep.subr.bf16.mxu0 %v9725_v47  ;;  %v9779_v47 = vld [vmem:[%s13775_s7 + $0xa24] ss:$16 sps:$4 sm:$0xff]  }
 0x38f   :  { %6668 = vmatpush2.bf16.msra.mxu1 %v9720_v48  ;;  %v9762_v48 = vld [vmem:[%s13775_s7 + $0x440] ss:$16 sps:$4 sm:$0xff]  }
 0x390   :  { %6793 = vmatpush2.bf16.msra.mxu0 %v9723_v49  ;;  %6669 = vmatprep.subr.bf16.mxu1 %v9728_v51  ;;  %v9770_v49 = vld [vmem:[%s13775_s7 + $0x424] ss:$16 sps:$4 sm:$0xff]   ;;  %v9777_v51 = vld [vmem:[%s13775_s7 + $0xa20] ss:$16 sps:$4 sm:$0xff]  }
 0x391   :  { %6794 = vmatprep.subr.bf16.mxu0 %v9731_v57  ;;  %v9768_v57 = vld [vmem:[%s13775_s7 + $0x420] ss:$16 sps:$4 sm:$0xff]  }
 0x393   :  { %6670 = vmatpush2.bf16.msra.mxu1 %v9726_v60  ;;  %v9776_v60 = vld [vmem:[%s13775_s7 + $0x404] ss:$16 sps:$4 sm:$0xff]  }
 0x394   :  { %6795 = vmatpush2.bf16.msra.mxu0 %v9729_v13  ;;  %6671 = vmatprep.subr.bf16.mxu1 %v9734_v62  ;;  %v9783_v13 = vld [vmem:[%s13775_s7 + $0xa00] ss:$16 sps:$4 sm:$0xff]   ;;  %v9791_v62 = vld [vmem:[%s13775_s7 + $0xbe4] ss:$16 sps:$4 sm:$0xff]  }
 0x395   :  { %6846 = vmatprep.subr.bf16.mxu0 %v9743_v7  ;;  %v9782_v7 = vld [vmem:[%s13775_s7 + $0x5e4] ss:$16 sps:$4 sm:$0xff]  }
 0x396   :  { %v3622_v20 = vpop.f32.mrf.mxu1 }
 0x397   :  { %v12341_v26 = vadd.f32 %v3622_v20, %v3582_v16  ;;  %6797 = vmatmul.mubr.bf16.vlgmr.msra.gmra.mxu0 %v12336_v17  ;;  %6672 = vmatpush2.bf16.msra.mxu1 %v9732_v8  ;;  %v9789_v8 = vld [vmem:[%s13775_s7 + $0xbe0] ss:$16 sps:$4 sm:$0xff]   ;;  %v9788_v16 = vld [vmem:[%s13775_s7 + $0x5c4] ss:$16 sps:$4 sm:$0xff]  }
 0x398   :  { %v12349_v6 = vpop.f32.mrf.mxu1  ;;  %6723 = vmatprep.subr.bf16.mxu1 %v9737_v9  ;;  %6847 = vmatpush1.bf16.msra.mxu0 %v9741_v14  ;;  %v9797_v9 = vld [vmem:[%s13775_s7 + $0xbc4] ss:$16 sps:$4 sm:$0xff]  }
 0x399   :  { %6848 = vmatprep.subr.bf16.mxu0 %v9749_v56  ;;  %v9795_v56 = vld [vmem:[%s13775_s7 + $0xbc0] ss:$16 sps:$4 sm:$0xff]  }
 0x39a   :  { %v3626_v31 = vpop.f32.mrf.mxu1  ;;  %6674 = vmatmul.mubr.bf16.vlgmr.msra.gmra.mxu1 %v12347_v29 }
 0x39b   :  { %6724 = vmatpush1.bf16.msra.mxu1 %v9735_v27  ;;  %6755 = vmatprep.mubr.bf16.mxu1 %v12357_v28  ;;  %v9803_v27 = vld [vmem:[%s13775_s7 + $0xba4] ss:$16 sps:$4 sm:$0xff]  }
 0x39c   :  { %v3627_v2 = vpop.f32.mrf.mxu1  ;;  %6725 = vmatprep.subr.bf16.mxu1 %v9740_v33  ;;  %6849 = vmatpush1.bf16.msra.mxu0 %v9747_v0  ;;  %v9786_v33 = vld [vmem:[%s13775_s7 + $0x5c0] ss:$16 sps:$4 sm:$0xff]   ;;  %v9794_v0 = vld [vmem:[%s13775_s7 + $0x5a4] ss:$16 sps:$4 sm:$0xff]  }
 0x39d   :  { %6850 = vmatprep.subr.bf16.mxu0 %v9755_v21  ;;  %v9801_v21 = vld [vmem:[%s13775_s7 + $0xba0] ss:$16 sps:$4 sm:$0xff]   ;;  %v9809_v31 = vld [vmem:[%s13775_s7 + $0xb84] ss:$16 sps:$4 sm:$0xff]  }
 0x39e   :  { %v9800_v2 = vld [vmem:[%s13775_s7 + $0x584] ss:$16 sps:$4 sm:$0xff]  }
 0x39f   :  { %6726 = vmatpush1.bf16.msra.mxu1 %v9738_v32  ;;  %v9792_v32 = vld [vmem:[%s13775_s7 + $0x5a0] ss:$16 sps:$4 sm:$0xff]  }
 0x3a0   :  { %6727 = vmatprep.subr.bf16.mxu1 %v9746_v22  ;;  %6851 = vmatpush1.bf16.msra.mxu0 %v9753_v34  ;;  %v9807_v22 = vld [vmem:[%s13775_s7 + $0xb80] ss:$16 sps:$4 sm:$0xff]   ;;  %v9815_v34 = vld [vmem:[%s13775_s7 + $0xb64] ss:$16 sps:$4 sm:$0xff]  }
 0x3a1   :  { %6852 = vmatprep.subr.bf16.mxu0 %v9761_v36  ;;  %v9798_v36 = vld [vmem:[%s13775_s7 + $0x580] ss:$16 sps:$4 sm:$0xff]  }
 0x3a3   :  { %6728 = vmatpush1.bf16.msra.mxu1 %v9744_v39  ;;  %v9806_v39 = vld [vmem:[%s13775_s7 + $0x564] ss:$16 sps:$4 sm:$0xff]  }
 0x3a4   :  { %6729 = vmatprep.subr.bf16.mxu1 %v9752_v41  ;;  %6853 = vmatpush1.bf16.msra.mxu0 %v9759_v23  ;;  %v9813_v41 = vld [vmem:[%s13775_s7 + $0xb60] ss:$16 sps:$4 sm:$0xff]   ;;  %v9821_v23 = vld [vmem:[%s13775_s7 + $0xb44] ss:$16 sps:$4 sm:$0xff]  }
 0x3a5   :  { %6854 = vmatprep.subr.bf16.mxu0 %v9767_v18  ;;  %v9804_v18 = vld [vmem:[%s13775_s7 + $0x560] ss:$16 sps:$4 sm:$0xff]  }
 0x3a7   :  { %6730 = vmatpush1.bf16.msra.mxu1 %v9750_v19  ;;  %v9812_v19 = vld [vmem:[%s13775_s7 + $0x544] ss:$16 sps:$4 sm:$0xff]  }
 0x3a8   :  { %6731 = vmatprep.subr.bf16.mxu1 %v9758_v42  ;;  %6855 = vmatpush1.bf16.msra.mxu0 %v9765_v43  ;;  %v9819_v42 = vld [vmem:[%s13775_s7 + $0xb40] ss:$16 sps:$4 sm:$0xff]   ;;  %v9827_v43 = vld [vmem:[%s13775_s7 + $0xb24] ss:$16 sps:$4 sm:$0xff]  }
 0x3a9   :  { %6856 = vmatprep.subr.bf16.mxu0 %v9773_v44  ;;  %v1279_v44 = vrot.slane %v12308_v58, %v10751_v53 }
 0x3ab   :  { %6732 = vmatpush1.bf16.msra.mxu1 %v9756_v45  ;;  %v9810_v45 = vld [vmem:[%s13775_s7 + $0x540] ss:$16 sps:$4 sm:$0xff]  }
 0x3ac   :  { %6733 = vmatprep.subr.bf16.mxu1 %v9764_v38  ;;  %6857 = vmatpush1.bf16.msra.mxu0 %v9771_v46  ;;  %v9818_v38 = vld [vmem:[%s13775_s7 + $0x524] ss:$16 sps:$4 sm:$0xff]   ;;  %v9825_v46 = vld [vmem:[%s13775_s7 + $0xb20] ss:$16 sps:$4 sm:$0xff]  }
 0x3ad   :  { %6858 = vmatprep.subr.bf16.mxu0 %v9779_v47  ;;  %v9833_v47 = vld [vmem:[%s13775_s7 + $0xb04] ss:$16 sps:$4 sm:$0xff]  }
 0x3af   :  { %6734 = vmatpush1.bf16.msra.mxu1 %v9762_v48  ;;  %v3584_v48 = vadd.f32 %v12097_v10, %v1279_v44  ;;  %v9839_v10 = vld [vmem:[%s13775_s7 + $0xec] ss:$16 sps:$4 sm:$0xff]   ;;  %v9846_v44 = vld [vmem:[%s13775_s7 + $0x880] ss:$16 sps:$4 sm:$0xff]  }
 0x3b0   :  { %6735 = vmatprep.subr.bf16.mxu1 %v9770_v49  ;;  %6859 = vmatpush1.bf16.msra.mxu0 %v9777_v51  ;;  %v9816_v49 = vld [vmem:[%s13775_s7 + $0x520] ss:$16 sps:$4 sm:$0xff]   ;;  %v9824_v51 = vld [vmem:[%s13775_s7 + $0x504] ss:$16 sps:$4 sm:$0xff]  }
 0x3b1   :  { %6860 = vmatprep.subr.bf16.mxu0 %v9785_v54  ;;  %v9831_v54 = vld [vmem:[%s13775_s7 + $0xb00] ss:$16 sps:$4 sm:$0xff]  }
 0x3b3   :  { %v12436_v12 = vpop.f32.mrf.mxu0  ;;  %6736 = vmatpush1.bf16.msra.mxu1 %v9768_v57  ;;  %v3625_v57 = vadd.f32 %v12349_v6, %v3584_v48  ;;  %v9830_v6 = vld [vmem:[%s13775_s7 + $0x8e4] ss:$16 sps:$4 sm:$0xff]  }
 0x3b4   :  { %6737 = vmatprep.subr.bf16.mxu1 %v9776_v60  ;;  %6861 = vmatpush1.bf16.msra.mxu0 %v9783_v13  ;;  %v1283_v60 = vrot.slane %v12308_v58, %v10908_v59  ;;  %v9822_v13 = vld [vmem:[%s13775_s7 + $0x500] ss:$16 sps:$4 sm:$0xff]   ;;  %v9860_v48 = vld [vmem:[%s13775_s7 + $0x844] ss:$16 sps:$4 sm:$0xff]  }
 0x3b5   :  { %v12447_v63 = vpop.f32.mrf.mxu0  ;;  %6862 = vmatprep.subr.bf16.mxu0 %v9791_v62  ;;  %v3877_v62 = vmax.f32 %v11992_v25, 0.0  ;;  %v9828_v25 = vld [vmem:[%s13775_s7 + $0x8e0] ss:$16 sps:$4 sm:$0xff]  }
 0x3b7   :  { %v3749_v14 = vpop.f32.mrf.mxu0  ;;  %6738 = vmatpush1.bf16.msra.mxu1 %v9774_v5  ;;  %v3882_v5 = vmax.f32 %v3625_v57, 0.0  ;;  %v9866_v57 = vld [vmem:[%s13775_s7 + $0x824] ss:$16 sps:$4 sm:$0xff]  }
 0x3b8   :  { %6739 = vmatprep.subr.bf16.mxu1 %v9782_v7  ;;  %6863 = vmatpush2.bf16.msra.mxu0 %v9789_v8  ;;  %v1287_v7 = vrot.slane %v12308_v58, %v10914_v61 }
 0x3b9   :  { %v3750_v20 = vpop.f32.mrf.mxu0  ;;  %6864 = vmatprep.subr.bf16.mxu0 %v9797_v9 }
 0x3ba   :  { %v12561_v20 = vpack.c.bf16 %v3882_v5, %v3882_v5  ;;  %v9870_v5 = vld [vmem:[%s13775_s7 + $0x800] ss:$16 sps:$4 sm:$0xff]  }
 0x3bb   :  { %6740 = vmatpush2.bf16.msra.mxu1 %v9780_v15  ;;  %v12556_v15 = vpack.c.bf16 %v3877_v62, %v3877_v62  ;;  %v9872_v62 = vld [vmem:[%s13775_s7 + $0x804] ss:$16 sps:$4 sm:$0xff]  }
 0x3bc   :  { %6741 = vmatprep.subr.bf16.mxu1 %v9788_v16  ;;  %6865 = vmatpush2.bf16.msra.mxu0 %v9795_v56  ;;  %v9836_v56 = vld [vmem:[%s13775_s7 + $0x8c4] ss:$16 sps:$4 sm:$0xff]  }
 0x3bd   :  { %6866 = vmatprep.subr.bf16.mxu0 %v9803_v27 }
 0x3bf   :  { %6742 = vmatpush2.bf16.msra.mxu1 %v9786_v33 }
 0x3c0   :  { %6743 = vmatprep.subr.bf16.mxu1 %v9794_v0  ;;  %6867 = vmatpush2.bf16.msra.mxu0 %v9801_v21 }
 0x3c1   :  { %6868 = vmatprep.subr.bf16.mxu0 %v9809_v31 }
 0x3c3   :  { %6744 = vmatpush2.bf16.msra.mxu1 %v9792_v32 }
 0x3c4   :  { %6745 = vmatprep.subr.bf16.mxu1 %v9800_v2  ;;  %6869 = vmatpush2.bf16.msra.mxu0 %v9807_v22  ;;  %v9834_v2 = vld [vmem:[%s13775_s7 + $0x8c0] ss:$16 sps:$4 sm:$0xff]  }
 0x3c5   :  { %6870 = vmatprep.subr.bf16.mxu0 %v9815_v34 }
 0x3c7   :  { %6746 = vmatpush2.bf16.msra.mxu1 %v9798_v36 }
 0x3c8   :  { %6747 = vmatprep.subr.bf16.mxu1 %v9806_v39  ;;  %6871 = vmatpush2.bf16.msra.mxu0 %v9813_v41 }
 0x3c9   :  { %6872 = vmatprep.subr.bf16.mxu0 %v9821_v23  ;;  %v9840_v23 = vld [vmem:[%s13775_s7 + $0x8a0] ss:$16 sps:$4 sm:$0xff]  }
 0x3cb   :  { %6748 = vmatpush2.bf16.msra.mxu1 %v9804_v18 }
 0x3cc   :  { %6749 = vmatprep.subr.bf16.mxu1 %v9812_v19  ;;  %6873 = vmatpush2.bf16.msra.mxu0 %v9819_v42  ;;  %v9845_v19 = vld [vmem:[%s13775_s7 + $0xcc] ss:$16 sps:$4 sm:$0xff]   ;;  %v9848_v42 = vld [vmem:[%s13775_s7 + $0x884] ss:$16 sps:$4 sm:$0xff]  }
 0x3cd   :  { %6874 = vmatprep.subr.bf16.mxu0 %v9827_v43  ;;  %v9843_v43 = vld [vmem:[%s13775_s7 + $0xc8] ss:$16 sps:$4 sm:$0xff]  }
 0x3cf   :  { %6750 = vmatpush2.bf16.msra.mxu1 %v9810_v45  ;;  %v9851_v45 = vld [vmem:[%s13775_s7 + $0xac] ss:$16 sps:$4 sm:$0xff]  }
 0x3d0   :  { %6751 = vmatprep.subr.bf16.mxu1 %v9818_v38  ;;  %6875 = vmatpush2.bf16.msra.mxu0 %v9825_v46  ;;  %v9854_v38 = vld [vmem:[%s13775_s7 + $0x864] ss:$16 sps:$4 sm:$0xff]   ;;  %v9849_v46 = vld [vmem:[%s13775_s7 + $0xa8] ss:$16 sps:$4 sm:$0xff]  }
 0x3d1   :  { %6876 = vmatprep.subr.bf16.mxu0 %v9833_v47  ;;  %v9857_v47 = vld [vmem:[%s13775_s7 + $0x8c] ss:$16 sps:$4 sm:$0xff]  }
 0x3d3   :  { %6752 = vmatpush2.bf16.msra.mxu1 %v9816_v49  ;;  %v9855_v49 = vld [vmem:[%s13775_s7 + $0x88] ss:$16 sps:$4 sm:$0xff]  }
 0x3d4   :  { %6753 = vmatprep.subr.bf16.mxu1 %v9824_v51  ;;  %6877 = vmatpush2.bf16.msra.mxu0 %v9831_v54  ;;  %v9858_v51 = vld [vmem:[%s13775_s7 + $0x840] ss:$16 sps:$4 sm:$0xff]   ;;  %v9863_v54 = vld [vmem:[%s13775_s7 + $0x6c] ss:$16 sps:$4 sm:$0xff]  }
 0x3d5   :  { %6969 = vmatprep.subr.bf16.mxu0 %v9839_v10  ;;  %v9861_v10 = vld [vmem:[%s13775_s7 + $0x68] ss:$16 sps:$4 sm:$0xff]  }
 0x3d6   :  { %v3663_v8 = vpop.f32.mrf.mxu1 }
 0x3d7   :  { %v3664_v9 = vadd.f32 %v3663_v8, %v1283_v60  ;;  %v12551_v14 = vpop.f32.mrf.mxu0  ;;  %6754 = vmatpush2.bf16.msra.mxu1 %v9822_v13  ;;  %v9864_v60 = vld [vmem:[%s13775_s7 + $0x820] ss:$16 sps:$4 sm:$0xff]   ;;  %v9869_v13 = vld [vmem:[%s13775_s7 + $0x4c] ss:$16 sps:$4 sm:$0xff]   ;;  %v9878_v8 = vld [vmem:[%s13775_s7 + $0x9e4] ss:$16 sps:$4 sm:$0xff]  }
 0x3d8   :  { %v3665_v16 = vpop.f32.mrf.mxu1  ;;  %6805 = vmatprep.subr.bf16.mxu1 %v9830_v6  ;;  %v9867_v6 = vld [vmem:[%s13775_s7 + $0x48] ss:$16 sps:$4 sm:$0xff]  }
 0x3d9   :  { %v3705_v27 = vadd.f32 %v12208_v3, %v3664_v9  ;;  %v3666_v33 = vadd.f32 %v3665_v16, %v1287_v7  ;;  %v3869_v0 = vpop.f32.mrf.mxu0  ;;  %v9842_v3 = vld [vmem:[%s13775_s7 + $0x8a4] ss:$16 sps:$4 sm:$0xff]   ;;  %v9875_v7 = vld [vmem:[%s13775_s7 + $0x2c] ss:$16 sps:$4 sm:$0xff]   ;;  %v1291_v9 = vrot.slane %v12308_v58, %v1258_v1  ;;  %v9876_v16 = vld [vmem:[%s13775_s7 + $0x9e0] ss:$16 sps:$4 sm:$0xff]  }
 0x3da   :  { %v3667_v21 = vpop.f32.mrf.mxu1  ;;  %6756 = vmatmul.mubr.bf16.vlgmr.msra.gmra.mxu1 %v12556_v15  ;;  %v9884_v1 = vld [vmem:[%s13775_s7 + $0x9c4] ss:$16 sps:$4 sm:$0xff]  }
 0x3db   :  { %v3707_v31 = vadd.f32 %v12219_v11, %v3666_v33  ;;  %v3870_v32 = vpop.f32.mrf.mxu0  ;;  %6806 = vmatpush1.bf16.msra.mxu1 %v9828_v25  ;;  %6837 = vmatprep.mubr.bf16.mxu1 %v12561_v20  ;;  %v3883_v22 = vmax.f32 %v3705_v27, 0.0  ;;  %v9837_v11 = vld [vmem:[%s13775_s7 + $0xe8] ss:$16 sps:$4 sm:$0xff]   ;;  %v3746_v27 = vadd.f32 %v12436_v12, %v1291_v9  ;;  %v9887_v12 = vld [vmem:[%s13775_s7 + $0x1ec] ss:$16 sps:$4 sm:$0xff]  }
 0x3dc   :  { %v3668_v34 = vpop.f32.mrf.mxu1  ;;  %6807 = vmatprep.subr.bf16.mxu1 %v9836_v56  ;;  %v9873_v25 = vld [vmem:[%s13775_s7 + $0x28] ss:$16 sps:$4 sm:$0xff]   ;;  %v9881_v56 = vld [vmem:[%s13775_s7 + $0xc] ss:$16 sps:$4 sm:$0xff]  }
 0x3dd   :  { %v3884_v36 = vmax.f32 %v3707_v31, 0.0  ;;  %v3871_v39 = vpop.f32.mrf.mxu0  ;;  %v12581_v18 = vpack.c.bf16 %v3883_v22, %v3883_v22  ;;  %v9879_v21 = vld [vmem:[%s13775_s7 + $0x8] ss:$16 sps:$4 sm:$0xff]   ;;  %v9882_v31 = vld [vmem:[%s13775_s7 + $0x9c0] ss:$16 sps:$4 sm:$0xff]  }
 0x3de   :  { %v9885_v34 = vld [vmem:[%s13775_s7 + $0x1e8] ss:$16 sps:$4 sm:$0xff]   ;;  %v9893_v39 = vld [vmem:[%s13775_s7 + $0x1cc] ss:$16 sps:$4 sm:$0xff]  }
 0x3df   :  { %v12573_v41 = vpack.c.bf16 %v3884_v36, %v3884_v36  ;;  %6808 = vmatpush1.bf16.msra.mxu1 %v9834_v2  ;;  %v9890_v2 = vld [vmem:[%s13775_s7 + $0x9a4] ss:$16 sps:$4 sm:$0xff]  }
 0x3e0   :  { %6809 = vmatprep.subr.bf16.mxu1 %v9842_v3  ;;  %v9888_v3 = vld [vmem:[%s13775_s7 + $0x9a0] ss:$16 sps:$4 sm:$0xff]  }
 0x3e1   :  { %6878 = vmatprep.mubr.bf16.mxu0 %v12573_v41 }
 0x3e2   :  { %6879 = vmatmul.mubr.bf16.vlgmr.msra.gmra.mxu0 %v12581_v18 }
 0x3e3   :  { %6970 = vmatpush1.bf16.msra.mxu0 %v9837_v11  ;;  %6810 = vmatpush1.bf16.msra.mxu1 %v9840_v23  ;;  %v9896_v11 = vld [vmem:[%s13775_s7 + $0x984] ss:$16 sps:$4 sm:$0xff]   ;;  %v9891_v23 = vld [vmem:[%s13775_s7 + $0x1c8] ss:$16 sps:$4 sm:$0xff]  }
 0x3e4   :  { %7001 = vmatprep.mubr.bf16.mxu0 %v12127_v37  ;;  %6971 = vmatprep.subr.bf16.mxu0 %v9845_v19  ;;  %v9852_v37 = vld [vmem:[%s13775_s7 + $0x860] ss:$16 sps:$4 sm:$0xff]  }
 0x3e5   :  { %6811 = vmatprep.subr.bf16.mxu1 %v9848_v42  ;;  %v9894_v19 = vld [vmem:[%s13775_s7 + $0x980] ss:$16 sps:$4 sm:$0xff]   ;;  %v9899_v42 = vld [vmem:[%s13775_s7 + $0x1ac] ss:$16 sps:$4 sm:$0xff]  }
 0x3e7   :  { %6972 = vmatpush1.bf16.msra.mxu0 %v9843_v43  ;;  %6812 = vmatpush1.bf16.msra.mxu1 %v9846_v44  ;;  %v9902_v43 = vld [vmem:[%s13775_s7 + $0x964] ss:$16 sps:$4 sm:$0xff]   ;;  %v9897_v44 = vld [vmem:[%s13775_s7 + $0x1a8] ss:$16 sps:$4 sm:$0xff]  }
 0x3e8   :  { %6973 = vmatprep.subr.bf16.mxu0 %v9851_v45  ;;  %6813 = vmatprep.subr.bf16.mxu1 %v9854_v38  ;;  %v9900_v45 = vld [vmem:[%s13775_s7 + $0x960] ss:$16 sps:$4 sm:$0xff]   ;;  %v9905_v38 = vld [vmem:[%s13775_s7 + $0x18c] ss:$16 sps:$4 sm:$0xff]  }
 0x3eb   :  { %6974 = vmatpush1.bf16.msra.mxu0 %v9849_v46  ;;  %6814 = vmatpush1.bf16.msra.mxu1 %v9852_v37  ;;  %v9908_v46 = vld [vmem:[%s13775_s7 + $0x944] ss:$16 sps:$4 sm:$0xff]   ;;  %v9903_v37 = vld [vmem:[%s13775_s7 + $0x188] ss:$16 sps:$4 sm:$0xff]  }
 0x3ec   :  { %6975 = vmatprep.subr.bf16.mxu0 %v9857_v47  ;;  %6815 = vmatprep.subr.bf16.mxu1 %v9860_v48  ;;  %v9906_v47 = vld [vmem:[%s13775_s7 + $0x940] ss:$16 sps:$4 sm:$0xff]   ;;  %v1295_v48 = vrot.slane %v12308_v58, %v1262_v4 }
 0x3ed   :  { %v9912_v4 = vld [vmem:[%s13775_s7 + $0x920] ss:$16 sps:$4 sm:$0xff]  }
 0x3ef   :  { %6976 = vmatpush1.bf16.msra.mxu0 %v9855_v49  ;;  %6816 = vmatpush1.bf16.msra.mxu1 %v9858_v51  ;;  %v9911_v49 = vld [vmem:[%s13775_s7 + $0x16c] ss:$16 sps:$4 sm:$0xff]   ;;  %v9914_v51 = vld [vmem:[%s13775_s7 + $0x924] ss:$16 sps:$4 sm:$0xff]  }
 0x3f0   :  { %6977 = vmatprep.subr.bf16.mxu0 %v9863_v54  ;;  %6817 = vmatprep.subr.bf16.mxu1 %v9866_v57  ;;  %v9909_v54 = vld [vmem:[%s13775_s7 + $0x168] ss:$16 sps:$4 sm:$0xff]   ;;  %v3748_v57 = vadd.f32 %v12447_v63, %v1295_v48  ;;  %v9918_v63 = vld [vmem:[%s13775_s7 + $0x900] ss:$16 sps:$4 sm:$0xff]  }
 0x3f1   :  { %v9954_v48 = vld [vmem:[%s13775_s7 + $0xc40] ss:$16 sps:$4 sm:$0xff]  }
 0x3f3   :  { %6978 = vmatpush1.bf16.msra.mxu0 %v9861_v10  ;;  %6818 = vmatpush1.bf16.msra.mxu1 %v9864_v60  ;;  %v9917_v10 = vld [vmem:[%s13775_s7 + $0x14c] ss:$16 sps:$4 sm:$0xff]   ;;  %v9920_v60 = vld [vmem:[%s13775_s7 + $0x904] ss:$16 sps:$4 sm:$0xff]  }
 0x3f4   :  { %6979 = vmatprep.subr.bf16.mxu0 %v9869_v13  ;;  %6819 = vmatprep.subr.bf16.mxu1 %v9872_v62  ;;  %v9915_v62 = vld [vmem:[%s13775_s7 + $0x148] ss:$16 sps:$4 sm:$0xff]  }
 0x3f7   :  { %6980 = vmatpush1.bf16.msra.mxu0 %v9867_v6  ;;  %6820 = vmatpush1.bf16.msra.mxu1 %v9870_v5  ;;  %v3881_v6 = vmax.f32 %v12341_v26, 0.0  ;;  %v9923_v5 = vld [vmem:[%s13775_s7 + $0x12c] ss:$16 sps:$4 sm:$0xff]   ;;  %v9924_v26 = vld [vmem:[%s13775_s7 + $0xce0] ss:$16 sps:$4 sm:$0xff]  }
 0x3f8   :  { %6981 = vmatprep.subr.bf16.mxu0 %v9875_v7  ;;  %6821 = vmatprep.subr.bf16.mxu1 %v9878_v8  ;;  %v9926_v7 = vld [vmem:[%s13775_s7 + $0xce4] ss:$16 sps:$4 sm:$0xff]  }
 0x3fa   :  { %v3786_v33 = vpop.f32.mrf.mxu1 }
 0x3fb   :  { %v12668_v0 = vadd.f32 %v3786_v33, %v3746_v27  ;;  %6982 = vmatpush1.bf16.msra.mxu0 %v9873_v25  ;;  %6822 = vmatpush2.bf16.msra.mxu1 %v9876_v16  ;;  %v9921_v25 = vld [vmem:[%s13775_s7 + $0x128] ss:$16 sps:$4 sm:$0xff]   ;;  %v12767_v16 = vpack.c.bf16 %v3881_v6, %v3881_v6  ;;  %v9932_v27 = vld [vmem:[%s13775_s7 + $0xcc4] ss:$16 sps:$4 sm:$0xff]  }
 0x3fc   :  { %v3788_v32 = vpop.f32.mrf.mxu1  ;;  %6983 = vmatprep.subr.bf16.mxu0 %v9881_v56  ;;  %6823 = vmatprep.subr.bf16.mxu1 %v9884_v1  ;;  %v9929_v56 = vld [vmem:[%s13775_s7 + $0x10c] ss:$16 sps:$4 sm:$0xff]   ;;  %v9969_v6 = vld [vmem:[%s13775_s7 + $0x428] ss:$16 sps:$4 sm:$0xff]  }
 0x3fd   :  { %v3789_v13 = vadd.f32 %v3788_v32, %v3748_v57  ;;  %v9927_v32 = vld [vmem:[%s13775_s7 + $0x108] ss:$16 sps:$4 sm:$0xff]   ;;  %v9965_v57 = vld [vmem:[%s13775_s7 + $0x44c] ss:$16 sps:$4 sm:$0xff]  }
 0x3fe   :  { %v3790_v22 = vpop.f32.mrf.mxu1 }
 0x3ff   :  { %6984 = vmatpush1.bf16.msra.mxu0 %v9879_v21  ;;  %6824 = vmatpush2.bf16.msra.mxu1 %v9882_v31  ;;  %v3886_v8 = vmax.f32 %v3789_v13, 0.0  ;;  %v9935_v22 = vld [vmem:[%s13775_s7 + $0x4ec] ss:$16 sps:$4 sm:$0xff]   ;;  %v9966_v13 = vld [vmem:[%s13775_s7 + $0xc00] ss:$16 sps:$4 sm:$0xff]  }
 0x400   :  { %v3791_v36 = vpop.f32.mrf.mxu1  ;;  %6985 = vmatprep.subr.bf16.mxu0 %v9887_v12  ;;  %6825 = vmatprep.subr.bf16.mxu1 %v9890_v2  ;;  %v9930_v12 = vld [vmem:[%s13775_s7 + $0xcc0] ss:$16 sps:$4 sm:$0xff]  }
 0x401   :  { %v12777_v33 = vpack.c.bf16 %v3886_v8, %v3886_v8  ;;  %v9980_v8 = vld [vmem:[%s13775_s7 + $0xdc4] ss:$16 sps:$4 sm:$0xff]  }
 0x403   :  { %6986 = vmatpush2.bf16.msra.mxu0 %v9885_v34  ;;  %6826 = vmatpush2.bf16.msra.mxu1 %v9888_v3  ;;  %v9938_v34 = vld [vmem:[%s13775_s7 + $0xca4] ss:$16 sps:$4 sm:$0xff]  }
 0x404   :  { %6987 = vmatprep.subr.bf16.mxu0 %v9893_v39  ;;  %6827 = vmatprep.subr.bf16.mxu1 %v9896_v11  ;;  %v9933_v39 = vld [vmem:[%s13775_s7 + $0x4e8] ss:$16 sps:$4 sm:$0xff]  }
 0x407   :  { %6988 = vmatpush2.bf16.msra.mxu0 %v9891_v23  ;;  %6828 = vmatpush2.bf16.msra.mxu1 %v9894_v19  ;;  %v9936_v23 = vld [vmem:[%s13775_s7 + $0xca0] ss:$16 sps:$4 sm:$0xff]   ;;  %v9941_v19 = vld [vmem:[%s13775_s7 + $0x4cc] ss:$16 sps:$4 sm:$0xff]  }
 0x408   :  { %6989 = vmatprep.subr.bf16.mxu0 %v9899_v42  ;;  %6829 = vmatprep.subr.bf16.mxu1 %v9902_v43  ;;  %v9944_v42 = vld [vmem:[%s13775_s7 + $0xc84] ss:$16 sps:$4 sm:$0xff]   ;;  %v9939_v43 = vld [vmem:[%s13775_s7 + $0x4c8] ss:$16 sps:$4 sm:$0xff]  }
 0x40b   :  { %6990 = vmatpush2.bf16.msra.mxu0 %v9897_v44  ;;  %6830 = vmatpush2.bf16.msra.mxu1 %v9900_v45  ;;  %v9942_v44 = vld [vmem:[%s13775_s7 + $0xc80] ss:$16 sps:$4 sm:$0xff]   ;;  %v9947_v45 = vld [vmem:[%s13775_s7 + $0x4ac] ss:$16 sps:$4 sm:$0xff]  }
 0x40c   :  { %6991 = vmatprep.subr.bf16.mxu0 %v9905_v38  ;;  %6831 = vmatprep.subr.bf16.mxu1 %v9908_v46  ;;  %v9948_v38 = vld [vmem:[%s13775_s7 + $0xc60] ss:$16 sps:$4 sm:$0xff]   ;;  %v9953_v46 = vld [vmem:[%s13775_s7 + $0x48c] ss:$16 sps:$4 sm:$0xff]  }
 0x40f   :  { %6992 = vmatpush2.bf16.msra.mxu0 %v9903_v37  ;;  %6832 = vmatpush2.bf16.msra.mxu1 %v9906_v47  ;;  %v9956_v37 = vld [vmem:[%s13775_s7 + $0xc44] ss:$16 sps:$4 sm:$0xff]   ;;  %v9951_v47 = vld [vmem:[%s13775_s7 + $0x488] ss:$16 sps:$4 sm:$0xff]  }
 0x410   :  { %6993 = vmatprep.subr.bf16.mxu0 %v9911_v49  ;;  %6833 = vmatprep.subr.bf16.mxu1 %v9914_v51  ;;  %v9959_v49 = vld [vmem:[%s13775_s7 + $0x46c] ss:$16 sps:$4 sm:$0xff]   ;;  %v9962_v51 = vld [vmem:[%s13775_s7 + $0xc24] ss:$16 sps:$4 sm:$0xff]  }
 0x413   :  { %6994 = vmatpush2.bf16.msra.mxu0 %v9909_v54  ;;  %6834 = vmatpush2.bf16.msra.mxu1 %v9912_v4  ;;  %v9957_v54 = vld [vmem:[%s13775_s7 + $0x468] ss:$16 sps:$4 sm:$0xff]   ;;  %v9960_v4 = vld [vmem:[%s13775_s7 + $0xc20] ss:$16 sps:$4 sm:$0xff]  }
 0x414   :  { %6995 = vmatprep.subr.bf16.mxu0 %v9917_v10  ;;  %6835 = vmatprep.subr.bf16.mxu1 %v9920_v60  ;;  %v9968_v10 = vld [vmem:[%s13775_s7 + $0xc04] ss:$16 sps:$4 sm:$0xff]   ;;  %v9963_v60 = vld [vmem:[%s13775_s7 + $0x448] ss:$16 sps:$4 sm:$0xff]  }
 0x417   :  { %v12759_v9 = vpop.f32.mrf.mxu0  ;;  %6996 = vmatpush2.bf16.msra.mxu0 %v9915_v62  ;;  %6836 = vmatpush2.bf16.msra.mxu1 %v9918_v63  ;;  %v9971_v62 = vld [vmem:[%s13775_s7 + $0x42c] ss:$16 sps:$4 sm:$0xff]   ;;  %v9974_v63 = vld [vmem:[%s13775_s7 + $0xde4] ss:$16 sps:$4 sm:$0xff]  }
 0x418   :  { %6997 = vmatprep.subr.bf16.mxu0 %v9923_v5  ;;  %6887 = vmatprep.subr.bf16.mxu1 %v9926_v7  ;;  %v9972_v5 = vld [vmem:[%s13775_s7 + $0xde0] ss:$16 sps:$4 sm:$0xff]   ;;  %v9977_v7 = vld [vmem:[%s13775_s7 + $0x40c] ss:$16 sps:$4 sm:$0xff]  }
 0x419   :  { %v12772_v1 = vpop.f32.mrf.mxu0 }
 0x41a   :  { %v12779_v21 = vpop.f32.mrf.mxu1  ;;  %6838 = vmatmul.mubr.bf16.vlgmr.msra.gmra.mxu1 %v12767_v16 }
 0x41b   :  { %v6720_v31 = vpop.f32.mrf.mxu0  ;;  %6998 = vmatpush2.bf16.msra.mxu0 %v9921_v25  ;;  %6888 = vmatpush1.bf16.msra.mxu1 %v9924_v26  ;;  %v9975_v25 = vld [vmem:[%s13775_s7 + $0x408] ss:$16 sps:$4 sm:$0xff]   ;;  %v9978_v26 = vld [vmem:[%s13775_s7 + $0xdc0] ss:$16 sps:$4 sm:$0xff]  }
 0x41c   :  { %6919 = vmatprep.mubr.bf16.mxu1 %v12777_v33  ;;  %v12789_v2 = vpop.f32.mrf.mxu1  ;;  %6999 = vmatprep.subr.bf16.mxu0 %v9929_v56  ;;  %v9983_v56 = vld [vmem:[%s13775_s7 + $0x5ec] ss:$16 sps:$4 sm:$0xff]   ;;  %v9981_v31 = vld [vmem:[%s13775_s7 + $0x5e8] ss:$16 sps:$4 sm:$0xff]  }
 0x41d   :  { %v6721_v3 = vpop.f32.mrf.mxu0  ;;  %6889 = vmatprep.subr.bf16.mxu1 %v9932_v27  ;;  %v9986_v27 = vld [vmem:[%s13775_s7 + $0xda4] ss:$16 sps:$4 sm:$0xff]  }
 0x41e   :  { %v8898_v36 = vpop.f32.mrf.mxu1  ;;  %v9990_v3 = vld [vmem:[%s13775_s7 + $0xd80] ss:$16 sps:$4 sm:$0xff]  }
 0x41f   :  { %7000 = vmatpush2.bf16.msra.mxu0 %v9927_v32  ;;  %6890 = vmatpush1.bf16.msra.mxu1 %v9930_v12  ;;  %v9984_v32 = vld [vmem:[%s13775_s7 + $0xda0] ss:$16 sps:$4 sm:$0xff]   ;;  %v9989_v12 = vld [vmem:[%s13775_s7 + $0x5cc] ss:$16 sps:$4 sm:$0xff]  }
 0x420   :  { %v8899_v11 = vpop.f32.mrf.mxu1  ;;  %7051 = vmatprep.subr.bf16.mxu0 %v9935_v22  ;;  %6891 = vmatprep.subr.bf16.mxu1 %v9938_v34  ;;  %v9992_v22 = vld [vmem:[%s13775_s7 + $0xd84] ss:$16 sps:$4 sm:$0xff]   ;;  %v9987_v34 = vld [vmem:[%s13775_s7 + $0x5c8] ss:$16 sps:$4 sm:$0xff]   ;;  %v9995_v36 = vld [vmem:[%s13775_s7 + $0x5ac] ss:$16 sps:$4 sm:$0xff]  }
 0x421   :  { %v9993_v11 = vld [vmem:[%s13775_s7 + $0x5a8] ss:$16 sps:$4 sm:$0xff]  }
 0x422   :  { %7002 = vmatmul.mubr.bf16.vlgmr.msra.gmra.mxu0 %v12347_v29  ;;  %v9950_v29 = vld [vmem:[%s13775_s7 + $0xc64] ss:$16 sps:$4 sm:$0xff]  }
 0x423   :  { %7052 = vmatpush1.bf16.msra.mxu0 %v9933_v39  ;;  %7083 = vmatprep.mubr.bf16.mxu0 %v12357_v28  ;;  %v9945_v28 = vld [vmem:[%s13775_s7 + $0x4a8] ss:$16 sps:$4 sm:$0xff]   ;;  %v9998_v39 = vld [vmem:[%s13775_s7 + $0xd64] ss:$16 sps:$4 sm:$0xff]  }
 0x424   :  { %6892 = vmatpush1.bf16.msra.mxu1 %v9936_v23  ;;  %7053 = vmatprep.subr.bf16.mxu0 %v9941_v19  ;;  %v9996_v23 = vld [vmem:[%s13775_s7 + $0xd60] ss:$16 sps:$4 sm:$0xff]   ;;  %v10001_v19 = vld [vmem:[%s13775_s7 + $0x58c] ss:$16 sps:$4 sm:$0xff]  }
 0x425   :  { %6893 = vmatprep.subr.bf16.mxu1 %v9944_v42  ;;  %v10004_v42 = vld [vmem:[%s13775_s7 + $0xd44] ss:$16 sps:$4 sm:$0xff]  }
 0x427   :  { %7054 = vmatpush1.bf16.msra.mxu0 %v9939_v43  ;;  %v9999_v43 = vld [vmem:[%s13775_s7 + $0x588] ss:$16 sps:$4 sm:$0xff]  }
 0x428   :  { %6894 = vmatpush1.bf16.msra.mxu1 %v9942_v44  ;;  %7055 = vmatprep.subr.bf16.mxu0 %v9947_v45  ;;  %v10002_v44 = vld [vmem:[%s13775_s7 + $0xd40] ss:$16 sps:$4 sm:$0xff]   ;;  %v10007_v45 = vld [vmem:[%s13775_s7 + $0x56c] ss:$16 sps:$4 sm:$0xff]  }
 0x429   :  { %6895 = vmatprep.subr.bf16.mxu1 %v9950_v29  ;;  %v10010_v29 = vld [vmem:[%s13775_s7 + $0xd24] ss:$16 sps:$4 sm:$0xff]  }
 0x42b   :  { %7056 = vmatpush1.bf16.msra.mxu0 %v9945_v28  ;;  %v10005_v28 = vld [vmem:[%s13775_s7 + $0x568] ss:$16 sps:$4 sm:$0xff]  }
 0x42c   :  { %6896 = vmatpush1.bf16.msra.mxu1 %v9948_v38  ;;  %7057 = vmatprep.subr.bf16.mxu0 %v9953_v46  ;;  %v10008_v38 = vld [vmem:[%s13775_s7 + $0xd20] ss:$16 sps:$4 sm:$0xff]   ;;  %v10013_v46 = vld [vmem:[%s13775_s7 + $0x54c] ss:$16 sps:$4 sm:$0xff]  }
 0x42d   :  { %6897 = vmatprep.subr.bf16.mxu1 %v9956_v37  ;;  %v1299_v37 = vrot.slane %v12308_v58, %v1266_v40  ;;  %v10019_v40 = vld [vmem:[%s13775_s7 + $0x52c] ss:$16 sps:$4 sm:$0xff]   ;;  %v3885_v58 = vmax.f32 %v12668_v0, 0.0 }
 0x42f   :  { %7058 = vmatpush1.bf16.msra.mxu0 %v9951_v47  ;;  %v8897_v47 = vadd.f32 %v12789_v2, %v12779_v21 }
 0x430   :  { %6898 = vmatpush1.bf16.msra.mxu1 %v9954_v48  ;;  %7059 = vmatprep.subr.bf16.mxu0 %v9959_v49  ;;  %v10016_v48 = vld [vmem:[%s13775_s7 + $0xd04] ss:$16 sps:$4 sm:$0xff]  }
 0x431   :  { %6899 = vmatprep.subr.bf16.mxu1 %v9962_v51  ;;  %v4351_v49 = vld [vmem:[%s13775_s7 + $0xe00] sm:$0xff]  ;;  %v10011_v51 = vld [vmem:[%s13775_s7 + $0x548] ss:$16 sps:$4 sm:$0xff]   ;;  %v3828_v21 = vadd.f32 %v8897_v47, %v1299_v37  ;;  %v10066_v47 = vld [vmem:[%s13775_s7 + $0x82c] ss:$16 sps:$4 sm:$0xff]  }
 0x432   :  { %v8806_v2 = vcombine.high %v4351_v49, %v4351_v49  ;;  %v10055_v37 = vld [vmem:[%s13775_s7 + $0x248] ss:$16 sps:$4 sm:$0xff]  }
 0x433   :  { %7060 = vmatpush1.bf16.msra.mxu0 %v9957_v54  ;;  %v8805_v54 = vcombine.low %v4351_v49, %v4351_v49  ;;  %v3868_v0 = vadd.f32 %v12551_v14, %v3828_v21  ;;  %v10022_v14 = vld [vmem:[%s13775_s7 + $0x508] ss:$16 sps:$4 sm:$0xff]  }
 0x434   :  { %6900 = vmatpush1.bf16.msra.mxu1 %v9960_v4  ;;  %7061 = vmatprep.subr.bf16.mxu0 %v9965_v57  ;;  %v10017_v57 = vld [vmem:[%s13775_s7 + $0x528] ss:$16 sps:$4 sm:$0xff]  }
 0x435   :  { %6901 = vmatprep.subr.bf16.mxu1 %v9968_v10  ;;  %v10024_v10 = vld [vmem:[%s13775_s7 + $0x50c] ss:$16 sps:$4 sm:$0xff]   ;;  %v10064_v49 = vld [vmem:[%s13775_s7 + $0x828] ss:$16 sps:$4 sm:$0xff]  }
 0x436   :  { %v10067_v21 = vld [vmem:[%s13775_s7 + $0x208] ss:$16 sps:$4 sm:$0xff]  }
 0x437   :  { %7062 = vmatpush1.bf16.msra.mxu0 %v9963_v60  ;;  %v12981_v60 = vpack.c.bf16 %v3885_v58, %v3885_v58  ;;  %v10070_v58 = vld [vmem:[%s13775_s7 + $0x808] ss:$16 sps:$4 sm:$0xff]  }
 0x438   :  { %6902 = vmatpush1.bf16.msra.mxu1 %v9966_v13  ;;  %7063 = vmatprep.subr.bf16.mxu0 %v9971_v62  ;;  %v6630_v62 = vsel %vm733_vm2, %v8805_v54, 0  ;;  %v10075_v54 = vld [vmem:[%s13775_s7 + $0x3ec] ss:$16 sps:$4 sm:$0xff]  }
 0x439   :  { %6903 = vmatprep.subr.bf16.mxu1 %v9974_v63  ;;  %v10027_v63 = vld [vmem:[%s13775_s7 + $0x2ec] ss:$16 sps:$4 sm:$0xff]  }
 0x43b   :  { %7064 = vmatpush1.bf16.msra.mxu0 %v9969_v6 }
 0x43c   :  { %6904 = vmatpush2.bf16.msra.mxu1 %v9972_v5  ;;  %7065 = vmatprep.subr.bf16.mxu0 %v9977_v7 }
 0x43d   :  { %6905 = vmatprep.subr.bf16.mxu1 %v9980_v8  ;;  %v10030_v8 = vld [vmem:[%s13775_s7 + $0x8ec] ss:$16 sps:$4 sm:$0xff]  }
 0x43f   :  { %7066 = vmatpush1.bf16.msra.mxu0 %v9975_v25  ;;  %v3887_v25 = vmax.f32 %v3868_v0, 0.0  ;;  %v10084_v0 = vld [vmem:[%s13775_s7 + $0x9cc] ss:$16 sps:$4 sm:$0xff]  }
 0x440   :  { %6906 = vmatpush2.bf16.msra.mxu1 %v9978_v26  ;;  %7067 = vmatprep.subr.bf16.mxu0 %v9983_v56 }
 0x441   :  { %6907 = vmatprep.subr.bf16.mxu1 %v9986_v27  ;;  %v10028_v27 = vld [vmem:[%s13775_s7 + $0x8e8] ss:$16 sps:$4 sm:$0xff]  }
 0x443   :  { %7068 = vmatpush2.bf16.msra.mxu0 %v9981_v31 }
 0x444   :  { %6908 = vmatpush2.bf16.msra.mxu1 %v9984_v32  ;;  %7069 = vmatprep.subr.bf16.mxu0 %v9989_v12  ;;  %v10025_v32 = vld [vmem:[%s13775_s7 + $0x2e8] ss:$16 sps:$4 sm:$0xff]   ;;  %v13009_v12 = vpack.c.bf16 %v3887_v25, %v3887_v25 }
 0x445   :  { %6909 = vmatprep.subr.bf16.mxu1 %v9992_v22  ;;  %v10033_v22 = vld [vmem:[%s13775_s7 + $0x2cc] ss:$16 sps:$4 sm:$0xff]   ;;  %v10088_v25 = vld [vmem:[%s13775_s7 + $0x9a8] ss:$16 sps:$4 sm:$0xff]  }
 0x447   :  { %7070 = vmatpush2.bf16.msra.mxu0 %v9987_v34  ;;  %v10036_v34 = vld [vmem:[%s13775_s7 + $0x8cc] ss:$16 sps:$4 sm:$0xff]  }
 0x448   :  { %6910 = vmatpush2.bf16.msra.mxu1 %v9990_v3  ;;  %7071 = vmatprep.subr.bf16.mxu0 %v9995_v36  ;;  %v10034_v3 = vld [vmem:[%s13775_s7 + $0x8c8] ss:$16 sps:$4 sm:$0xff]  }
 0x449   :  { %6911 = vmatprep.subr.bf16.mxu1 %v9998_v39  ;;  %v10031_v36 = vld [vmem:[%s13775_s7 + $0x2c8] ss:$16 sps:$4 sm:$0xff]   ;;  %v10039_v39 = vld [vmem:[%s13775_s7 + $0x2ac] ss:$16 sps:$4 sm:$0xff]  }
 0x44b   :  { %7072 = vmatpush2.bf16.msra.mxu0 %v9993_v11  ;;  %v10037_v11 = vld [vmem:[%s13775_s7 + $0x2a8] ss:$16 sps:$4 sm:$0xff]  }
 0x44c   :  { %6912 = vmatpush2.bf16.msra.mxu1 %v9996_v23  ;;  %7073 = vmatprep.subr.bf16.mxu0 %v10001_v19  ;;  %v10045_v23 = vld [vmem:[%s13775_s7 + $0x28c] ss:$16 sps:$4 sm:$0xff]   ;;  %v10046_v19 = vld [vmem:[%s13775_s7 + $0x888] ss:$16 sps:$4 sm:$0xff]  }
 0x44d   :  { %6913 = vmatprep.subr.bf16.mxu1 %v10004_v42  ;;  %v10043_v42 = vld [vmem:[%s13775_s7 + $0x288] ss:$16 sps:$4 sm:$0xff]  }
 0x44f   :  { %7074 = vmatpush2.bf16.msra.mxu0 %v9999_v43  ;;  %v10054_v43 = vld [vmem:[%s13775_s7 + $0x86c] ss:$16 sps:$4 sm:$0xff]  }
 0x450   :  { %6914 = vmatpush2.bf16.msra.mxu1 %v10002_v44  ;;  %7075 = vmatprep.subr.bf16.mxu0 %v10007_v45  ;;  %v10051_v44 = vld [vmem:[%s13775_s7 + $0x26c] ss:$16 sps:$4 sm:$0xff]   ;;  %v10052_v45 = vld [vmem:[%s13775_s7 + $0x868] ss:$16 sps:$4 sm:$0xff]  }
 0x451   :  { %6915 = vmatprep.subr.bf16.mxu1 %v10010_v29  ;;  %v10049_v29 = vld [vmem:[%s13775_s7 + $0x268] ss:$16 sps:$4 sm:$0xff]  }
 0x453   :  { %7076 = vmatpush2.bf16.msra.mxu0 %v10005_v28  ;;  %v10060_v28 = vld [vmem:[%s13775_s7 + $0x84c] ss:$16 sps:$4 sm:$0xff]  }
 0x454   :  { %6916 = vmatpush2.bf16.msra.mxu1 %v10008_v38  ;;  %7077 = vmatprep.subr.bf16.mxu0 %v10013_v46  ;;  %v10057_v38 = vld [vmem:[%s13775_s7 + $0x24c] ss:$16 sps:$4 sm:$0xff]   ;;  %v10058_v46 = vld [vmem:[%s13775_s7 + $0x848] ss:$16 sps:$4 sm:$0xff]  }
 0x455   :  { %6917 = vmatprep.subr.bf16.mxu1 %v10016_v48  ;;  %v10063_v48 = vld [vmem:[%s13775_s7 + $0x22c] ss:$16 sps:$4 sm:$0xff]  }
 0x457   :  { %v12973_v4 = vpop.f32.mrf.mxu0  ;;  %7078 = vmatpush2.bf16.msra.mxu0 %v10011_v51  ;;  %v10061_v51 = vld [vmem:[%s13775_s7 + $0x228] ss:$16 sps:$4 sm:$0xff]  }
 0x458   :  { %6918 = vmatpush2.bf16.msra.mxu1 %v10014_v50  ;;  %7079 = vmatprep.subr.bf16.mxu0 %v10019_v40  ;;  %v10072_v50 = vld [vmem:[%s13775_s7 + $0x80c] ss:$16 sps:$4 sm:$0xff]  }
 0x459   :  { %v12984_v13 = vpop.f32.mrf.mxu0  ;;  %8809 = vmatprep.subr.msk.bf16.mxu1 %vm733_vm2, %v8806_v2  ;;  %v10069_v40 = vld [vmem:[%s13775_s7 + $0x20c] ss:$16 sps:$4 sm:$0xff]  }
 0x45a   :  { %v12991_v6 = vpop.f32.mrf.mxu1  ;;  %v10078_v2 = vld [vmem:[%s13775_s7 + $0x9ec] ss:$16 sps:$4 sm:$0xff]  }
 0x45b   :  { %v6802_v5 = vpop.f32.mrf.mxu0  ;;  %6920 = vmatmul.mubr.bf16.vlgmr.msra.gmra.mxu1 %v12981_v60  ;;  %7080 = vmatpush2.bf16.msra.mxu0 %v10017_v57  ;;  %v10076_v57 = vld [vmem:[%s13775_s7 + $0x9e8] ss:$16 sps:$4 sm:$0xff]  }
 0x45c   :  { %6943 = vmatpush1.bf16.msra.mxu1 %v6630_v62  ;;  %v12997_v7 = vpop.f32.mrf.mxu1  ;;  %7081 = vmatprep.subr.bf16.mxu0 %v10024_v10  ;;  %v10073_v10 = vld [vmem:[%s13775_s7 + $0x3e8] ss:$16 sps:$4 sm:$0xff]   ;;  %v10081_v62 = vld [vmem:[%s13775_s7 + $0x3cc] ss:$16 sps:$4 sm:$0xff]  }
 0x45d   :  { %v6803_v26 = vpop.f32.mrf.mxu0  ;;  %6960 = vmatprep.mubr.bf16.mxu1 %v10377_v55  ;;  %7010 = vmatprep.subr.bf16.mxu1 %v10027_v63  ;;  %v10082_v63 = vld [vmem:[%s13775_s7 + $0x9c8] ss:$16 sps:$4 sm:$0xff]  }
 0x45e   :  { %v6679_v56 = vpop.f32.mrf.mxu1  ;;  %v10079_v5 = vld [vmem:[%s13775_s7 + $0x3c8] ss:$16 sps:$4 sm:$0xff]  }
 0x45f   :  { %7082 = vmatpush2.bf16.msra.mxu0 %v10022_v14  ;;  %v10090_v14 = vld [vmem:[%s13775_s7 + $0x9ac] ss:$16 sps:$4 sm:$0xff]   ;;  %v10085_v26 = vld [vmem:[%s13775_s7 + $0x3a8] ss:$16 sps:$4 sm:$0xff]  }
 0x460   :  { %v6680_v31 = vpop.f32.mrf.mxu1  ;;  %7133 = vmatprep.subr.bf16.mxu0 %v10030_v8  ;;  %v10087_v8 = vld [vmem:[%s13775_s7 + $0x3ac] ss:$16 sps:$4 sm:$0xff]  }
 0x461   :  { %v10096_v56 = vld [vmem:[%s13775_s7 + $0x98c] ss:$16 sps:$4 sm:$0xff]   ;;  %v10094_v31 = vld [vmem:[%s13775_s7 + $0x988] ss:$16 sps:$4 sm:$0xff]  }
 0x462   :  { %7084 = vmatmul.mubr.bf16.vlgmr.msra.gmra.mxu0 %v12556_v15  ;;  %v10042_v15 = vld [vmem:[%s13775_s7 + $0x8ac] ss:$16 sps:$4 sm:$0xff]  }
 0x463   :  { %8810 = vmatmul.mubr.msk.bf16.vlgmr.msra.gmra.mxu1 %vm6625_vm5, %v13009_v12  ;;  %7134 = vmatpush1.bf16.msra.mxu0 %v10028_v27  ;;  %v10093_v27 = vld [vmem:[%s13775_s7 + $0x38c] ss:$16 sps:$4 sm:$0xff]  }
 0x464   :  { %7011 = vmatpush1.bf16.msra.mxu1 %v10025_v32  ;;  %7165 = vmatprep.mubr.bf16.mxu0 %v12561_v20  ;;  %v10040_v20 = vld [vmem:[%s13775_s7 + $0x8a8] ss:$16 sps:$4 sm:$0xff]  }
 0x465   :  { %7042 = vmatprep.mubr.bf16.mxu1 %v11892_v35  ;;  %7012 = vmatprep.subr.bf16.mxu1 %v10033_v22  ;;  %v10048_v35 = vld [vmem:[%s13775_s7 + $0x88c] ss:$16 sps:$4 sm:$0xff]   ;;  %v10091_v32 = vld [vmem:[%s13775_s7 + $0x388] ss:$16 sps:$4 sm:$0xff]  }
 0x466   :  { %7135 = vmatprep.subr.bf16.mxu0 %v10036_v34  ;;  %v10102_v22 = vld [vmem:[%s13775_s7 + $0x96c] ss:$16 sps:$4 sm:$0xff]  }
 0x467   :  { %7136 = vmatpush1.bf16.msra.mxu0 %v10034_v3  ;;  %v10099_v34 = vld [vmem:[%s13775_s7 + $0x36c] ss:$16 sps:$4 sm:$0xff]   ;;  %v13157_v3 = vld [vmem:[%s13776_s8] sm:$0xf] }
 0x468   :  { %7013 = vmatpush1.bf16.msra.mxu1 %v10031_v36  ;;  %7137 = vmatprep.subr.bf16.mxu0 %v10042_v15  ;;  %v10100_v36 = vld [vmem:[%s13775_s7 + $0x968] ss:$16 sps:$4 sm:$0xff]  }
 0x469   :  { %7014 = vmatprep.subr.bf16.mxu1 %v10039_v39  ;;  %v10097_v15 = vld [vmem:[%s13775_s7 + $0x368] ss:$16 sps:$4 sm:$0xff]   ;;  %v10108_v39 = vld [vmem:[%s13775_s7 + $0x94c] ss:$16 sps:$4 sm:$0xff]  }
 0x46b   :  { %7138 = vmatpush1.bf16.msra.mxu0 %v10040_v20  ;;  %v4358_v20 = vrot.slane %v13157_v3, %v10748_v52 }
 0x46c   :  { %7015 = vmatpush1.bf16.msra.mxu1 %v10037_v11  ;;  %7139 = vmatprep.subr.bf16.mxu0 %v10048_v35  ;;  %v10105_v11 = vld [vmem:[%s13775_s7 + $0x34c] ss:$16 sps:$4 sm:$0xff]   ;;  %v4362_v35 = vrot.slane %v13157_v3, %v10751_v53 }
 0x46d   :  { %7016 = vmatprep.subr.bf16.mxu1 %v10045_v23  ;;  %v10106_v23 = vld [vmem:[%s13775_s7 + $0x948] ss:$16 sps:$4 sm:$0xff]  }
 0x46f   :  { %7140 = vmatpush1.bf16.msra.mxu0 %v10046_v19  ;;  %v10103_v19 = vld [vmem:[%s13775_s7 + $0x348] ss:$16 sps:$4 sm:$0xff]  }
 0x470   :  { %7017 = vmatpush1.bf16.msra.mxu1 %v10043_v42  ;;  %7141 = vmatprep.subr.bf16.mxu0 %v10054_v43  ;;  %v10114_v42 = vld [vmem:[%s13775_s7 + $0x92c] ss:$16 sps:$4 sm:$0xff]   ;;  %v6676_v43 = vadd.f32 %v12991_v6, %v4358_v20 }
 0x471   :  { %7018 = vmatprep.subr.bf16.mxu1 %v10051_v44  ;;  %v10111_v44 = vld [vmem:[%s13775_s7 + $0x32c] ss:$16 sps:$4 sm:$0xff]  }
 0x472   :  { %v10120_v6 = vld [vmem:[%s13775_s7 + $0x90c] ss:$16 sps:$4 sm:$0xff]  }
 0x473   :  { %7142 = vmatpush1.bf16.msra.mxu0 %v10052_v45  ;;  %v6678_v45 = vadd.f32 %v12997_v7, %v4362_v35  ;;  %v10117_v7 = vld [vmem:[%s13775_s7 + $0x30c] ss:$16 sps:$4 sm:$0xff]   ;;  %v10160_v35 = vld [vmem:[%s13775_s7 + $0xc28] ss:$16 sps:$4 sm:$0xff]  }
 0x474   :  { %7019 = vmatpush1.bf16.msra.mxu1 %v10049_v29  ;;  %7143 = vmatprep.subr.bf16.mxu0 %v10060_v28  ;;  %v10112_v29 = vld [vmem:[%s13775_s7 + $0x928] ss:$16 sps:$4 sm:$0xff]   ;;  %v10162_v20 = vld [vmem:[%s13775_s7 + $0xc2c] ss:$16 sps:$4 sm:$0xff]  }
 0x475   :  { %7020 = vmatprep.subr.bf16.mxu1 %v10057_v38  ;;  %v10109_v28 = vld [vmem:[%s13775_s7 + $0x328] ss:$16 sps:$4 sm:$0xff]   ;;  %v6717_v38 = vadd.f32 %v12759_v9, %v6676_v43 }
 0x476   :  { %v10115_v9 = vld [vmem:[%s13775_s7 + $0x308] ss:$16 sps:$4 sm:$0xff]  }
 0x477   :  { %7144 = vmatpush1.bf16.msra.mxu0 %v10058_v46  ;;  %v10166_v43 = vld [vmem:[%s13775_s7 + $0xc08] ss:$16 sps:$4 sm:$0xff]  }
 0x478   :  { %7021 = vmatpush1.bf16.msra.mxu1 %v10055_v37  ;;  %7145 = vmatprep.subr.bf16.mxu0 %v10066_v47  ;;  %v6719_v47 = vadd.f32 %v12772_v1, %v6678_v45  ;;  %v10123_v1 = vld [vmem:[%s13775_s7 + $0x6ec] ss:$16 sps:$4 sm:$0xff]  }
 0x479   :  { %7022 = vmatprep.subr.bf16.mxu1 %v10063_v48  ;;  %v10118_v48 = vld [vmem:[%s13775_s7 + $0x908] ss:$16 sps:$4 sm:$0xff]   ;;  %v10174_v45 = vld [vmem:[%s13775_s7 + $0xdec] ss:$16 sps:$4 sm:$0xff]  }
 0x47b   :  { %7146 = vmatpush1.bf16.msra.mxu0 %v10064_v49 }
 0x47c   :  { %7023 = vmatpush1.bf16.msra.mxu1 %v10061_v51  ;;  %7147 = vmatprep.subr.bf16.mxu0 %v10072_v50  ;;  %v10126_v51 = vld [vmem:[%s13775_s7 + $0xcec] ss:$16 sps:$4 sm:$0xff]  }
 0x47d   :  { %7024 = vmatprep.subr.bf16.mxu1 %v10069_v40 }
 0x47f   :  { %7148 = vmatpush1.bf16.msra.mxu0 %v10070_v58  ;;  %v10124_v58 = vld [vmem:[%s13775_s7 + $0xce8] ss:$16 sps:$4 sm:$0xff]  }
 0x480   :  { %7025 = vmatpush1.bf16.msra.mxu1 %v10067_v21  ;;  %7149 = vmatprep.subr.bf16.mxu0 %v10078_v2  ;;  %v10121_v2 = vld [vmem:[%s13775_s7 + $0x6e8] ss:$16 sps:$4 sm:$0xff]  }
 0x481   :  { %7026 = vmatprep.subr.bf16.mxu1 %v10075_v54  ;;  %v10129_v54 = vld [vmem:[%s13775_s7 + $0x6cc] ss:$16 sps:$4 sm:$0xff]  }
 0x483   :  { %7150 = vmatpush2.bf16.msra.mxu0 %v10076_v57 }
 0x484   :  { %7027 = vmatpush2.bf16.msra.mxu1 %v10073_v10  ;;  %7151 = vmatprep.subr.bf16.mxu0 %v10084_v0  ;;  %v10132_v10 = vld [vmem:[%s13775_s7 + $0xccc] ss:$16 sps:$4 sm:$0xff]   ;;  %v10130_v0 = vld [vmem:[%s13775_s7 + $0xcc8] ss:$16 sps:$4 sm:$0xff]  }
 0x485   :  { %7028 = vmatprep.subr.bf16.mxu1 %v10081_v62 }
 0x487   :  { %7152 = vmatpush2.bf16.msra.mxu0 %v10082_v63  ;;  %v10138_v63 = vld [vmem:[%s13775_s7 + $0xcac] ss:$16 sps:$4 sm:$0xff]  }
 0x488   :  { %7029 = vmatpush2.bf16.msra.mxu1 %v10079_v5  ;;  %7153 = vmatprep.subr.bf16.mxu0 %v10090_v14 }
 0x489   :  { %7030 = vmatprep.subr.bf16.mxu1 %v10087_v8  ;;  %v10133_v8 = vld [vmem:[%s13775_s7 + $0x6a8] ss:$16 sps:$4 sm:$0xff]  }
 0x48b   :  { %7154 = vmatpush2.bf16.msra.mxu0 %v10088_v25  ;;  %v10141_v25 = vld [vmem:[%s13775_s7 + $0x68c] ss:$16 sps:$4 sm:$0xff]  }
 0x48c   :  { %7031 = vmatpush2.bf16.msra.mxu1 %v10085_v26  ;;  %7155 = vmatprep.subr.bf16.mxu0 %v10096_v56  ;;  %v10142_v26 = vld [vmem:[%s13775_s7 + $0xc88] ss:$16 sps:$4 sm:$0xff]  }
 0x48d   :  { %7032 = vmatprep.subr.bf16.mxu1 %v10093_v27  ;;  %v10139_v56 = vld [vmem:[%s13775_s7 + $0x688] ss:$16 sps:$4 sm:$0xff]   ;;  %v10150_v27 = vld [vmem:[%s13775_s7 + $0xc6c] ss:$16 sps:$4 sm:$0xff]  }
 0x48f   :  { %7156 = vmatpush2.bf16.msra.mxu0 %v10094_v31  ;;  %v10147_v31 = vld [vmem:[%s13775_s7 + $0x66c] ss:$16 sps:$4 sm:$0xff]  }
 0x490   :  { %7033 = vmatpush2.bf16.msra.mxu1 %v10091_v32  ;;  %7157 = vmatprep.subr.bf16.mxu0 %v10102_v22  ;;  %v10148_v32 = vld [vmem:[%s13775_s7 + $0xc68] ss:$16 sps:$4 sm:$0xff]  }
 0x491   :  { %7034 = vmatprep.subr.bf16.mxu1 %v10099_v34  ;;  %v10145_v22 = vld [vmem:[%s13775_s7 + $0x668] ss:$16 sps:$4 sm:$0xff]   ;;  %v10156_v34 = vld [vmem:[%s13775_s7 + $0xc4c] ss:$16 sps:$4 sm:$0xff]  }
 0x493   :  { %7158 = vmatpush2.bf16.msra.mxu0 %v10100_v36  ;;  %v10153_v36 = vld [vmem:[%s13775_s7 + $0x64c] ss:$16 sps:$4 sm:$0xff]  }
 0x494   :  { %7035 = vmatpush2.bf16.msra.mxu1 %v10097_v15  ;;  %7159 = vmatprep.subr.bf16.mxu0 %v10108_v39  ;;  %v10154_v15 = vld [vmem:[%s13775_s7 + $0xc48] ss:$16 sps:$4 sm:$0xff]  }
 0x495   :  { %7036 = vmatprep.subr.bf16.mxu1 %v10105_v11  ;;  %v10151_v39 = vld [vmem:[%s13775_s7 + $0x648] ss:$16 sps:$4 sm:$0xff]   ;;  %v10159_v11 = vld [vmem:[%s13775_s7 + $0x62c] ss:$16 sps:$4 sm:$0xff]  }
 0x497   :  { %7160 = vmatpush2.bf16.msra.mxu0 %v10106_v23  ;;  %v10157_v23 = vld [vmem:[%s13775_s7 + $0x628] ss:$16 sps:$4 sm:$0xff]  }
 0x498   :  { %7037 = vmatpush2.bf16.msra.mxu1 %v10103_v19  ;;  %7161 = vmatprep.subr.bf16.mxu0 %v10114_v42  ;;  %v10168_v19 = vld [vmem:[%s13775_s7 + $0xc0c] ss:$16 sps:$4 sm:$0xff]  }
 0x499   :  { %7038 = vmatprep.subr.bf16.mxu1 %v10111_v44  ;;  %v10165_v42 = vld [vmem:[%s13775_s7 + $0x60c] ss:$16 sps:$4 sm:$0xff]   ;;  %v10163_v44 = vld [vmem:[%s13775_s7 + $0x608] ss:$16 sps:$4 sm:$0xff]  }
 0x49a   :  { %v6757_v46 = vpop.f32.mrf.mxu1 }
 0x49b   :  { %v13202_v37 = vadd.f32 %v6757_v46, %v6717_v38  ;;  %7162 = vmatpush2.bf16.msra.mxu0 %v10112_v29  ;;  %v10171_v29 = vld [vmem:[%s13775_s7 + $0x7ec] ss:$16 sps:$4 sm:$0xff]   ;;  %v10178_v46 = vld [vmem:[%s13775_s7 + $0xdc8] ss:$16 sps:$4 sm:$0xff]  }
 0x49c   :  { %7039 = vmatpush2.bf16.msra.mxu1 %v10109_v28  ;;  %v6759_v49 = vpop.f32.mrf.mxu1  ;;  %7163 = vmatprep.subr.bf16.mxu0 %v10120_v6  ;;  %v10172_v28 = vld [vmem:[%s13775_s7 + $0xde8] ss:$16 sps:$4 sm:$0xff]   ;;  %v10180_v38 = vld [vmem:[%s13775_s7 + $0xdcc] ss:$16 sps:$4 sm:$0xff]  }
 0x49d   :  { %v13214_v50 = vadd.f32 %v6759_v49, %v6719_v47  ;;  %7040 = vmatprep.subr.bf16.mxu1 %v10117_v7  ;;  %v10169_v6 = vld [vmem:[%s13775_s7 + $0x7e8] ss:$16 sps:$4 sm:$0xff]   ;;  %v10177_v7 = vld [vmem:[%s13775_s7 + $0x7cc] ss:$16 sps:$4 sm:$0xff]  }
 0x49e   :  { %v6761_v40 = vpop.f32.mrf.mxu1  ;;  %v10175_v47 = vld [vmem:[%s13775_s7 + $0x7c8] ss:$16 sps:$4 sm:$0xff]   ;;  %v10183_v49 = vld [vmem:[%s13775_s7 + $0x7ac] ss:$16 sps:$4 sm:$0xff]  }
 0x49f   :  { %7164 = vmatpush2.bf16.msra.mxu0 %v10118_v48  ;;  %v10186_v48 = vld [vmem:[%s13775_s7 + $0xdac] ss:$16 sps:$4 sm:$0xff]  }
 0x4a0   :  { %7041 = vmatpush2.bf16.msra.mxu1 %v10115_v9  ;;  %v6762_v21 = vpop.f32.mrf.mxu1  ;;  %7215 = vmatprep.subr.bf16.mxu0 %v10126_v51  ;;  %v10184_v9 = vld [vmem:[%s13775_s7 + $0xda8] ss:$16 sps:$4 sm:$0xff]   ;;  %v10189_v40 = vld [vmem:[%s13775_s7 + $0x78c] ss:$16 sps:$4 sm:$0xff]  }
 0x4a1   :  { %7092 = vmatprep.subr.bf16.mxu1 %v10123_v1  ;;  %v10181_v51 = vld [vmem:[%s13775_s7 + $0x7a8] ss:$16 sps:$4 sm:$0xff]   ;;  %v10192_v1 = vld [vmem:[%s13775_s7 + $0xd8c] ss:$16 sps:$4 sm:$0xff]  }
 0x4a2   :  { %7166 = vmatmul.mubr.bf16.vlgmr.msra.gmra.mxu0 %v12767_v16  ;;  %v13229_v57 = vpop.f32.mrf.mxu0  ;;  %v10127_v16 = vld [vmem:[%s13775_s7 + $0x6c8] ss:$16 sps:$4 sm:$0xff]  }
 0x4a3   :  { %7043 = vmatmul.mubr.bf16.vlgmr.msra.gmra.mxu1 %v12112_v24  ;;  %7216 = vmatpush1.bf16.msra.mxu0 %v10124_v58  ;;  %v10135_v24 = vld [vmem:[%s13775_s7 + $0x6ac] ss:$16 sps:$4 sm:$0xff]   ;;  %v10190_v58 = vld [vmem:[%s13775_s7 + $0xd88] ss:$16 sps:$4 sm:$0xff]  }
 0x4a4   :  { %7093 = vmatpush1.bf16.msra.mxu1 %v10121_v2  ;;  %7124 = vmatprep.mubr.bf16.mxu1 %v12237_v30  ;;  %v13239_v62 = vpop.f32.mrf.mxu0  ;;  %v10136_v30 = vld [vmem:[%s13775_s7 + $0xca8] ss:$16 sps:$4 sm:$0xff]   ;;  %v10198_v2 = vld [vmem:[%s13775_s7 + $0xd6c] ss:$16 sps:$4 sm:$0xff]  }
 0x4a5   :  { %7247 = vmatprep.mubr.bf16.mxu0 %v12777_v33  ;;  %7094 = vmatprep.subr.bf16.mxu1 %v10129_v54  ;;  %v10144_v33 = vld [vmem:[%s13775_s7 + $0xc8c] ss:$16 sps:$4 sm:$0xff]   ;;  %v10187_v21 = vld [vmem:[%s13775_s7 + $0x788] ss:$16 sps:$4 sm:$0xff]  }
 0x4a6   :  { %7217 = vmatprep.subr.bf16.mxu0 %v10132_v10  ;;  %v6884_v5 = vpop.f32.mrf.mxu0  ;;  %v10195_v54 = vld [vmem:[%s13775_s7 + $0x76c] ss:$16 sps:$4 sm:$0xff]   ;;  %v10196_v10 = vld [vmem:[%s13775_s7 + $0xd68] ss:$16 sps:$4 sm:$0xff]  }
 0x4a7   :  { %7218 = vmatpush1.bf16.msra.mxu0 %v10130_v0  ;;  %v10193_v0 = vld [vmem:[%s13775_s7 + $0x768] ss:$16 sps:$4 sm:$0xff]  }
 0x4a8   :  { %7095 = vmatpush1.bf16.msra.mxu1 %v10127_v16  ;;  %v6885_v14 = vpop.f32.mrf.mxu0  ;;  %7219 = vmatprep.subr.bf16.mxu0 %v10138_v63  ;;  %v10204_v16 = vld [vmem:[%s13775_s7 + $0xd4c] ss:$16 sps:$4 sm:$0xff]   ;;  %v10199_v5 = vld [vmem:[%s13775_s7 + $0x748] ss:$16 sps:$4 sm:$0xff]  }
 0x4a9   :  { %7096 = vmatprep.subr.bf16.mxu1 %v10135_v24  ;;  %v10201_v63 = vld [vmem:[%s13775_s7 + $0x74c] ss:$16 sps:$4 sm:$0xff]   ;;  %v10202_v24 = vld [vmem:[%s13775_s7 + $0xd48] ss:$16 sps:$4 sm:$0xff]  }
 0x4aa   :  { %v10207_v14 = vld [vmem:[%s13775_s7 + $0x72c] ss:$16 sps:$4 sm:$0xff]  }
 0x4ab   :  { %7220 = vmatpush1.bf16.msra.mxu0 %v10136_v30  ;;  %v10210_v30 = vld [vmem:[%s13775_s7 + $0xd2c] ss:$16 sps:$4 sm:$0xff]  }
 0x4ac   :  { %7097 = vmatpush1.bf16.msra.mxu1 %v10133_v8  ;;  %7221 = vmatprep.subr.bf16.mxu0 %v10144_v33  ;;  %v10208_v8 = vld [vmem:[%s13775_s7 + $0xd28] ss:$16 sps:$4 sm:$0xff]  }
 0x4ad   :  { %7098 = vmatprep.subr.bf16.mxu1 %v10141_v25  ;;  %v10205_v33 = vld [vmem:[%s13775_s7 + $0x728] ss:$16 sps:$4 sm:$0xff]   ;;  %v10216_v25 = vld [vmem:[%s13775_s7 + $0xd0c] ss:$16 sps:$4 sm:$0xff]  }
 0x4af   :  { %7222 = vmatpush1.bf16.msra.mxu0 %v10142_v26  ;;  %v6799_v26 = vadd.f32 %v12973_v4, %v13202_v37  ;;  %v10211_v4 = vld [vmem:[%s13775_s7 + $0x708] ss:$16 sps:$4 sm:$0xff]  }
 0x4b0   :  { %7099 = vmatpush1.bf16.msra.mxu1 %v10139_v56  ;;  %7223 = vmatprep.subr.bf16.mxu0 %v10150_v27  ;;  %v10213_v56 = vld [vmem:[%s13775_s7 + $0x70c] ss:$16 sps:$4 sm:$0xff]  }
 0x4b1   :  { %7100 = vmatprep.subr.bf16.mxu1 %v10147_v31 }
 0x4b3   :  { %7224 = vmatpush1.bf16.msra.mxu0 %v10148_v32  ;;  %v6801_v32 = vadd.f32 %v12984_v13, %v13214_v50 }
 0x4b4   :  { %7101 = vmatpush1.bf16.msra.mxu1 %v10145_v22  ;;  %7225 = vmatprep.subr.bf16.mxu0 %v10156_v34  ;;  %v10214_v22 = vld [vmem:[%s13775_s7 + $0xd08] ss:$16 sps:$4 sm:$0xff]  }
 0x4b5   :  { %7102 = vmatprep.subr.bf16.mxu1 %v10153_v36  ;;  %v10219_v36 = vld [vmem:[%s13775_s7 + $0xaec] ss:$16 sps:$4 sm:$0xff]  }
 0x4b7   :  { %7226 = vmatpush1.bf16.msra.mxu0 %v10154_v15 }
 0x4b8   :  { %7103 = vmatpush1.bf16.msra.mxu1 %v10151_v39  ;;  %7227 = vmatprep.subr.bf16.mxu0 %v10162_v20  ;;  %v10217_v20 = vld [vmem:[%s13775_s7 + $0xae8] ss:$16 sps:$4 sm:$0xff]  }
 0x4b9   :  { %7104 = vmatprep.subr.bf16.mxu1 %v10159_v11  ;;  %v10222_v11 = vld [vmem:[%s13775_s7 + $0xacc] ss:$16 sps:$4 sm:$0xff]  }
 0x4bb   :  { %7228 = vmatpush1.bf16.msra.mxu0 %v10160_v35 }
 0x4bc   :  { %7105 = vmatpush1.bf16.msra.mxu1 %v10157_v23  ;;  %7229 = vmatprep.subr.bf16.mxu0 %v10168_v19  ;;  %v10225_v23 = vld [vmem:[%s13775_s7 + $0xaac] ss:$16 sps:$4 sm:$0xff]  }
 0x4bd   :  { %7106 = vmatprep.subr.bf16.mxu1 %v10165_v42 }
 0x4bf   :  { %7230 = vmatpush1.bf16.msra.mxu0 %v10166_v43  ;;  %v10231_v43 = vld [vmem:[%s13775_s7 + $0xa6c] ss:$16 sps:$4 sm:$0xff]  }
 0x4c0   :  { %7107 = vmatpush1.bf16.msra.mxu1 %v10163_v44  ;;  %7231 = vmatprep.subr.bf16.mxu0 %v10174_v45  ;;  %v10229_v44 = vld [vmem:[%s13775_s7 + $0xa68] ss:$16 sps:$4 sm:$0xff]   ;;  %v10234_v45 = vld [vmem:[%s13775_s7 + $0xa4c] ss:$16 sps:$4 sm:$0xff]  }
 0x4c1   :  { %7108 = vmatprep.subr.bf16.mxu1 %v10171_v29  ;;  %v10232_v29 = vld [vmem:[%s13775_s7 + $0xa48] ss:$16 sps:$4 sm:$0xff]  }
 0x4c3   :  { %7232 = vmatpush2.bf16.msra.mxu0 %v10172_v28  ;;  %v10237_v28 = vld [vmem:[%s13775_s7 + $0xa2c] ss:$16 sps:$4 sm:$0xff]  }
 0x4c4   :  { %7109 = vmatpush2.bf16.msra.mxu1 %v10169_v6  ;;  %7233 = vmatprep.subr.bf16.mxu0 %v10180_v38  ;;  %v10235_v6 = vld [vmem:[%s13775_s7 + $0xa28] ss:$16 sps:$4 sm:$0xff]   ;;  %v10240_v38 = vld [vmem:[%s13775_s7 + $0xa0c] ss:$16 sps:$4 sm:$0xff]  }
 0x4c5   :  { %7110 = vmatprep.subr.bf16.mxu1 %v10177_v7  ;;  %v10238_v7 = vld [vmem:[%s13775_s7 + $0xa08] ss:$16 sps:$4 sm:$0xff]  }
 0x4c7   :  { %7234 = vmatpush2.bf16.msra.mxu0 %v10178_v46  ;;  %v10243_v46 = vld [vmem:[%s13775_s7 + $0xbec] ss:$16 sps:$4 sm:$0xff]  }
 0x4c8   :  { %7111 = vmatpush2.bf16.msra.mxu1 %v10175_v47  ;;  %7235 = vmatprep.subr.bf16.mxu0 %v10186_v48  ;;  %v10241_v47 = vld [vmem:[%s13775_s7 + $0xbe8] ss:$16 sps:$4 sm:$0xff]   ;;  %v10246_v48 = vld [vmem:[%s13775_s7 + $0xbcc] ss:$16 sps:$4 sm:$0xff]  }
 0x4c9   :  { %7112 = vmatprep.subr.bf16.mxu1 %v10183_v49  ;;  %v10244_v49 = vld [vmem:[%s13775_s7 + $0xbc8] ss:$16 sps:$4 sm:$0xff]  }
 0x4cb   :  { %7236 = vmatpush2.bf16.msra.mxu0 %v10184_v9  ;;  %v10249_v9 = vld [vmem:[%s13775_s7 + $0xbac] ss:$16 sps:$4 sm:$0xff]  }
 0x4cc   :  { %7113 = vmatpush2.bf16.msra.mxu1 %v10181_v51  ;;  %7237 = vmatprep.subr.bf16.mxu0 %v10192_v1  ;;  %v10247_v51 = vld [vmem:[%s13775_s7 + $0xba8] ss:$16 sps:$4 sm:$0xff]   ;;  %v10252_v1 = vld [vmem:[%s13775_s7 + $0xb8c] ss:$16 sps:$4 sm:$0xff]  }
 0x4cd   :  { %7114 = vmatprep.subr.bf16.mxu1 %v10189_v40  ;;  %v10250_v40 = vld [vmem:[%s13775_s7 + $0xb88] ss:$16 sps:$4 sm:$0xff]  }
 0x4cf   :  { %7238 = vmatpush2.bf16.msra.mxu0 %v10190_v58  ;;  %v10255_v58 = vld [vmem:[%s13775_s7 + $0xb6c] ss:$16 sps:$4 sm:$0xff]  }
 0x4d0   :  { %7115 = vmatpush2.bf16.msra.mxu1 %v10187_v21  ;;  %7239 = vmatprep.subr.bf16.mxu0 %v10198_v2  ;;  %v10253_v21 = vld [vmem:[%s13775_s7 + $0xb68] ss:$16 sps:$4 sm:$0xff]   ;;  %v10258_v2 = vld [vmem:[%s13775_s7 + $0xb4c] ss:$16 sps:$4 sm:$0xff]  }
 0x4d1   :  { %7116 = vmatprep.subr.bf16.mxu1 %v10195_v54  ;;  %v10256_v54 = vld [vmem:[%s13775_s7 + $0xb48] ss:$16 sps:$4 sm:$0xff]  }
 0x4d3   :  { %7240 = vmatpush2.bf16.msra.mxu0 %v10196_v10  ;;  %v10261_v10 = vld [vmem:[%s13775_s7 + $0xb2c] ss:$16 sps:$4 sm:$0xff]  }
 0x4d4   :  { %7117 = vmatpush2.bf16.msra.mxu1 %v10193_v0  ;;  %7241 = vmatprep.subr.bf16.mxu0 %v10204_v16  ;;  %v10259_v0 = vld [vmem:[%s13775_s7 + $0xb28] ss:$16 sps:$4 sm:$0xff]   ;;  %v10264_v16 = vld [vmem:[%s13775_s7 + $0xb0c] ss:$16 sps:$4 sm:$0xff]  }
 0x4d5   :  { %7118 = vmatprep.subr.bf16.mxu1 %v10201_v63  ;;  %v4352_v63 = vld [vmem:[%s13775_s7 + $0xe08] sm:$0xff] }
 0x4d7   :  { %7242 = vmatpush2.bf16.msra.mxu0 %v10202_v24 }
 0x4d8   :  { %7119 = vmatpush2.bf16.msra.mxu1 %v10199_v5  ;;  %7243 = vmatprep.subr.bf16.mxu0 %v10210_v30  ;;  %v10262_v30 = vld [vmem:[%s13775_s7 + $0xb08] ss:$16 sps:$4 sm:$0xff]  }
 0x4d9   :  { %7120 = vmatprep.subr.bf16.mxu1 %v10207_v14 }
 0x4da   :  { %v6839_v27 = vpop.f32.mrf.mxu1 }
 0x4db   :  { %v6840_v31 = vadd.f32 %v6839_v27, %v6799_v26  ;;  %7244 = vmatpush2.bf16.msra.mxu0 %v10208_v8  ;;  %v8808_v8 = vcombine.high %v4352_v63, %v4352_v63  ;;  %v10269_v27 = vld [vmem:[%s13777_s9 + $0x74] ss:$8 sps:$4 sm:$0xff]  }
 0x4dc   :  { %7121 = vmatpush2.bf16.msra.mxu1 %v10205_v33  ;;  %v6841_v34 = vpop.f32.mrf.mxu1  ;;  %7245 = vmatprep.subr.bf16.mxu0 %v10216_v25  ;;  %v8807_v33 = vcombine.low %v4352_v63, %v4352_v63  ;;  %v10300_v63 = vld [vmem:[%s13777_s9 + $0xc0] ss:$8 sps:$4 sm:$0xff]  }
 0x4dd   :  { %v6842_v37 = vadd.f32 %v6841_v34, %v6801_v32  ;;  %7122 = vmatprep.subr.bf16.mxu1 %v10213_v56  ;;  %v13421_v15 = vadd.f32 %v13229_v57, %v6840_v31 }
 0x4de   :  { %v6843_v13 = vpop.f32.mrf.mxu1  ;;  %v6636_v56 = vsel %vm733_vm2, %v8807_v33, 0  ;;  %v4366_v33 = vrot.slane %v13157_v3, %v10908_v59 }
 0x4df   :  { %7246 = vmatpush2.bf16.msra.mxu0 %v10214_v22  ;;  %v13424_v50 = vadd.f32 %v13239_v62, %v6842_v37  ;;  %v10220_v62 = vld [vmem:[%s13775_s7 + $0xac8] ss:$16 sps:$4 sm:$0xff]  }
 0x4e0   :  { %7123 = vmatpush2.bf16.msra.mxu1 %v10211_v4  ;;  %v6844_v39 = vpop.f32.mrf.mxu1 }
 0x4e1   :  { %7174 = vmatprep.subr.bf16.mxu1 %v10219_v36 }
 0x4e2   :  { %v13432_v35 = vpop.f32.mrf.mxu0  ;;  %7248 = vmatmul.mubr.bf16.vlgmr.msra.gmra.mxu0 %v12981_v60  ;;  %v10226_v60 = vld [vmem:[%s13775_s7 + $0xa88] ss:$16 sps:$4 sm:$0xff]  }
 0x4e3   :  { %7125 = vmatmul.mubr.bf16.vlgmr.msra.gmra.mxu1 %v12336_v17  ;;  %v10223_v17 = vld [vmem:[%s13775_s7 + $0xaa8] ss:$16 sps:$4 sm:$0xff]  }
 0x4e4   :  { %7175 = vmatpush1.bf16.msra.mxu1 %v10217_v20  ;;  %7206 = vmatprep.mubr.bf16.mxu1 %v12573_v41  ;;  %v13437_v57 = vpop.f32.mrf.mxu0  ;;  %v10228_v41 = vld [vmem:[%s13775_s7 + $0xa8c] ss:$16 sps:$4 sm:$0xff]  }
 0x4e5   :  { %7176 = vmatprep.subr.bf16.mxu1 %v10222_v11 }
 0x4e6   :  { %v7007_v19 = vpop.f32.mrf.mxu0 }
 0x4e8   :  { %7177 = vmatpush1.bf16.msra.mxu1 %v10220_v62  ;;  %v7008_v42 = vpop.f32.mrf.mxu0  ;;  %v10315_v62 = vld [vmem:[%s13777_s9 + $0x170] ss:$8 sps:$4 sm:$0xff]  }
 0x4e9   :  { %7178 = vmatprep.subr.bf16.mxu1 %v10225_v23  ;;  %v10317_v23 = vld [vmem:[%s13777_s9 + $0x174] ss:$8 sps:$4 sm:$0xff]   ;;  %v10320_v42 = vld [vmem:[%s13777_s9 + $0x164] ss:$8 sps:$4 sm:$0xff]  }
 0x4ea   :  { %7661 = vmatprep.subr.bf16.mxu0 %v10317_v23  ;;  %v10338_v23 = vld [vmem:[%s13777_s9 + $0x104] ss:$8 sps:$4 sm:$0xff]  }
 0x4eb   :  { %7662 = vmatpush1.bf16.msra.mxu0 %v10315_v62 }
 0x4ec   :  { %7179 = vmatpush1.bf16.msra.mxu1 %v10223_v17  ;;  %v10270_v17 = vld [vmem:[%s13777_s9 + $0x60] ss:$8 sps:$4 sm:$0xff]   ;;  %7663 = vmatprep.subr.bf16.mxu0 %v10320_v42  ;;  %v10341_v42 = vld [vmem:[%s13777_s9 + $0x184] ss:$8 sps:$4 sm:$0xff]  }
 0x4ed   :  { %7180 = vmatprep.subr.bf16.mxu1 %v10228_v41  ;;  %v10275_v41 = vld [vmem:[%s13777_s9 + $0x54] ss:$8 sps:$4 sm:$0xff]  }
 0x4f0   :  { %7181 = vmatpush1.bf16.msra.mxu1 %v10226_v60  ;;  %v10318_v60 = vld [vmem:[%s13777_s9 + $0x160] ss:$8 sps:$4 sm:$0xff]  }
 0x4f1   :  { %7182 = vmatprep.subr.bf16.mxu1 %v10231_v43  ;;  %v10273_v43 = vld [vmem:[%s13777_s9 + $0x50] ss:$8 sps:$4 sm:$0xff]   ;;  %7664 = vmatpush1.bf16.msra.mxu0 %v10318_v60 }
 0x4f4   :  { %7183 = vmatpush1.bf16.msra.mxu1 %v10229_v44  ;;  %v10278_v44 = vld [vmem:[%s13777_s9 + $0x44] ss:$8 sps:$4 sm:$0xff]  }
 0x4f5   :  { %7184 = vmatprep.subr.bf16.mxu1 %v10234_v45  ;;  %v10321_v45 = vld [vmem:[%s13777_s9 + $0x150] ss:$8 sps:$4 sm:$0xff]  }
 0x4f8   :  { %7185 = vmatpush1.bf16.msra.mxu1 %v10232_v29  ;;  %v10326_v29 = vld [vmem:[%s13777_s9 + $0x144] ss:$8 sps:$4 sm:$0xff]  }
 0x4f9   :  { %7186 = vmatprep.subr.bf16.mxu1 %v10237_v28  ;;  %v10276_v28 = vld [vmem:[%s13777_s9 + $0x40] ss:$8 sps:$4 sm:$0xff]  }
 0x4fc   :  { %7187 = vmatpush1.bf16.msra.mxu1 %v10235_v6  ;;  %v10281_v6 = vld [vmem:[%s13777_s9 + $0x34] ss:$8 sps:$4 sm:$0xff]  }
 0x4fd   :  { %7188 = vmatprep.subr.bf16.mxu1 %v10240_v38  ;;  %v10324_v38 = vld [vmem:[%s13777_s9 + $0x140] ss:$8 sps:$4 sm:$0xff]  }
 0x500   :  { %7189 = vmatpush1.bf16.msra.mxu1 %v10238_v7  ;;  %v10329_v7 = vld [vmem:[%s13777_s9 + $0x134] ss:$8 sps:$4 sm:$0xff]  }
 0x501   :  { %7190 = vmatprep.subr.bf16.mxu1 %v10243_v46  ;;  %v10279_v46 = vld [vmem:[%s13777_s9 + $0x30] ss:$8 sps:$4 sm:$0xff]  }
 0x504   :  { %7191 = vmatpush2.bf16.msra.mxu1 %v10241_v47  ;;  %v10284_v47 = vld [vmem:[%s13777_s9 + $0x24] ss:$8 sps:$4 sm:$0xff]  }
 0x505   :  { %7192 = vmatprep.subr.bf16.mxu1 %v10246_v48  ;;  %v10327_v48 = vld [vmem:[%s13777_s9 + $0x130] ss:$8 sps:$4 sm:$0xff]  }
 0x508   :  { %7193 = vmatpush2.bf16.msra.mxu1 %v10244_v49  ;;  %v10282_v49 = vld [vmem:[%s13777_s9 + $0x20] ss:$8 sps:$4 sm:$0xff]  }
 0x509   :  { %7194 = vmatprep.subr.bf16.mxu1 %v10249_v9  ;;  %v10287_v9 = vld [vmem:[%s13777_s9 + $0x14] ss:$8 sps:$4 sm:$0xff]  }
 0x50c   :  { %7195 = vmatpush2.bf16.msra.mxu1 %v10247_v51  ;;  %v10285_v51 = vld [vmem:[%s13777_s9 + $0x10] ss:$8 sps:$4 sm:$0xff]  }
 0x50d   :  { %7196 = vmatprep.subr.bf16.mxu1 %v10252_v1  ;;  %v10290_v1 = vld [vmem:[%s13777_s9 + $0x4] ss:$8 sps:$4 sm:$0xff]  }
 0x510   :  { %7197 = vmatpush2.bf16.msra.mxu1 %v10250_v40  ;;  %v10288_v40 = vld [vmem:[%s13777_s9] ss:$8 sps:$4 sm:$0xff]  }
 0x511   :  { %7198 = vmatprep.subr.bf16.mxu1 %v10255_v58  ;;  %v10293_v58 = vld [vmem:[%s13777_s9 + $0xf4] ss:$8 sps:$4 sm:$0xff]  }
 0x514   :  { %7199 = vmatpush2.bf16.msra.mxu1 %v10253_v21  ;;  %v10291_v21 = vld [vmem:[%s13777_s9 + $0xf0] ss:$8 sps:$4 sm:$0xff]  }
 0x515   :  { %7200 = vmatprep.subr.bf16.mxu1 %v10258_v2  ;;  %v10296_v2 = vld [vmem:[%s13777_s9 + $0xe4] ss:$8 sps:$4 sm:$0xff]  }
 0x518   :  { %7201 = vmatpush2.bf16.msra.mxu1 %v10256_v54  ;;  %v10294_v54 = vld [vmem:[%s13777_s9 + $0xe0] ss:$8 sps:$4 sm:$0xff]  }
 0x519   :  { %7202 = vmatprep.subr.bf16.mxu1 %v10261_v10  ;;  %v10299_v10 = vld [vmem:[%s13777_s9 + $0xd4] ss:$8 sps:$4 sm:$0xff]  }
 0x51b   :  { %v6921_v24 = vpop.f32.mrf.mxu1 }
 0x51c   :  { %v6922_v5 = vadd.f32 %v6921_v24, %v13421_v15  ;;  %7203 = vmatpush2.bf16.msra.mxu1 %v10259_v0  ;;  %v10297_v0 = vld [vmem:[%s13777_s9 + $0xd0] ss:$8 sps:$4 sm:$0xff]   ;;  %v10305_v24 = vld [vmem:[%s13777_s9 + $0xb4] ss:$8 sps:$4 sm:$0xff]  }
 0x51d   :  { %v6923_v14 = vpop.f32.mrf.mxu1  ;;  %7204 = vmatprep.subr.bf16.mxu1 %v10264_v16  ;;  %v10302_v16 = vld [vmem:[%s13777_s9 + $0xc4] ss:$8 sps:$4 sm:$0xff]  }
 0x51e   :  { %v6924_v22 = vadd.f32 %v6923_v14, %v13424_v50  ;;  %v10272_v50 = vld [vmem:[%s13777_s9 + $0x64] ss:$8 sps:$4 sm:$0xff]   ;;  %v10306_v14 = vld [vmem:[%s13777_s9 + $0xa0] ss:$8 sps:$4 sm:$0xff]  }
 0x51f   :  { %v6925_v25 = vpop.f32.mrf.mxu1 }
 0x520   :  { %7205 = vmatpush2.bf16.msra.mxu1 %v10262_v30  ;;  %v10308_v30 = vld [vmem:[%s13777_s9 + $0xa4] ss:$8 sps:$4 sm:$0xff]   ;;  %v4370_v25 = vrot.slane %v13157_v3, %v10914_v61  ;;  %v10312_v61 = vld [vmem:[%s13777_s9 + $0x80] ss:$8 sps:$4 sm:$0xff]  }
 0x521   :  { %v6926_v26 = vpop.f32.mrf.mxu1  ;;  %8811 = vmatprep.subr.msk.bf16.mxu1 %vm733_vm2, %v8808_v8  ;;  %v10311_v8 = vld [vmem:[%s13777_s9 + $0x94] ss:$8 sps:$4 sm:$0xff]   ;;  %v10332_v3 = vld [vmem:[%s13777_s9 + $0x124] ss:$8 sps:$4 sm:$0xff]  }
 0x522   :  { %v13535_v31 = vpop.f32.mrf.mxu0  ;;  %v10309_v26 = vld [vmem:[%s13777_s9 + $0x90] ss:$8 sps:$4 sm:$0xff]  }
 0x523   :  { %7207 = vmatmul.mubr.bf16.vlgmr.msra.gmra.mxu1 %v12581_v18  ;;  %v6962_v32 = vpop.f32.mrf.mxu1  ;;  %v10267_v18 = vld [vmem:[%s13777_s9 + $0x70] ss:$8 sps:$4 sm:$0xff]  }
 0x524   :  { %v13539_v34 = vadd.f32 %v6962_v32, %v6922_v5  ;;  %7271 = vmatpush1.bf16.msra.mxu1 %v6636_v56  ;;  %v13541_v4 = vpop.f32.mrf.mxu0  ;;  %7288 = vmatprep.mubr.bf16.mxu1 %v10377_v55  ;;  %v10303_v5 = vld [vmem:[%s13777_s9 + $0xb0] ss:$8 sps:$4 sm:$0xff]   ;;  %v10314_v56 = vld [vmem:[%s13777_s9 + $0x84] ss:$8 sps:$4 sm:$0xff]  }
 0x525   :  { %v6964_v37 = vpop.f32.mrf.mxu1  ;;  %7620 = vmatprep.subr.bf16.mxu1 %v10269_v27  ;;  %v7004_v27 = vadd.f32 %v13432_v35, %v4366_v33  ;;  %v10330_v35 = vld [vmem:[%s13777_s9 + $0x120] ss:$8 sps:$4 sm:$0xff]  }
 0x526   :  { %v6965_v36 = vadd.f32 %v6964_v37, %v6924_v22  ;;  %v7089_v15 = vpop.f32.mrf.mxu0  ;;  %v7006_v37 = vadd.f32 %v13437_v57, %v4370_v25  ;;  %v10344_v33 = vld [vmem:[%s13779_s11 + $0x28] sm:$0xff]   ;;  %v10345_v25 = vld [vmem:[%s13779_s11 + $0x20] sm:$0xff]  }
 0x527   :  { %v6966_v13 = vpop.f32.mrf.mxu1  ;;  %v7297_v15 = vmax.f32 %v13539_v34, 0.0  ;;  %v10333_v34 = vld [vmem:[%s13777_s9 + $0x110] ss:$8 sps:$4 sm:$0xff]  }
 0x528   :  { %v7298_v39 = vmax.f32 %v6965_v36, 0.0  ;;  %v7090_v20 = vpop.f32.mrf.mxu0 }
 0x529   :  { %v6967_v11 = vpop.f32.mrf.mxu1 }
 0x52a   :  { %v7302_v19 = vpack.c.bf16 %v7298_v39, %v7298_v39  ;;  %v10335_v11 = vld [vmem:[%s13777_s9 + $0x114] ss:$8 sps:$4 sm:$0xff]  }
 0x52b   :  { %8812 = vmatmul.mubr.msk.bf16.vlgmr.msra.gmra.mxu1 %vm6625_vm5, %v13009_v12  ;;  %v10323_v12 = vld [vmem:[%s13777_s9 + $0x154] ss:$8 sps:$4 sm:$0xff]  }
 0x52c   :  { %7621 = vmatpush1.bf16.msra.mxu1 %v10267_v18  ;;  %7652 = vmatprep.mubr.bf16.mxu1 %v7302_v19  ;;  %v10336_v19 = vld [vmem:[%s13777_s9 + $0x100] ss:$8 sps:$4 sm:$0xff]  }
 0x52d   :  { %7622 = vmatprep.subr.bf16.mxu1 %v10272_v50  ;;  %7665 = vmatprep.subr.bf16.mxu0 %v10323_v12  ;;  %v7301_v50 = vpack.c.bf16 %v7297_v15, %v7297_v15 }
 0x52e   :  { %7666 = vmatpush1.bf16.msra.mxu0 %v10321_v45 }
 0x52f   :  { %7667 = vmatprep.subr.bf16.mxu0 %v10326_v29 }
 0x530   :  { %7623 = vmatpush1.bf16.msra.mxu1 %v10270_v17  ;;  %v10339_v17 = vld [vmem:[%s13777_s9 + $0x180] ss:$8 sps:$4 sm:$0xff]  }
 0x531   :  { %7624 = vmatprep.subr.bf16.mxu1 %v10275_v41 }
 0x532   :  { %7668 = vmatpush1.bf16.msra.mxu0 %v10324_v38 }
 0x533   :  { %7669 = vmatprep.subr.bf16.mxu0 %v10329_v7 }
 0x534   :  { %7625 = vmatpush1.bf16.msra.mxu1 %v10273_v43 }
 0x535   :  { %7626 = vmatprep.subr.bf16.mxu1 %v10278_v44 }
 0x536   :  { %7670 = vmatpush1.bf16.msra.mxu0 %v10327_v48 }
 0x537   :  { %7671 = vmatprep.subr.bf16.mxu0 %v10332_v3 }
 0x538   :  { %7627 = vmatpush1.bf16.msra.mxu1 %v10276_v28 }
 0x539   :  { %7628 = vmatprep.subr.bf16.mxu1 %v10281_v6 }
 0x53a   :  { %7672 = vmatpush1.bf16.msra.mxu0 %v10330_v35  ;;  %v10353_v35 = vld [vmem:[%s13779_s11 + $0x48] sm:$0xff]  }
 0x53b   :  { %7673 = vmatprep.subr.bf16.mxu0 %v10335_v11 }
 0x53c   :  { %7629 = vmatpush1.bf16.msra.mxu1 %v10279_v46 }
 0x53d   :  { %7630 = vmatprep.subr.bf16.mxu1 %v10284_v47 }
 0x53e   :  { %7674 = vmatpush1.bf16.msra.mxu0 %v10333_v34 }
 0x53f   :  { %7675 = vmatprep.subr.bf16.mxu0 %v10338_v23 }
 0x540   :  { %7631 = vmatpush1.bf16.msra.mxu1 %v10282_v49 }
 0x541   :  { %7632 = vmatprep.subr.bf16.mxu1 %v10287_v9 }
 0x542   :  { %7676 = vmatpush1.bf16.msra.mxu0 %v10336_v19 }
 0x543   :  { %7691 = vmatprep.subr.bf16.mxu0 %v10341_v42 }
 0x544   :  { %7633 = vmatpush1.bf16.msra.mxu1 %v10285_v51 }
 0x545   :  { %7634 = vmatprep.subr.bf16.mxu1 %v10290_v1 }
 0x546   :  { %7692 = vmatpush2.bf16.msra.mxu0 %v10339_v17 }
 0x547   :  { %7819 = vmatprep.subr.bf16.mxu0 %v10377_v55 }
 0x548   :  { %7635 = vmatpush1.bf16.msra.mxu1 %v10288_v40 }
 0x549   :  { %7636 = vmatprep.subr.bf16.mxu1 %v10293_v58 }
 0x54c   :  { %7637 = vmatpush2.bf16.msra.mxu1 %v10291_v21 }
 0x54d   :  { %7638 = vmatprep.subr.bf16.mxu1 %v10296_v2 }
 0x550   :  { %7639 = vmatpush2.bf16.msra.mxu1 %v10294_v54 }
 0x551   :  { %7640 = vmatprep.subr.bf16.mxu1 %v10299_v10 }
 0x554   :  { %7641 = vmatpush2.bf16.msra.mxu1 %v10297_v0 }
 0x555   :  { %7642 = vmatprep.subr.bf16.mxu1 %v10302_v16 }
 0x558   :  { %7643 = vmatpush2.bf16.msra.mxu1 %v10300_v63 }
 0x559   :  { %7644 = vmatprep.subr.bf16.mxu1 %v10305_v24 }
 0x55c   :  { %7645 = vmatpush2.bf16.msra.mxu1 %v10303_v5 }
 0x55d   :  { %7646 = vmatprep.subr.bf16.mxu1 %v10308_v30  ;;  %v10342_v30 = vld [vmem:[%s13779_s11 + $0x38] sm:$0xff]  }
 0x560   :  { %7647 = vmatpush2.bf16.msra.mxu1 %v10306_v14 }
 0x561   :  { %7648 = vmatprep.subr.bf16.mxu1 %v10311_v8  ;;  %v10343_v8 = vld [vmem:[%s13779_s11 + $0x30] sm:$0xff]  }
 0x562   :  { %v7167_v32 = vpop.f32.mrf.mxu0 }
 0x563   :  { %v7044_v22 = vpop.f32.mrf.mxu1 }
 0x564   :  { %v7045_v59 = vadd.f32 %v7044_v22, %v7004_v27  ;;  %7649 = vmatpush2.bf16.msra.mxu1 %v10309_v26  ;;  %v7169_v36 = vpop.f32.mrf.mxu0  ;;  %v10346_v26 = vld [vmem:[%s13779_s11 + $0x18] sm:$0xff]   ;;  %v10348_v27 = vld [vmem:[%s13779_s11 + $0x8] sm:$0xff]   ;;  %v10350_v22 = vld [vmem:[%s13779_s11 + $0x60] ss:$0 sps:$4 sm:$0xff]  }
 0x565   :  { %v7046_v13 = vpop.f32.mrf.mxu1  ;;  %7650 = vmatprep.subr.bf16.mxu1 %v10314_v56  ;;  %v10347_v56 = vld [vmem:[%s13779_s11 + $0x10] sm:$0xff]  }
 0x566   :  { %v7047_v57 = vadd.f32 %v7046_v13, %v7006_v37  ;;  %v7171_v39 = vpop.f32.mrf.mxu0  ;;  %v7086_v41 = vadd.f32 %v13535_v31, %v7045_v59  ;;  %v7817_v37 = vsel %vm733_vm2, %v10350_v22, 0  ;;  %v10351_v59 = vld [vmem:[%s13779_s11 + $0x58] sm:$0xff]  }
 0x567   :  { %v7048_v20 = vpop.f32.mrf.mxu1  ;;  %v7355_v39 = vld [vmem:[%s13778_s10] sm:$0x3] }
 0x568   :  { %7651 = vmatpush2.bf16.msra.mxu1 %v10312_v61  ;;  %v7172_v18 = vpop.f32.mrf.mxu0  ;;  %v7088_v44 = vadd.f32 %v13541_v4, %v7047_v57  ;;  %v10354_v57 = vld [vmem:[%s13779_s11 + $0x40] sm:$0xff]   ;;  %v7360_v20 = vrot.slane %v7355_v39, %v10748_v52 }
 0x569   :  { %v7049_v62 = vpop.f32.mrf.mxu1  ;;  %v7364_v18 = vrot.slane %v7355_v39, %v10751_v53  ;;  %v8864_v52 = vld [vmem:[%s13780_s12] ss:$0 sm:$0xff] }
 0x56b   :  { %7653 = vmatmul.mubr.bf16.vlgmr.msra.gmra.mxu1 %v7301_v50 }
 0x5a2   :  { %v7249_v60 = vpop.f32.mrf.mxu0 }
 0x5a3   :  { %v7126_v12 = vpop.f32.mrf.mxu1 }
 0x5a4   :  { %v7127_v43 = vadd.f32 %v7126_v12, %v7086_v41  ;;  %v7251_v45 = vpop.f32.mrf.mxu0 }
 0x5a5   :  { %v7128_v29 = vpop.f32.mrf.mxu1 }
 0x5a6   :  { %v7129_v28 = vadd.f32 %v7128_v29, %v7088_v44  ;;  %v7253_v6 = vpop.f32.mrf.mxu0  ;;  %v7168_v48 = vadd.f32 %v7167_v32, %v7127_v43  ;;  %v10349_v32 = vld [vmem:[%s13779_s11] sm:$0xff]  }
 0x5a7   :  { %v7130_v38 = vpop.f32.mrf.mxu1 }
 0x5a8   :  { %v7254_v7 = vpop.f32.mrf.mxu0  ;;  %v7170_v51 = vadd.f32 %v7169_v36, %v7129_v28  ;;  %v10352_v36 = vld [vmem:[%s13779_s11 + $0x50] sm:$0xff]  }
 0x5a9   :  { %v7131_v46 = vpop.f32.mrf.mxu1 }
 0x5e3   :  { %v7208_v47 = vpop.f32.mrf.mxu1 }
 0x5e4   :  { %v7209_v9 = vadd.f32 %v7208_v47, %v7168_v48 }
 0x5e5   :  { %v7210_v49 = vpop.f32.mrf.mxu1 }
 0x5e6   :  { %v7211_v40 = vadd.f32 %v7210_v49, %v7170_v51  ;;  %v7250_v58 = vadd.f32 %v7249_v60, %v7209_v9 }
 0x5e7   :  { %v7212_v1 = vpop.f32.mrf.mxu1 }
 0x5e8   :  { %v7252_v54 = vadd.f32 %v7251_v45, %v7211_v40 }
 0x5e9   :  { %v7213_v31 = vpop.f32.mrf.mxu1 }
 0x5eb   :  { %v7290_v21 = vpop.f32.mrf.mxu1 }
 0x5ec   :  { %v7291_v2 = vadd.f32 %v7290_v21, %v7250_v58 }
 0x5ed   :  { %v7292_v4 = vpop.f32.mrf.mxu1 }
 0x5ee   :  { %v7293_v10 = vadd.f32 %v7292_v4, %v7252_v54  ;;  %v7299_v0 = vmax.f32 %v7291_v2, 0.0 }
 0x5ef   :  { %v7294_v16 = vpop.f32.mrf.mxu1 }
 0x5f0   :  { %v7300_v63 = vmax.f32 %v7293_v10, 0.0  ;;  %v7303_v14 = vpack.c.bf16 %v7299_v0, %v7299_v0 }
 0x5f1   :  { %v7295_v24 = vpop.f32.mrf.mxu1 }
 0x5f2   :  { %v7304_v5 = vpack.c.bf16 %v7300_v63, %v7300_v63 }
 0x5f4   :  { %8863 = vmatprep.mubr.msk.bf16.mxu0 %vm3215_vm4, %v7304_v5 }
 0x5f5   :  { %7694 = vmatmul.mubr.bf16.vlgmr.msra.gmra.mxu0 %v7303_v14 }
 0x5f6   :  { %7820 = vmatpush1.bf16.msra.mxu0 %v10342_v30 }
 0x5f7   :  { %7821 = vmatprep.subr.bf16.mxu0 %v10377_v55 }
 0x5fa   :  { %7822 = vmatpush1.bf16.msra.mxu0 %v10343_v8 }
 0x5fb   :  { %7823 = vmatprep.subr.bf16.mxu0 %v10377_v55 }
 0x5fe   :  { %7824 = vmatpush1.bf16.msra.mxu0 %v10344_v33 }
 0x5ff   :  { %7825 = vmatprep.subr.bf16.mxu0 %v10377_v55 }
 0x602   :  { %7826 = vmatpush1.bf16.msra.mxu0 %v10345_v25 }
 0x603   :  { %7827 = vmatprep.subr.bf16.mxu0 %v10377_v55 }
 0x606   :  { %7828 = vmatpush1.bf16.msra.mxu0 %v10346_v26 }
 0x607   :  { %7829 = vmatprep.subr.bf16.mxu0 %v10377_v55 }
 0x60a   :  { %7830 = vmatpush1.bf16.msra.mxu0 %v10347_v56 }
 0x60b   :  { %7831 = vmatprep.subr.bf16.mxu0 %v10377_v55 }
 0x60e   :  { %7832 = vmatpush1.bf16.msra.mxu0 %v10348_v27 }
 0x60f   :  { %7833 = vmatprep.subr.bf16.mxu0 %v10377_v55 }
 0x612   :  { %7834 = vmatpush1.bf16.msra.mxu0 %v10349_v32 }
 0x613   :  { %7841 = vmatprep.subr.bf16.mxu0 %v10377_v55 }
 0x616   :  { %7842 = vmatpush2.bf16.msra.mxu0 %v7817_v37 }
 0x617   :  { %7843 = vmatprep.subr.bf16.mxu0 %v10377_v55 }
 0x61a   :  { %7844 = vmatpush2.bf16.msra.mxu0 %v10351_v59 }
 0x61b   :  { %7845 = vmatprep.subr.bf16.mxu0 %v10377_v55 }
 0x61e   :  { %7846 = vmatpush2.bf16.msra.mxu0 %v10352_v36 }
 0x61f   :  { %7847 = vmatprep.subr.bf16.mxu0 %v10377_v55 }
 0x622   :  { %7848 = vmatpush2.bf16.msra.mxu0 %v10353_v35 }
 0x623   :  { %7849 = vmatprep.subr.bf16.mxu0 %v10377_v55 }
 0x626   :  { %7850 = vmatpush2.bf16.msra.mxu0 %v10354_v57 }
 0x62b   :  { %v7654_v61 = vpop.f32.mrf.mxu1 }
 0x62c   :  { %v7655_v11 = vadd.f32 %v7654_v61, %v7360_v20 }
 0x62d   :  { %v7656_v3 = vpop.f32.mrf.mxu1 }
 0x62e   :  { %v7657_v62 = vadd.f32 %v7656_v3, %v7364_v18 }
 0x62f   :  { %v7658_v15 = vpop.f32.mrf.mxu1 }
 0x631   :  { %v7659_v13 = vpop.f32.mrf.mxu1 }
 0x6b5   :  { %v7695_v50 = vpop.f32.mrf.mxu0 }
 0x6b6   :  { %v7696_v34 = vadd.f32 %v7695_v50, %v7655_v11 }
 0x6b7   :  { %v7697_v23 = vpop.f32.mrf.mxu0 }
 0x6b8   :  { %v7698_v19 = vadd.f32 %v7697_v23, %v7657_v62  ;;  %v7702_v55 = vmax.f32 %v7696_v34, 0.0 }
 0x6b9   :  { %v7699_v42 = vpop.f32.mrf.mxu0 }
 0x6ba   :  { %v7703_v17 = vmax.f32 %v7698_v19, 0.0  ;;  %v7704_v12 = vpack.c.bf16 %v7702_v55, %v7702_v55 }
 0x6bb   :  { %v7700_v41 = vpop.f32.mrf.mxu0 }
 0x6bc   :  { %v7705_v60 = vpack.c.bf16 %v7703_v17, %v7703_v17 }
 0x6be   :  { %8878 = vmatprep.mubr.msk.bf16.mxu0 %vm729_vm3, %v7705_v60 }
 0x6bf   :  { %7852 = vmatmul.mubr.bf16.vlgmr.msra.gmra.mxu0 %v7704_v12 }
 0x77f   :  { %v7853_v53 = vpop.f32.mrf.mxu0 }
 0x780   :  { %v7854_v43 = vadd.f32 %v8864_v52, %v7853_v53 }
 0x781   :  { %v7855_v44 = vpop.f32.mrf.mxu0 }
 0x782   :  { %7859 = vst [vmem:[#allocation2] sm:$0xff] %v7854_v43 }
 0x783   :  { %v7856_v45 = vpop.f32.mrf.mxu0 }
 0x784   :  { %10366 = shalt.err (!%p10363_p4)
}
 0x785   :  { %7869 = dma.vmem_to_hbm [thread:$0]  %s7867_s21, 128, %s13781_s13, [#allocation3]   ;;  %v7857_v29 = vpop.f32.mrf.mxu0 }
 0x786   :  { %10375 = dma.done.wait [#allocation3], 128  }
 0x787   :  { %10376 = vsyncadd [#allocation3], 4294967168 }
 0x788   :  { %7873 = vsyncpa [#allocation3], 1 }

</bundles_post_ra>
